<compile_context>
chip_gen: v5e
topology: v5e:2x2
jax: 0.10.0
libtpu: 0.0.40
codegen_flags: <defaults>
</compile_context>

<pallas_src>
import functools
import math

import jax
import jax.numpy as jnp
from jax.experimental import pallas as pl
from jax.experimental.pallas import tpu as pltpu

_CHEB = (676.5203681218851, -1259.1392167224028, 771.3234287776531,
         -176.6150291621406, 12.507343278686905, -0.13857109526572012,
         9.984369578019572e-06, 1.5056327351493116e-07)
_SQRT_TWO_PI = math.sqrt(2.0 * math.pi)
_F32_MAX = float(jnp.finfo(jnp.float32).max)
_ROWS = 8            # sublane-dense row block (f32 vreg = 8 x 128)
_SERIES_TERMS = 8    # same 8-term truncated series as the torch module


# --------------------------------------------------------------------------
# Per-row scalar math (operates on [rows, 1] tensors -> negligible cost)
# --------------------------------------------------------------------------
def _gamma(z):
    """Lanczos approximation of Gamma(z) (same coefficients as the module)."""
    x = jnp.full_like(z, 0.9999999999998099)
    for i in range(8):
        x = x + _CHEB[i] / (z + (i + 1.0))
    t = z + 8.0 - 0.5
    y = _SQRT_TWO_PI * jnp.power(t, z + 0.5) * jnp.exp(-t) * x
    return y / z


def _trigamma(x):
    z = x + 1.0
    zz = z * z
    a = 0.2 - 1.0 / (7.0 * zz)
    b = 1.0 - a / zz
    c = 1.0 + b / (3.0 * z)
    d = 1.0 + c / (2.0 * z)
    e = d / z
    return e + 1.0 / (x * x)


def _digamma(x):
    # torch.digamma has no direct Pallas lowering; recurrence + asymptotic
    # series (~1e-7 abs error for x > 0), plenty for the Newton iteration.
    acc = jnp.zeros_like(x)
    for i in range(6):
        acc = acc + 1.0 / (x + float(i))
    z = x + 6.0
    inv = 1.0 / z
    inv2 = inv * inv
    psi = (jnp.log(z) - 0.5 * inv
           - inv2 * (1.0 / 12.0 - inv2 * (1.0 / 120.0 - inv2 * (1.0 / 252.0))))
    return psi - acc


def _k_update(k, s):
    nm = jnp.log(k) - _digamma(k) - s
    dn = 1.0 / k - _trigamma(k)
    return k - nm / dn


# --------------------------------------------------------------------------
# Kernel
# --------------------------------------------------------------------------
def _gamma_norm_kernel(x_ref, o_ref, *, n_valid, n_pad):
    x = x_ref[...]                                    # (ROWS, n_pad) f32 tile
    inv_n = jnp.float32(1.0 / n_valid)

    if n_pad != n_valid:                              # lane mask for padding
        lane = jax.lax.broadcasted_iota(jnp.int32, x.shape, 1)
        valid = lane < n_valid
        x_for_min = jnp.where(valid, x, jnp.float32(jnp.inf))
    else:
        valid = None
        x_for_min = x

    # ---- per-row statistics (reduce over the pixel / lane axis) ----
    row_min = jnp.min(x_for_min, axis=-1, keepdims=True)
    x1 = x - row_min + 1e-07                          # forward offset
    x2 = x1 + 1e-07                                   # ML-estimation offset
    log_x2 = jnp.log(x2)                              # reused for the CDF
    if valid is not None:
        x2_sum = jnp.sum(jnp.where(valid, x2, 0.0), axis=-1, keepdims=True)
        log_sum = jnp.sum(jnp.where(valid, log_x2, 0.0), axis=-1, keepdims=True)
    else:
        x2_sum = jnp.sum(x2, axis=-1, keepdims=True)
        log_sum = jnp.sum(log_x2, axis=-1, keepdims=True)
    mean_x2 = x2_sum * inv_n
    s = jnp.log(mean_x2) - log_sum * inv_n

    # ---- Gamma shape k: closed-form init + 10 Newton-Raphson steps ----
    s3 = s - 3.0
    rt = jnp.sqrt(s3 * s3 + 24.0 * s)
    k = (3.0 - s + rt) / (12.0 * s) + 1e-07
    for _ in range(10):
        k = _k_update(k, s)
    k = jnp.clip(k, 1e-07, 18.0)

    # th = mean_x2 / k  ->  y = x1 / th = x1 * (k / mean_x2)
    inv_th = k * pl.reciprocal(mean_x2, approx=False)         # (ROWS, 1)

    # ---- regularized lower-incomplete-gamma series, Gamma(k) cancelled ----
    #   P(k, y) ~= exp(k*log(y) - y) * sum_{n=0}^{7} y^n / Gamma(k + n + 1)
    gs = _gamma(k) * k                                # Gamma(k + 1)
    coeffs = [1.0 / gs]                               # per-row scalars
    for n in range(1, _SERIES_TERMS):
        gs = gs * (k + float(n))
        coeffs.append(1.0 / gs)

    y = x1 * inv_th
    log_y = log_x2 + jnp.log(inv_th)                  # reuse per-pixel log
    poly = coeffs[_SERIES_TERMS - 1]
    for n in range(_SERIES_TERMS - 2, -1, -1):        # Horner: mul+add only
        poly = poly * y + coeffs[n]
    out = jnp.exp(k * log_y - y) * poly               # one exp per pixel

    # Degenerate rows (all pixels equal -> s == 0 -> NaN) squash to 0,
    # matching the torch isfinite gate.
    finite = jnp.abs(out) <= jnp.float32(_F32_MAX)
    o_ref[...] = jnp.where(finite, out, jnp.zeros_like(out)).astype(o_ref.dtype)


# --------------------------------------------------------------------------
# Wrapper
# --------------------------------------------------------------------------
def gamma_norm_2d(x):
    """x: [B, H, W] float32, values >= 0. Returns [B, H, W] in ~[0, 1]."""
    B, H, W = x.shape
    n = H * W
    x2d = x.reshape(B, n).astype(jnp.float32)

    n_pad = ((n + 127) // 128) * 128                  # lane-dense pixel axis
    b_pad = ((B + _ROWS - 1) // _ROWS) * _ROWS        # sublane-dense rows
    if n_pad != n or b_pad != B:
        # Edge padding keeps padded rows/pixels finite & positive (no NaNs);
        # padded pixels are masked out of the statistics in-kernel and padded
        # rows are sliced off below.
        x2d = jnp.pad(x2d, ((0, b_pad - B), (0, n_pad - n)), mode="edge")

    kernel = functools.partial(_gamma_norm_kernel, n_valid=n, n_pad=n_pad)
    # TODO(synk): for very large images (H*W >~ 128K on v5e/v7x) split the
    # pixel axis with a two-pass stats/squash grid instead of one row tile.
    out = pl.pallas_call(
        kernel,
        out_shape=jax.ShapeDtypeStruct((b_pad, n_pad), jnp.float32),
        grid_spec=pltpu.PrefetchScalarGridSpec(
            num_scalar_prefetch=0,
            grid=(b_pad // _ROWS,),
            in_specs=[pl.BlockSpec((_ROWS, n_pad), lambda b: (b, 0))],
            out_specs=pl.BlockSpec((_ROWS, n_pad), lambda b: (b, 0)),
        ),
        compiler_params=pltpu.CompilerParams(
            dimension_semantics=("parallel",)),
    )(x2d)
    return out[:B, :n].reshape(B, H, W)


# --------------------------------------------------------------------------
# Pure-JAX reference (faithful to the torch module's formulation)
# --------------------------------------------------------------------------
def _lower_incl_gamma_ref(s, x, iters=8):
    iters = iters - 2
    gs = _gamma(s)
    L = jnp.power(x, s) * gs * jnp.exp(-x)
    gs = gs * s
    R = (1.0 / gs) * jnp.ones_like(x)
    X = x
    for m in range(iters):
        gs = gs * (s + m + 1.0)
        R = R + X / gs
        X = X * x
    gs = gs * (s + iters + 1.0)
    R = R + X / gs
    return L * R


def gamma_norm_2d_ref(x):
    B, H, W = x.shape
    xr = x.reshape(B, H * W).astype(jnp.float32)
    x1 = xr - jnp.min(xr, axis=-1, keepdims=True) + 1e-07
    x2 = x1 + 1e-07
    mean_x = jnp.mean(x2, axis=-1, keepdims=True)
    s = jnp.log(mean_x) - jnp.mean(jnp.log(x2), axis=-1, keepdims=True)
    s3 = s - 3.0
    rt = jnp.sqrt(s3 * s3 + 24.0 * s)
    k = (3.0 - s + rt) / (12.0 * s) + 1e-07
    for _ in range(10):
        k = _k_update(k, s)
    k = jnp.clip(k, 1e-07, 18.0)
    th = (1.0 / k) * mean_x
    out = (1.0 / _gamma(k)) * _lower_incl_gamma_ref(k, x1 / th)
    finite = jnp.abs(out) <= jnp.float32(_F32_MAX)
    out = jnp.where(finite, out, jnp.zeros_like(out))
    return out.reshape(B, H, W)


if __name__ == "__main__":
    key = jax.random.PRNGKey(0)
    # positive real-valued "saliency map", shape [B, H, W]
    x = jax.random.uniform(key, (2, 16, 16), dtype=jnp.float32,
                           minval=0.0, maxval=5.0)

    y = jax.block_until_ready(gamma_norm_2d(x))
    y_ref = jax.block_until_ready(gamma_norm_2d_ref(x))

    assert y.shape == (2, 16, 16)
    assert bool(jnp.all(jnp.isfinite(y)))
    assert bool(jnp.all((y >= -1e-3) & (y <= 1.0 + 1e-3)))
    assert bool(jnp.allclose(y, y_ref, rtol=2e-3, atol=2e-3))
    print("KERNEL_OK")
</pallas_src>

<mosaic_0001>
module attributes {stable_mosaic.version = 11 : i64} {
  func.func @_gamma_norm_kernel(%arg0: i32, %arg1: memref<8x256xf32, #tpu.memory_space<vmem>>, %arg2: memref<8x256xf32, #tpu.memory_space<vmem>>) attributes {dimension_semantics = [#tpu.dimension_semantics<parallel>], iteration_bounds = array<i64: 1>, scalar_prefetch = 0 : i64, scratch_operands = 0 : i64, tpu.core_type = #tpu.core_type<tc>, window_params = [{transform_indices = @transform_0, window_bounds = array<i64: 8, 256>}, {transform_indices = @transform_1, window_bounds = array<i64: 8, 256>}]} {
    %c0 = arith.constant 0 : index
    %c0_0 = arith.constant 0 : index
    %0 = vector.load %arg1[%c0, %c0_0] : memref<8x256xf32, #tpu.memory_space<vmem>>, vector<8x256xf32>
    %cst = arith.constant dense<0x7F800000> : vector<8xf32>
    %1 = vector.multi_reduction <minimumf>, %0, %cst [1] : vector<8x256xf32> to vector<8xf32>
    %2 = vector.shape_cast %1 : vector<8xf32> to vector<8x1xf32>
    %3 = vector.broadcast %2 : vector<8x1xf32> to vector<8x256xf32>
    %4 = arith.subf %0, %3 : vector<8x256xf32>
    %cst_1 = arith.constant 1.000000e-07 : f32
    %5 = vector.broadcast %cst_1 : f32 to vector<8x256xf32>
    %6 = arith.addf %4, %5 : vector<8x256xf32>
    %cst_2 = arith.constant 1.000000e-07 : f32
    %7 = vector.broadcast %cst_2 : f32 to vector<8x256xf32>
    %8 = arith.addf %6, %7 : vector<8x256xf32>
    %9 = math.log %8 : vector<8x256xf32>
    %cst_3 = arith.constant dense<0.000000e+00> : vector<8xf32>
    %10 = vector.multi_reduction <add>, %8, %cst_3 [1] : vector<8x256xf32> to vector<8xf32>
    %11 = vector.shape_cast %10 : vector<8xf32> to vector<8x1xf32>
    %cst_4 = arith.constant dense<0.000000e+00> : vector<8xf32>
    %12 = vector.multi_reduction <add>, %9, %cst_4 [1] : vector<8x256xf32> to vector<8xf32>
    %13 = vector.shape_cast %12 : vector<8xf32> to vector<8x1xf32>
    %cst_5 = arith.constant 3.906250e-03 : f32
    %14 = vector.broadcast %cst_5 : f32 to vector<8x1xf32>
    %15 = arith.mulf %11, %14 : vector<8x1xf32>
    %16 = math.log %15 : vector<8x1xf32>
    %cst_6 = arith.constant 3.906250e-03 : f32
    %17 = vector.broadcast %cst_6 : f32 to vector<8x1xf32>
    %18 = arith.mulf %13, %17 : vector<8x1xf32>
    %19 = arith.subf %16, %18 : vector<8x1xf32>
    %cst_7 = arith.constant 3.000000e+00 : f32
    %20 = vector.broadcast %cst_7 : f32 to vector<8x1xf32>
    %21 = arith.subf %19, %20 : vector<8x1xf32>
    %22 = arith.mulf %21, %21 : vector<8x1xf32>
    %cst_8 = arith.constant 2.400000e+01 : f32
    %23 = vector.broadcast %cst_8 : f32 to vector<8x1xf32>
    %24 = arith.mulf %23, %19 : vector<8x1xf32>
    %25 = arith.addf %22, %24 : vector<8x1xf32>
    %26 = math.sqrt %25 : vector<8x1xf32>
    %cst_9 = arith.constant 3.000000e+00 : f32
    %27 = vector.broadcast %cst_9 : f32 to vector<8x1xf32>
    %28 = arith.subf %27, %19 : vector<8x1xf32>
    %29 = arith.addf %28, %26 : vector<8x1xf32>
    %cst_10 = arith.constant 1.200000e+01 : f32
    %30 = vector.broadcast %cst_10 : f32 to vector<8x1xf32>
    %31 = arith.mulf %30, %19 : vector<8x1xf32>
    %32 = arith.divf %29, %31 : vector<8x1xf32>
    %cst_11 = arith.constant 1.000000e-07 : f32
    %33 = vector.broadcast %cst_11 : f32 to vector<8x1xf32>
    %34 = arith.addf %32, %33 : vector<8x1xf32>
    %35 = math.log %34 : vector<8x1xf32>
    %cst_12 = arith.constant 0.000000e+00 : f32
    %36 = vector.broadcast %cst_12 : f32 to vector<8x1xf32>
    %cst_13 = arith.constant 0.000000e+00 : f32
    %37 = vector.broadcast %cst_13 : f32 to vector<8x1xf32>
    %38 = arith.addf %34, %37 : vector<8x1xf32>
    %cst_14 = arith.constant 1.000000e+00 : f32
    %39 = vector.broadcast %cst_14 : f32 to vector<8x1xf32>
    %40 = arith.divf %39, %38 : vector<8x1xf32>
    %41 = arith.addf %36, %40 : vector<8x1xf32>
    %cst_15 = arith.constant 1.000000e+00 : f32
    %42 = vector.broadcast %cst_15 : f32 to vector<8x1xf32>
    %43 = arith.addf %34, %42 : vector<8x1xf32>
    %cst_16 = arith.constant 1.000000e+00 : f32
    %44 = vector.broadcast %cst_16 : f32 to vector<8x1xf32>
    %45 = arith.divf %44, %43 : vector<8x1xf32>
    %46 = arith.addf %41, %45 : vector<8x1xf32>
    %cst_17 = arith.constant 2.000000e+00 : f32
    %47 = vector.broadcast %cst_17 : f32 to vector<8x1xf32>
    %48 = arith.addf %34, %47 : vector<8x1xf32>
    %cst_18 = arith.constant 1.000000e+00 : f32
    %49 = vector.broadcast %cst_18 : f32 to vector<8x1xf32>
    %50 = arith.divf %49, %48 : vector<8x1xf32>
    %51 = arith.addf %46, %50 : vector<8x1xf32>
    %cst_19 = arith.constant 3.000000e+00 : f32
    %52 = vector.broadcast %cst_19 : f32 to vector<8x1xf32>
    %53 = arith.addf %34, %52 : vector<8x1xf32>
    %cst_20 = arith.constant 1.000000e+00 : f32
    %54 = vector.broadcast %cst_20 : f32 to vector<8x1xf32>
    %55 = arith.divf %54, %53 : vector<8x1xf32>
    %56 = arith.addf %51, %55 : vector<8x1xf32>
    %cst_21 = arith.constant 4.000000e+00 : f32
    %57 = vector.broadcast %cst_21 : f32 to vector<8x1xf32>
    %58 = arith.addf %34, %57 : vector<8x1xf32>
    %cst_22 = arith.constant 1.000000e+00 : f32
    %59 = vector.broadcast %cst_22 : f32 to vector<8x1xf32>
    %60 = arith.divf %59, %58 : vector<8x1xf32>
    %61 = arith.addf %56, %60 : vector<8x1xf32>
    %cst_23 = arith.constant 5.000000e+00 : f32
    %62 = vector.broadcast %cst_23 : f32 to vector<8x1xf32>
    %63 = arith.addf %34, %62 : vector<8x1xf32>
    %cst_24 = arith.constant 1.000000e+00 : f32
    %64 = vector.broadcast %cst_24 : f32 to vector<8x1xf32>
    %65 = arith.divf %64, %63 : vector<8x1xf32>
    %66 = arith.addf %61, %65 : vector<8x1xf32>
    %cst_25 = arith.constant 6.000000e+00 : f32
    %67 = vector.broadcast %cst_25 : f32 to vector<8x1xf32>
    %68 = arith.addf %34, %67 : vector<8x1xf32>
    %cst_26 = arith.constant 1.000000e+00 : f32
    %69 = vector.broadcast %cst_26 : f32 to vector<8x1xf32>
    %70 = arith.divf %69, %68 : vector<8x1xf32>
    %71 = arith.mulf %70, %70 : vector<8x1xf32>
    %72 = math.log %68 : vector<8x1xf32>
    %cst_27 = arith.constant 5.000000e-01 : f32
    %73 = vector.broadcast %cst_27 : f32 to vector<8x1xf32>
    %74 = arith.mulf %73, %70 : vector<8x1xf32>
    %75 = arith.subf %72, %74 : vector<8x1xf32>
    %cst_28 = arith.constant 0.0039682542 : f32
    %76 = vector.broadcast %cst_28 : f32 to vector<8x1xf32>
    %77 = arith.mulf %71, %76 : vector<8x1xf32>
    %cst_29 = arith.constant 0.00833333377 : f32
    %78 = vector.broadcast %cst_29 : f32 to vector<8x1xf32>
    %79 = arith.subf %78, %77 : vector<8x1xf32>
    %80 = arith.mulf %71, %79 : vector<8x1xf32>
    %cst_30 = arith.constant 0.0833333358 : f32
    %81 = vector.broadcast %cst_30 : f32 to vector<8x1xf32>
    %82 = arith.subf %81, %80 : vector<8x1xf32>
    %83 = arith.mulf %71, %82 : vector<8x1xf32>
    %84 = arith.subf %75, %83 : vector<8x1xf32>
    %85 = arith.subf %84, %66 : vector<8x1xf32>
    %86 = arith.subf %35, %85 : vector<8x1xf32>
    %87 = arith.subf %86, %19 : vector<8x1xf32>
    %cst_31 = arith.constant 1.000000e+00 : f32
    %88 = vector.broadcast %cst_31 : f32 to vector<8x1xf32>
    %89 = arith.divf %88, %34 : vector<8x1xf32>
    %cst_32 = arith.constant 1.000000e+00 : f32
    %90 = vector.broadcast %cst_32 : f32 to vector<8x1xf32>
    %91 = arith.addf %34, %90 : vector<8x1xf32>
    %92 = arith.mulf %91, %91 : vector<8x1xf32>
    %cst_33 = arith.constant 7.000000e+00 : f32
    %93 = vector.broadcast %cst_33 : f32 to vector<8x1xf32>
    %94 = arith.mulf %93, %92 : vector<8x1xf32>
    %cst_34 = arith.constant 1.000000e+00 : f32
    %95 = vector.broadcast %cst_34 : f32 to vector<8x1xf32>
    %96 = arith.divf %95, %94 : vector<8x1xf32>
    %cst_35 = arith.constant 2.000000e-01 : f32
    %97 = vector.broadcast %cst_35 : f32 to vector<8x1xf32>
    %98 = arith.subf %97, %96 : vector<8x1xf32>
    %99 = arith.divf %98, %92 : vector<8x1xf32>
    %cst_36 = arith.constant 1.000000e+00 : f32
    %100 = vector.broadcast %cst_36 : f32 to vector<8x1xf32>
    %101 = arith.subf %100, %99 : vector<8x1xf32>
    %cst_37 = arith.constant 3.000000e+00 : f32
    %102 = vector.broadcast %cst_37 : f32 to vector<8x1xf32>
    %103 = arith.mulf %102, %91 : vector<8x1xf32>
    %104 = arith.divf %101, %103 : vector<8x1xf32>
    %cst_38 = arith.constant 1.000000e+00 : f32
    %105 = vector.broadcast %cst_38 : f32 to vector<8x1xf32>
    %106 = arith.addf %105, %104 : vector<8x1xf32>
    %cst_39 = arith.constant 2.000000e+00 : f32
    %107 = vector.broadcast %cst_39 : f32 to vector<8x1xf32>
    %108 = arith.mulf %107, %91 : vector<8x1xf32>
    %109 = arith.divf %106, %108 : vector<8x1xf32>
    %cst_40 = arith.constant 1.000000e+00 : f32
    %110 = vector.broadcast %cst_40 : f32 to vector<8x1xf32>
    %111 = arith.addf %110, %109 : vector<8x1xf32>
    %112 = arith.divf %111, %91 : vector<8x1xf32>
    %113 = arith.mulf %34, %34 : vector<8x1xf32>
    %cst_41 = arith.constant 1.000000e+00 : f32
    %114 = vector.broadcast %cst_41 : f32 to vector<8x1xf32>
    %115 = arith.divf %114, %113 : vector<8x1xf32>
    %116 = arith.addf %112, %115 : vector<8x1xf32>
    %117 = arith.subf %89, %116 : vector<8x1xf32>
    %118 = arith.divf %87, %117 : vector<8x1xf32>
    %119 = arith.subf %34, %118 : vector<8x1xf32>
    %120 = math.log %119 : vector<8x1xf32>
    %cst_42 = arith.constant 0.000000e+00 : f32
    %121 = vector.broadcast %cst_42 : f32 to vector<8x1xf32>
    %cst_43 = arith.constant 0.000000e+00 : f32
    %122 = vector.broadcast %cst_43 : f32 to vector<8x1xf32>
    %123 = arith.addf %119, %122 : vector<8x1xf32>
    %cst_44 = arith.constant 1.000000e+00 : f32
    %124 = vector.broadcast %cst_44 : f32 to vector<8x1xf32>
    %125 = arith.divf %124, %123 : vector<8x1xf32>
    %126 = arith.addf %121, %125 : vector<8x1xf32>
    %cst_45 = arith.constant 1.000000e+00 : f32
    %127 = vector.broadcast %cst_45 : f32 to vector<8x1xf32>
    %128 = arith.addf %119, %127 : vector<8x1xf32>
    %cst_46 = arith.constant 1.000000e+00 : f32
    %129 = vector.broadcast %cst_46 : f32 to vector<8x1xf32>
    %130 = arith.divf %129, %128 : vector<8x1xf32>
    %131 = arith.addf %126, %130 : vector<8x1xf32>
    %cst_47 = arith.constant 2.000000e+00 : f32
    %132 = vector.broadcast %cst_47 : f32 to vector<8x1xf32>
    %133 = arith.addf %119, %132 : vector<8x1xf32>
    %cst_48 = arith.constant 1.000000e+00 : f32
    %134 = vector.broadcast %cst_48 : f32 to vector<8x1xf32>
    %135 = arith.divf %134, %133 : vector<8x1xf32>
    %136 = arith.addf %131, %135 : vector<8x1xf32>
    %cst_49 = arith.constant 3.000000e+00 : f32
    %137 = vector.broadcast %cst_49 : f32 to vector<8x1xf32>
    %138 = arith.addf %119, %137 : vector<8x1xf32>
    %cst_50 = arith.constant 1.000000e+00 : f32
    %139 = vector.broadcast %cst_50 : f32 to vector<8x1xf32>
    %140 = arith.divf %139, %138 : vector<8x1xf32>
    %141 = arith.addf %136, %140 : vector<8x1xf32>
    %cst_51 = arith.constant 4.000000e+00 : f32
    %142 = vector.broadcast %cst_51 : f32 to vector<8x1xf32>
    %143 = arith.addf %119, %142 : vector<8x1xf32>
    %cst_52 = arith.constant 1.000000e+00 : f32
    %144 = vector.broadcast %cst_52 : f32 to vector<8x1xf32>
    %145 = arith.divf %144, %143 : vector<8x1xf32>
    %146 = arith.addf %141, %145 : vector<8x1xf32>
    %cst_53 = arith.constant 5.000000e+00 : f32
    %147 = vector.broadcast %cst_53 : f32 to vector<8x1xf32>
    %148 = arith.addf %119, %147 : vector<8x1xf32>
    %cst_54 = arith.constant 1.000000e+00 : f32
    %149 = vector.broadcast %cst_54 : f32 to vector<8x1xf32>
    %150 = arith.divf %149, %148 : vector<8x1xf32>
    %151 = arith.addf %146, %150 : vector<8x1xf32>
    %cst_55 = arith.constant 6.000000e+00 : f32
    %152 = vector.broadcast %cst_55 : f32 to vector<8x1xf32>
    %153 = arith.addf %119, %152 : vector<8x1xf32>
    %cst_56 = arith.constant 1.000000e+00 : f32
    %154 = vector.broadcast %cst_56 : f32 to vector<8x1xf32>
    %155 = arith.divf %154, %153 : vector<8x1xf32>
    %156 = arith.mulf %155, %155 : vector<8x1xf32>
    %157 = math.log %153 : vector<8x1xf32>
    %cst_57 = arith.constant 5.000000e-01 : f32
    %158 = vector.broadcast %cst_57 : f32 to vector<8x1xf32>
    %159 = arith.mulf %158, %155 : vector<8x1xf32>
    %160 = arith.subf %157, %159 : vector<8x1xf32>
    %cst_58 = arith.constant 0.0039682542 : f32
    %161 = vector.broadcast %cst_58 : f32 to vector<8x1xf32>
    %162 = arith.mulf %156, %161 : vector<8x1xf32>
    %cst_59 = arith.constant 0.00833333377 : f32
    %163 = vector.broadcast %cst_59 : f32 to vector<8x1xf32>
    %164 = arith.subf %163, %162 : vector<8x1xf32>
    %165 = arith.mulf %156, %164 : vector<8x1xf32>
    %cst_60 = arith.constant 0.0833333358 : f32
    %166 = vector.broadcast %cst_60 : f32 to vector<8x1xf32>
    %167 = arith.subf %166, %165 : vector<8x1xf32>
    %168 = arith.mulf %156, %167 : vector<8x1xf32>
    %169 = arith.subf %160, %168 : vector<8x1xf32>
    %170 = arith.subf %169, %151 : vector<8x1xf32>
    %171 = arith.subf %120, %170 : vector<8x1xf32>
    %172 = arith.subf %171, %19 : vector<8x1xf32>
    %cst_61 = arith.constant 1.000000e+00 : f32
    %173 = vector.broadcast %cst_61 : f32 to vector<8x1xf32>
    %174 = arith.divf %173, %119 : vector<8x1xf32>
    %cst_62 = arith.constant 1.000000e+00 : f32
    %175 = vector.broadcast %cst_62 : f32 to vector<8x1xf32>
    %176 = arith.addf %119, %175 : vector<8x1xf32>
    %177 = arith.mulf %176, %176 : vector<8x1xf32>
    %cst_63 = arith.constant 7.000000e+00 : f32
    %178 = vector.broadcast %cst_63 : f32 to vector<8x1xf32>
    %179 = arith.mulf %178, %177 : vector<8x1xf32>
    %cst_64 = arith.constant 1.000000e+00 : f32
    %180 = vector.broadcast %cst_64 : f32 to vector<8x1xf32>
    %181 = arith.divf %180, %179 : vector<8x1xf32>
    %cst_65 = arith.constant 2.000000e-01 : f32
    %182 = vector.broadcast %cst_65 : f32 to vector<8x1xf32>
    %183 = arith.subf %182, %181 : vector<8x1xf32>
    %184 = arith.divf %183, %177 : vector<8x1xf32>
    %cst_66 = arith.constant 1.000000e+00 : f32
    %185 = vector.broadcast %cst_66 : f32 to vector<8x1xf32>
    %186 = arith.subf %185, %184 : vector<8x1xf32>
    %cst_67 = arith.constant 3.000000e+00 : f32
    %187 = vector.broadcast %cst_67 : f32 to vector<8x1xf32>
    %188 = arith.mulf %187, %176 : vector<8x1xf32>
    %189 = arith.divf %186, %188 : vector<8x1xf32>
    %cst_68 = arith.constant 1.000000e+00 : f32
    %190 = vector.broadcast %cst_68 : f32 to vector<8x1xf32>
    %191 = arith.addf %190, %189 : vector<8x1xf32>
    %cst_69 = arith.constant 2.000000e+00 : f32
    %192 = vector.broadcast %cst_69 : f32 to vector<8x1xf32>
    %193 = arith.mulf %192, %176 : vector<8x1xf32>
    %194 = arith.divf %191, %193 : vector<8x1xf32>
    %cst_70 = arith.constant 1.000000e+00 : f32
    %195 = vector.broadcast %cst_70 : f32 to vector<8x1xf32>
    %196 = arith.addf %195, %194 : vector<8x1xf32>
    %197 = arith.divf %196, %176 : vector<8x1xf32>
    %198 = arith.mulf %119, %119 : vector<8x1xf32>
    %cst_71 = arith.constant 1.000000e+00 : f32
    %199 = vector.broadcast %cst_71 : f32 to vector<8x1xf32>
    %200 = arith.divf %199, %198 : vector<8x1xf32>
    %201 = arith.addf %197, %200 : vector<8x1xf32>
    %202 = arith.subf %174, %201 : vector<8x1xf32>
    %203 = arith.divf %172, %202 : vector<8x1xf32>
    %204 = arith.subf %119, %203 : vector<8x1xf32>
    %205 = math.log %204 : vector<8x1xf32>
    %cst_72 = arith.constant 0.000000e+00 : f32
    %206 = vector.broadcast %cst_72 : f32 to vector<8x1xf32>
    %cst_73 = arith.constant 0.000000e+00 : f32
    %207 = vector.broadcast %cst_73 : f32 to vector<8x1xf32>
    %208 = arith.addf %204, %207 : vector<8x1xf32>
    %cst_74 = arith.constant 1.000000e+00 : f32
    %209 = vector.broadcast %cst_74 : f32 to vector<8x1xf32>
    %210 = arith.divf %209, %208 : vector<8x1xf32>
    %211 = arith.addf %206, %210 : vector<8x1xf32>
    %cst_75 = arith.constant 1.000000e+00 : f32
    %212 = vector.broadcast %cst_75 : f32 to vector<8x1xf32>
    %213 = arith.addf %204, %212 : vector<8x1xf32>
    %cst_76 = arith.constant 1.000000e+00 : f32
    %214 = vector.broadcast %cst_76 : f32 to vector<8x1xf32>
    %215 = arith.divf %214, %213 : vector<8x1xf32>
    %216 = arith.addf %211, %215 : vector<8x1xf32>
    %cst_77 = arith.constant 2.000000e+00 : f32
    %217 = vector.broadcast %cst_77 : f32 to vector<8x1xf32>
    %218 = arith.addf %204, %217 : vector<8x1xf32>
    %cst_78 = arith.constant 1.000000e+00 : f32
    %219 = vector.broadcast %cst_78 : f32 to vector<8x1xf32>
    %220 = arith.divf %219, %218 : vector<8x1xf32>
    %221 = arith.addf %216, %220 : vector<8x1xf32>
    %cst_79 = arith.constant 3.000000e+00 : f32
    %222 = vector.broadcast %cst_79 : f32 to vector<8x1xf32>
    %223 = arith.addf %204, %222 : vector<8x1xf32>
    %cst_80 = arith.constant 1.000000e+00 : f32
    %224 = vector.broadcast %cst_80 : f32 to vector<8x1xf32>
    %225 = arith.divf %224, %223 : vector<8x1xf32>
    %226 = arith.addf %221, %225 : vector<8x1xf32>
    %cst_81 = arith.constant 4.000000e+00 : f32
    %227 = vector.broadcast %cst_81 : f32 to vector<8x1xf32>
    %228 = arith.addf %204, %227 : vector<8x1xf32>
    %cst_82 = arith.constant 1.000000e+00 : f32
    %229 = vector.broadcast %cst_82 : f32 to vector<8x1xf32>
    %230 = arith.divf %229, %228 : vector<8x1xf32>
    %231 = arith.addf %226, %230 : vector<8x1xf32>
    %cst_83 = arith.constant 5.000000e+00 : f32
    %232 = vector.broadcast %cst_83 : f32 to vector<8x1xf32>
    %233 = arith.addf %204, %232 : vector<8x1xf32>
    %cst_84 = arith.constant 1.000000e+00 : f32
    %234 = vector.broadcast %cst_84 : f32 to vector<8x1xf32>
    %235 = arith.divf %234, %233 : vector<8x1xf32>
    %236 = arith.addf %231, %235 : vector<8x1xf32>
    %cst_85 = arith.constant 6.000000e+00 : f32
    %237 = vector.broadcast %cst_85 : f32 to vector<8x1xf32>
    %238 = arith.addf %204, %237 : vector<8x1xf32>
    %cst_86 = arith.constant 1.000000e+00 : f32
    %239 = vector.broadcast %cst_86 : f32 to vector<8x1xf32>
    %240 = arith.divf %239, %238 : vector<8x1xf32>
    %241 = arith.mulf %240, %240 : vector<8x1xf32>
    %242 = math.log %238 : vector<8x1xf32>
    %cst_87 = arith.constant 5.000000e-01 : f32
    %243 = vector.broadcast %cst_87 : f32 to vector<8x1xf32>
    %244 = arith.mulf %243, %240 : vector<8x1xf32>
    %245 = arith.subf %242, %244 : vector<8x1xf32>
    %cst_88 = arith.constant 0.0039682542 : f32
    %246 = vector.broadcast %cst_88 : f32 to vector<8x1xf32>
    %247 = arith.mulf %241, %246 : vector<8x1xf32>
    %cst_89 = arith.constant 0.00833333377 : f32
    %248 = vector.broadcast %cst_89 : f32 to vector<8x1xf32>
    %249 = arith.subf %248, %247 : vector<8x1xf32>
    %250 = arith.mulf %241, %249 : vector<8x1xf32>
    %cst_90 = arith.constant 0.0833333358 : f32
    %251 = vector.broadcast %cst_90 : f32 to vector<8x1xf32>
    %252 = arith.subf %251, %250 : vector<8x1xf32>
    %253 = arith.mulf %241, %252 : vector<8x1xf32>
    %254 = arith.subf %245, %253 : vector<8x1xf32>
    %255 = arith.subf %254, %236 : vector<8x1xf32>
    %256 = arith.subf %205, %255 : vector<8x1xf32>
    %257 = arith.subf %256, %19 : vector<8x1xf32>
    %cst_91 = arith.constant 1.000000e+00 : f32
    %258 = vector.broadcast %cst_91 : f32 to vector<8x1xf32>
    %259 = arith.divf %258, %204 : vector<8x1xf32>
    %cst_92 = arith.constant 1.000000e+00 : f32
    %260 = vector.broadcast %cst_92 : f32 to vector<8x1xf32>
    %261 = arith.addf %204, %260 : vector<8x1xf32>
    %262 = arith.mulf %261, %261 : vector<8x1xf32>
    %cst_93 = arith.constant 7.000000e+00 : f32
    %263 = vector.broadcast %cst_93 : f32 to vector<8x1xf32>
    %264 = arith.mulf %263, %262 : vector<8x1xf32>
    %cst_94 = arith.constant 1.000000e+00 : f32
    %265 = vector.broadcast %cst_94 : f32 to vector<8x1xf32>
    %266 = arith.divf %265, %264 : vector<8x1xf32>
    %cst_95 = arith.constant 2.000000e-01 : f32
    %267 = vector.broadcast %cst_95 : f32 to vector<8x1xf32>
    %268 = arith.subf %267, %266 : vector<8x1xf32>
    %269 = arith.divf %268, %262 : vector<8x1xf32>
    %cst_96 = arith.constant 1.000000e+00 : f32
    %270 = vector.broadcast %cst_96 : f32 to vector<8x1xf32>
    %271 = arith.subf %270, %269 : vector<8x1xf32>
    %cst_97 = arith.constant 3.000000e+00 : f32
    %272 = vector.broadcast %cst_97 : f32 to vector<8x1xf32>
    %273 = arith.mulf %272, %261 : vector<8x1xf32>
    %274 = arith.divf %271, %273 : vector<8x1xf32>
    %cst_98 = arith.constant 1.000000e+00 : f32
    %275 = vector.broadcast %cst_98 : f32 to vector<8x1xf32>
    %276 = arith.addf %275, %274 : vector<8x1xf32>
    %cst_99 = arith.constant 2.000000e+00 : f32
    %277 = vector.broadcast %cst_99 : f32 to vector<8x1xf32>
    %278 = arith.mulf %277, %261 : vector<8x1xf32>
    %279 = arith.divf %276, %278 : vector<8x1xf32>
    %cst_100 = arith.constant 1.000000e+00 : f32
    %280 = vector.broadcast %cst_100 : f32 to vector<8x1xf32>
    %281 = arith.addf %280, %279 : vector<8x1xf32>
    %282 = arith.divf %281, %261 : vector<8x1xf32>
    %283 = arith.mulf %204, %204 : vector<8x1xf32>
    %cst_101 = arith.constant 1.000000e+00 : f32
    %284 = vector.broadcast %cst_101 : f32 to vector<8x1xf32>
    %285 = arith.divf %284, %283 : vector<8x1xf32>
    %286 = arith.addf %282, %285 : vector<8x1xf32>
    %287 = arith.subf %259, %286 : vector<8x1xf32>
    %288 = arith.divf %257, %287 : vector<8x1xf32>
    %289 = arith.subf %204, %288 : vector<8x1xf32>
    %290 = math.log %289 : vector<8x1xf32>
    %cst_102 = arith.constant 0.000000e+00 : f32
    %291 = vector.broadcast %cst_102 : f32 to vector<8x1xf32>
    %cst_103 = arith.constant 0.000000e+00 : f32
    %292 = vector.broadcast %cst_103 : f32 to vector<8x1xf32>
    %293 = arith.addf %289, %292 : vector<8x1xf32>
    %cst_104 = arith.constant 1.000000e+00 : f32
    %294 = vector.broadcast %cst_104 : f32 to vector<8x1xf32>
    %295 = arith.divf %294, %293 : vector<8x1xf32>
    %296 = arith.addf %291, %295 : vector<8x1xf32>
    %cst_105 = arith.constant 1.000000e+00 : f32
    %297 = vector.broadcast %cst_105 : f32 to vector<8x1xf32>
    %298 = arith.addf %289, %297 : vector<8x1xf32>
    %cst_106 = arith.constant 1.000000e+00 : f32
    %299 = vector.broadcast %cst_106 : f32 to vector<8x1xf32>
    %300 = arith.divf %299, %298 : vector<8x1xf32>
    %301 = arith.addf %296, %300 : vector<8x1xf32>
    %cst_107 = arith.constant 2.000000e+00 : f32
    %302 = vector.broadcast %cst_107 : f32 to vector<8x1xf32>
    %303 = arith.addf %289, %302 : vector<8x1xf32>
    %cst_108 = arith.constant 1.000000e+00 : f32
    %304 = vector.broadcast %cst_108 : f32 to vector<8x1xf32>
    %305 = arith.divf %304, %303 : vector<8x1xf32>
    %306 = arith.addf %301, %305 : vector<8x1xf32>
    %cst_109 = arith.constant 3.000000e+00 : f32
    %307 = vector.broadcast %cst_109 : f32 to vector<8x1xf32>
    %308 = arith.addf %289, %307 : vector<8x1xf32>
    %cst_110 = arith.constant 1.000000e+00 : f32
    %309 = vector.broadcast %cst_110 : f32 to vector<8x1xf32>
    %310 = arith.divf %309, %308 : vector<8x1xf32>
    %311 = arith.addf %306, %310 : vector<8x1xf32>
    %cst_111 = arith.constant 4.000000e+00 : f32
    %312 = vector.broadcast %cst_111 : f32 to vector<8x1xf32>
    %313 = arith.addf %289, %312 : vector<8x1xf32>
    %cst_112 = arith.constant 1.000000e+00 : f32
    %314 = vector.broadcast %cst_112 : f32 to vector<8x1xf32>
    %315 = arith.divf %314, %313 : vector<8x1xf32>
    %316 = arith.addf %311, %315 : vector<8x1xf32>
    %cst_113 = arith.constant 5.000000e+00 : f32
    %317 = vector.broadcast %cst_113 : f32 to vector<8x1xf32>
    %318 = arith.addf %289, %317 : vector<8x1xf32>
    %cst_114 = arith.constant 1.000000e+00 : f32
    %319 = vector.broadcast %cst_114 : f32 to vector<8x1xf32>
    %320 = arith.divf %319, %318 : vector<8x1xf32>
    %321 = arith.addf %316, %320 : vector<8x1xf32>
    %cst_115 = arith.constant 6.000000e+00 : f32
    %322 = vector.broadcast %cst_115 : f32 to vector<8x1xf32>
    %323 = arith.addf %289, %322 : vector<8x1xf32>
    %cst_116 = arith.constant 1.000000e+00 : f32
    %324 = vector.broadcast %cst_116 : f32 to vector<8x1xf32>
    %325 = arith.divf %324, %323 : vector<8x1xf32>
    %326 = arith.mulf %325, %325 : vector<8x1xf32>
    %327 = math.log %323 : vector<8x1xf32>
    %cst_117 = arith.constant 5.000000e-01 : f32
    %328 = vector.broadcast %cst_117 : f32 to vector<8x1xf32>
    %329 = arith.mulf %328, %325 : vector<8x1xf32>
    %330 = arith.subf %327, %329 : vector<8x1xf32>
    %cst_118 = arith.constant 0.0039682542 : f32
    %331 = vector.broadcast %cst_118 : f32 to vector<8x1xf32>
    %332 = arith.mulf %326, %331 : vector<8x1xf32>
    %cst_119 = arith.constant 0.00833333377 : f32
    %333 = vector.broadcast %cst_119 : f32 to vector<8x1xf32>
    %334 = arith.subf %333, %332 : vector<8x1xf32>
    %335 = arith.mulf %326, %334 : vector<8x1xf32>
    %cst_120 = arith.constant 0.0833333358 : f32
    %336 = vector.broadcast %cst_120 : f32 to vector<8x1xf32>
    %337 = arith.subf %336, %335 : vector<8x1xf32>
    %338 = arith.mulf %326, %337 : vector<8x1xf32>
    %339 = arith.subf %330, %338 : vector<8x1xf32>
    %340 = arith.subf %339, %321 : vector<8x1xf32>
    %341 = arith.subf %290, %340 : vector<8x1xf32>
    %342 = arith.subf %341, %19 : vector<8x1xf32>
    %cst_121 = arith.constant 1.000000e+00 : f32
    %343 = vector.broadcast %cst_121 : f32 to vector<8x1xf32>
    %344 = arith.divf %343, %289 : vector<8x1xf32>
    %cst_122 = arith.constant 1.000000e+00 : f32
    %345 = vector.broadcast %cst_122 : f32 to vector<8x1xf32>
    %346 = arith.addf %289, %345 : vector<8x1xf32>
    %347 = arith.mulf %346, %346 : vector<8x1xf32>
    %cst_123 = arith.constant 7.000000e+00 : f32
    %348 = vector.broadcast %cst_123 : f32 to vector<8x1xf32>
    %349 = arith.mulf %348, %347 : vector<8x1xf32>
    %cst_124 = arith.constant 1.000000e+00 : f32
    %350 = vector.broadcast %cst_124 : f32 to vector<8x1xf32>
    %351 = arith.divf %350, %349 : vector<8x1xf32>
    %cst_125 = arith.constant 2.000000e-01 : f32
    %352 = vector.broadcast %cst_125 : f32 to vector<8x1xf32>
    %353 = arith.subf %352, %351 : vector<8x1xf32>
    %354 = arith.divf %353, %347 : vector<8x1xf32>
    %cst_126 = arith.constant 1.000000e+00 : f32
    %355 = vector.broadcast %cst_126 : f32 to vector<8x1xf32>
    %356 = arith.subf %355, %354 : vector<8x1xf32>
    %cst_127 = arith.constant 3.000000e+00 : f32
    %357 = vector.broadcast %cst_127 : f32 to vector<8x1xf32>
    %358 = arith.mulf %357, %346 : vector<8x1xf32>
    %359 = arith.divf %356, %358 : vector<8x1xf32>
    %cst_128 = arith.constant 1.000000e+00 : f32
    %360 = vector.broadcast %cst_128 : f32 to vector<8x1xf32>
    %361 = arith.addf %360, %359 : vector<8x1xf32>
    %cst_129 = arith.constant 2.000000e+00 : f32
    %362 = vector.broadcast %cst_129 : f32 to vector<8x1xf32>
    %363 = arith.mulf %362, %346 : vector<8x1xf32>
    %364 = arith.divf %361, %363 : vector<8x1xf32>
    %cst_130 = arith.constant 1.000000e+00 : f32
    %365 = vector.broadcast %cst_130 : f32 to vector<8x1xf32>
    %366 = arith.addf %365, %364 : vector<8x1xf32>
    %367 = arith.divf %366, %346 : vector<8x1xf32>
    %368 = arith.mulf %289, %289 : vector<8x1xf32>
    %cst_131 = arith.constant 1.000000e+00 : f32
    %369 = vector.broadcast %cst_131 : f32 to vector<8x1xf32>
    %370 = arith.divf %369, %368 : vector<8x1xf32>
    %371 = arith.addf %367, %370 : vector<8x1xf32>
    %372 = arith.subf %344, %371 : vector<8x1xf32>
    %373 = arith.divf %342, %372 : vector<8x1xf32>
    %374 = arith.subf %289, %373 : vector<8x1xf32>
    %375 = math.log %374 : vector<8x1xf32>
    %cst_132 = arith.constant 0.000000e+00 : f32
    %376 = vector.broadcast %cst_132 : f32 to vector<8x1xf32>
    %cst_133 = arith.constant 0.000000e+00 : f32
    %377 = vector.broadcast %cst_133 : f32 to vector<8x1xf32>
    %378 = arith.addf %374, %377 : vector<8x1xf32>
    %cst_134 = arith.constant 1.000000e+00 : f32
    %379 = vector.broadcast %cst_134 : f32 to vector<8x1xf32>
    %380 = arith.divf %379, %378 : vector<8x1xf32>
    %381 = arith.addf %376, %380 : vector<8x1xf32>
    %cst_135 = arith.constant 1.000000e+00 : f32
    %382 = vector.broadcast %cst_135 : f32 to vector<8x1xf32>
    %383 = arith.addf %374, %382 : vector<8x1xf32>
    %cst_136 = arith.constant 1.000000e+00 : f32
    %384 = vector.broadcast %cst_136 : f32 to vector<8x1xf32>
    %385 = arith.divf %384, %383 : vector<8x1xf32>
    %386 = arith.addf %381, %385 : vector<8x1xf32>
    %cst_137 = arith.constant 2.000000e+00 : f32
    %387 = vector.broadcast %cst_137 : f32 to vector<8x1xf32>
    %388 = arith.addf %374, %387 : vector<8x1xf32>
    %cst_138 = arith.constant 1.000000e+00 : f32
    %389 = vector.broadcast %cst_138 : f32 to vector<8x1xf32>
    %390 = arith.divf %389, %388 : vector<8x1xf32>
    %391 = arith.addf %386, %390 : vector<8x1xf32>
    %cst_139 = arith.constant 3.000000e+00 : f32
    %392 = vector.broadcast %cst_139 : f32 to vector<8x1xf32>
    %393 = arith.addf %374, %392 : vector<8x1xf32>
    %cst_140 = arith.constant 1.000000e+00 : f32
    %394 = vector.broadcast %cst_140 : f32 to vector<8x1xf32>
    %395 = arith.divf %394, %393 : vector<8x1xf32>
    %396 = arith.addf %391, %395 : vector<8x1xf32>
    %cst_141 = arith.constant 4.000000e+00 : f32
    %397 = vector.broadcast %cst_141 : f32 to vector<8x1xf32>
    %398 = arith.addf %374, %397 : vector<8x1xf32>
    %cst_142 = arith.constant 1.000000e+00 : f32
    %399 = vector.broadcast %cst_142 : f32 to vector<8x1xf32>
    %400 = arith.divf %399, %398 : vector<8x1xf32>
    %401 = arith.addf %396, %400 : vector<8x1xf32>
    %cst_143 = arith.constant 5.000000e+00 : f32
    %402 = vector.broadcast %cst_143 : f32 to vector<8x1xf32>
    %403 = arith.addf %374, %402 : vector<8x1xf32>
    %cst_144 = arith.constant 1.000000e+00 : f32
    %404 = vector.broadcast %cst_144 : f32 to vector<8x1xf32>
    %405 = arith.divf %404, %403 : vector<8x1xf32>
    %406 = arith.addf %401, %405 : vector<8x1xf32>
    %cst_145 = arith.constant 6.000000e+00 : f32
    %407 = vector.broadcast %cst_145 : f32 to vector<8x1xf32>
    %408 = arith.addf %374, %407 : vector<8x1xf32>
    %cst_146 = arith.constant 1.000000e+00 : f32
    %409 = vector.broadcast %cst_146 : f32 to vector<8x1xf32>
    %410 = arith.divf %409, %408 : vector<8x1xf32>
    %411 = arith.mulf %410, %410 : vector<8x1xf32>
    %412 = math.log %408 : vector<8x1xf32>
    %cst_147 = arith.constant 5.000000e-01 : f32
    %413 = vector.broadcast %cst_147 : f32 to vector<8x1xf32>
    %414 = arith.mulf %413, %410 : vector<8x1xf32>
    %415 = arith.subf %412, %414 : vector<8x1xf32>
    %cst_148 = arith.constant 0.0039682542 : f32
    %416 = vector.broadcast %cst_148 : f32 to vector<8x1xf32>
    %417 = arith.mulf %411, %416 : vector<8x1xf32>
    %cst_149 = arith.constant 0.00833333377 : f32
    %418 = vector.broadcast %cst_149 : f32 to vector<8x1xf32>
    %419 = arith.subf %418, %417 : vector<8x1xf32>
    %420 = arith.mulf %411, %419 : vector<8x1xf32>
    %cst_150 = arith.constant 0.0833333358 : f32
    %421 = vector.broadcast %cst_150 : f32 to vector<8x1xf32>
    %422 = arith.subf %421, %420 : vector<8x1xf32>
    %423 = arith.mulf %411, %422 : vector<8x1xf32>
    %424 = arith.subf %415, %423 : vector<8x1xf32>
    %425 = arith.subf %424, %406 : vector<8x1xf32>
    %426 = arith.subf %375, %425 : vector<8x1xf32>
    %427 = arith.subf %426, %19 : vector<8x1xf32>
    %cst_151 = arith.constant 1.000000e+00 : f32
    %428 = vector.broadcast %cst_151 : f32 to vector<8x1xf32>
    %429 = arith.divf %428, %374 : vector<8x1xf32>
    %cst_152 = arith.constant 1.000000e+00 : f32
    %430 = vector.broadcast %cst_152 : f32 to vector<8x1xf32>
    %431 = arith.addf %374, %430 : vector<8x1xf32>
    %432 = arith.mulf %431, %431 : vector<8x1xf32>
    %cst_153 = arith.constant 7.000000e+00 : f32
    %433 = vector.broadcast %cst_153 : f32 to vector<8x1xf32>
    %434 = arith.mulf %433, %432 : vector<8x1xf32>
    %cst_154 = arith.constant 1.000000e+00 : f32
    %435 = vector.broadcast %cst_154 : f32 to vector<8x1xf32>
    %436 = arith.divf %435, %434 : vector<8x1xf32>
    %cst_155 = arith.constant 2.000000e-01 : f32
    %437 = vector.broadcast %cst_155 : f32 to vector<8x1xf32>
    %438 = arith.subf %437, %436 : vector<8x1xf32>
    %439 = arith.divf %438, %432 : vector<8x1xf32>
    %cst_156 = arith.constant 1.000000e+00 : f32
    %440 = vector.broadcast %cst_156 : f32 to vector<8x1xf32>
    %441 = arith.subf %440, %439 : vector<8x1xf32>
    %cst_157 = arith.constant 3.000000e+00 : f32
    %442 = vector.broadcast %cst_157 : f32 to vector<8x1xf32>
    %443 = arith.mulf %442, %431 : vector<8x1xf32>
    %444 = arith.divf %441, %443 : vector<8x1xf32>
    %cst_158 = arith.constant 1.000000e+00 : f32
    %445 = vector.broadcast %cst_158 : f32 to vector<8x1xf32>
    %446 = arith.addf %445, %444 : vector<8x1xf32>
    %cst_159 = arith.constant 2.000000e+00 : f32
    %447 = vector.broadcast %cst_159 : f32 to vector<8x1xf32>
    %448 = arith.mulf %447, %431 : vector<8x1xf32>
    %449 = arith.divf %446, %448 : vector<8x1xf32>
    %cst_160 = arith.constant 1.000000e+00 : f32
    %450 = vector.broadcast %cst_160 : f32 to vector<8x1xf32>
    %451 = arith.addf %450, %449 : vector<8x1xf32>
    %452 = arith.divf %451, %431 : vector<8x1xf32>
    %453 = arith.mulf %374, %374 : vector<8x1xf32>
    %cst_161 = arith.constant 1.000000e+00 : f32
    %454 = vector.broadcast %cst_161 : f32 to vector<8x1xf32>
    %455 = arith.divf %454, %453 : vector<8x1xf32>
    %456 = arith.addf %452, %455 : vector<8x1xf32>
    %457 = arith.subf %429, %456 : vector<8x1xf32>
    %458 = arith.divf %427, %457 : vector<8x1xf32>
    %459 = arith.subf %374, %458 : vector<8x1xf32>
    %460 = math.log %459 : vector<8x1xf32>
    %cst_162 = arith.constant 0.000000e+00 : f32
    %461 = vector.broadcast %cst_162 : f32 to vector<8x1xf32>
    %cst_163 = arith.constant 0.000000e+00 : f32
    %462 = vector.broadcast %cst_163 : f32 to vector<8x1xf32>
    %463 = arith.addf %459, %462 : vector<8x1xf32>
    %cst_164 = arith.constant 1.000000e+00 : f32
    %464 = vector.broadcast %cst_164 : f32 to vector<8x1xf32>
    %465 = arith.divf %464, %463 : vector<8x1xf32>
    %466 = arith.addf %461, %465 : vector<8x1xf32>
    %cst_165 = arith.constant 1.000000e+00 : f32
    %467 = vector.broadcast %cst_165 : f32 to vector<8x1xf32>
    %468 = arith.addf %459, %467 : vector<8x1xf32>
    %cst_166 = arith.constant 1.000000e+00 : f32
    %469 = vector.broadcast %cst_166 : f32 to vector<8x1xf32>
    %470 = arith.divf %469, %468 : vector<8x1xf32>
    %471 = arith.addf %466, %470 : vector<8x1xf32>
    %cst_167 = arith.constant 2.000000e+00 : f32
    %472 = vector.broadcast %cst_167 : f32 to vector<8x1xf32>
    %473 = arith.addf %459, %472 : vector<8x1xf32>
    %cst_168 = arith.constant 1.000000e+00 : f32
    %474 = vector.broadcast %cst_168 : f32 to vector<8x1xf32>
    %475 = arith.divf %474, %473 : vector<8x1xf32>
    %476 = arith.addf %471, %475 : vector<8x1xf32>
    %cst_169 = arith.constant 3.000000e+00 : f32
    %477 = vector.broadcast %cst_169 : f32 to vector<8x1xf32>
    %478 = arith.addf %459, %477 : vector<8x1xf32>
    %cst_170 = arith.constant 1.000000e+00 : f32
    %479 = vector.broadcast %cst_170 : f32 to vector<8x1xf32>
    %480 = arith.divf %479, %478 : vector<8x1xf32>
    %481 = arith.addf %476, %480 : vector<8x1xf32>
    %cst_171 = arith.constant 4.000000e+00 : f32
    %482 = vector.broadcast %cst_171 : f32 to vector<8x1xf32>
    %483 = arith.addf %459, %482 : vector<8x1xf32>
    %cst_172 = arith.constant 1.000000e+00 : f32
    %484 = vector.broadcast %cst_172 : f32 to vector<8x1xf32>
    %485 = arith.divf %484, %483 : vector<8x1xf32>
    %486 = arith.addf %481, %485 : vector<8x1xf32>
    %cst_173 = arith.constant 5.000000e+00 : f32
    %487 = vector.broadcast %cst_173 : f32 to vector<8x1xf32>
    %488 = arith.addf %459, %487 : vector<8x1xf32>
    %cst_174 = arith.constant 1.000000e+00 : f32
    %489 = vector.broadcast %cst_174 : f32 to vector<8x1xf32>
    %490 = arith.divf %489, %488 : vector<8x1xf32>
    %491 = arith.addf %486, %490 : vector<8x1xf32>
    %cst_175 = arith.constant 6.000000e+00 : f32
    %492 = vector.broadcast %cst_175 : f32 to vector<8x1xf32>
    %493 = arith.addf %459, %492 : vector<8x1xf32>
    %cst_176 = arith.constant 1.000000e+00 : f32
    %494 = vector.broadcast %cst_176 : f32 to vector<8x1xf32>
    %495 = arith.divf %494, %493 : vector<8x1xf32>
    %496 = arith.mulf %495, %495 : vector<8x1xf32>
    %497 = math.log %493 : vector<8x1xf32>
    %cst_177 = arith.constant 5.000000e-01 : f32
    %498 = vector.broadcast %cst_177 : f32 to vector<8x1xf32>
    %499 = arith.mulf %498, %495 : vector<8x1xf32>
    %500 = arith.subf %497, %499 : vector<8x1xf32>
    %cst_178 = arith.constant 0.0039682542 : f32
    %501 = vector.broadcast %cst_178 : f32 to vector<8x1xf32>
    %502 = arith.mulf %496, %501 : vector<8x1xf32>
    %cst_179 = arith.constant 0.00833333377 : f32
    %503 = vector.broadcast %cst_179 : f32 to vector<8x1xf32>
    %504 = arith.subf %503, %502 : vector<8x1xf32>
    %505 = arith.mulf %496, %504 : vector<8x1xf32>
    %cst_180 = arith.constant 0.0833333358 : f32
    %506 = vector.broadcast %cst_180 : f32 to vector<8x1xf32>
    %507 = arith.subf %506, %505 : vector<8x1xf32>
    %508 = arith.mulf %496, %507 : vector<8x1xf32>
    %509 = arith.subf %500, %508 : vector<8x1xf32>
    %510 = arith.subf %509, %491 : vector<8x1xf32>
    %511 = arith.subf %460, %510 : vector<8x1xf32>
    %512 = arith.subf %511, %19 : vector<8x1xf32>
    %cst_181 = arith.constant 1.000000e+00 : f32
    %513 = vector.broadcast %cst_181 : f32 to vector<8x1xf32>
    %514 = arith.divf %513, %459 : vector<8x1xf32>
    %cst_182 = arith.constant 1.000000e+00 : f32
    %515 = vector.broadcast %cst_182 : f32 to vector<8x1xf32>
    %516 = arith.addf %459, %515 : vector<8x1xf32>
    %517 = arith.mulf %516, %516 : vector<8x1xf32>
    %cst_183 = arith.constant 7.000000e+00 : f32
    %518 = vector.broadcast %cst_183 : f32 to vector<8x1xf32>
    %519 = arith.mulf %518, %517 : vector<8x1xf32>
    %cst_184 = arith.constant 1.000000e+00 : f32
    %520 = vector.broadcast %cst_184 : f32 to vector<8x1xf32>
    %521 = arith.divf %520, %519 : vector<8x1xf32>
    %cst_185 = arith.constant 2.000000e-01 : f32
    %522 = vector.broadcast %cst_185 : f32 to vector<8x1xf32>
    %523 = arith.subf %522, %521 : vector<8x1xf32>
    %524 = arith.divf %523, %517 : vector<8x1xf32>
    %cst_186 = arith.constant 1.000000e+00 : f32
    %525 = vector.broadcast %cst_186 : f32 to vector<8x1xf32>
    %526 = arith.subf %525, %524 : vector<8x1xf32>
    %cst_187 = arith.constant 3.000000e+00 : f32
    %527 = vector.broadcast %cst_187 : f32 to vector<8x1xf32>
    %528 = arith.mulf %527, %516 : vector<8x1xf32>
    %529 = arith.divf %526, %528 : vector<8x1xf32>
    %cst_188 = arith.constant 1.000000e+00 : f32
    %530 = vector.broadcast %cst_188 : f32 to vector<8x1xf32>
    %531 = arith.addf %530, %529 : vector<8x1xf32>
    %cst_189 = arith.constant 2.000000e+00 : f32
    %532 = vector.broadcast %cst_189 : f32 to vector<8x1xf32>
    %533 = arith.mulf %532, %516 : vector<8x1xf32>
    %534 = arith.divf %531, %533 : vector<8x1xf32>
    %cst_190 = arith.constant 1.000000e+00 : f32
    %535 = vector.broadcast %cst_190 : f32 to vector<8x1xf32>
    %536 = arith.addf %535, %534 : vector<8x1xf32>
    %537 = arith.divf %536, %516 : vector<8x1xf32>
    %538 = arith.mulf %459, %459 : vector<8x1xf32>
    %cst_191 = arith.constant 1.000000e+00 : f32
    %539 = vector.broadcast %cst_191 : f32 to vector<8x1xf32>
    %540 = arith.divf %539, %538 : vector<8x1xf32>
    %541 = arith.addf %537, %540 : vector<8x1xf32>
    %542 = arith.subf %514, %541 : vector<8x1xf32>
    %543 = arith.divf %512, %542 : vector<8x1xf32>
    %544 = arith.subf %459, %543 : vector<8x1xf32>
    %545 = math.log %544 : vector<8x1xf32>
    %cst_192 = arith.constant 0.000000e+00 : f32
    %546 = vector.broadcast %cst_192 : f32 to vector<8x1xf32>
    %cst_193 = arith.constant 0.000000e+00 : f32
    %547 = vector.broadcast %cst_193 : f32 to vector<8x1xf32>
    %548 = arith.addf %544, %547 : vector<8x1xf32>
    %cst_194 = arith.constant 1.000000e+00 : f32
    %549 = vector.broadcast %cst_194 : f32 to vector<8x1xf32>
    %550 = arith.divf %549, %548 : vector<8x1xf32>
    %551 = arith.addf %546, %550 : vector<8x1xf32>
    %cst_195 = arith.constant 1.000000e+00 : f32
    %552 = vector.broadcast %cst_195 : f32 to vector<8x1xf32>
    %553 = arith.addf %544, %552 : vector<8x1xf32>
    %cst_196 = arith.constant 1.000000e+00 : f32
    %554 = vector.broadcast %cst_196 : f32 to vector<8x1xf32>
    %555 = arith.divf %554, %553 : vector<8x1xf32>
    %556 = arith.addf %551, %555 : vector<8x1xf32>
    %cst_197 = arith.constant 2.000000e+00 : f32
    %557 = vector.broadcast %cst_197 : f32 to vector<8x1xf32>
    %558 = arith.addf %544, %557 : vector<8x1xf32>
    %cst_198 = arith.constant 1.000000e+00 : f32
    %559 = vector.broadcast %cst_198 : f32 to vector<8x1xf32>
    %560 = arith.divf %559, %558 : vector<8x1xf32>
    %561 = arith.addf %556, %560 : vector<8x1xf32>
    %cst_199 = arith.constant 3.000000e+00 : f32
    %562 = vector.broadcast %cst_199 : f32 to vector<8x1xf32>
    %563 = arith.addf %544, %562 : vector<8x1xf32>
    %cst_200 = arith.constant 1.000000e+00 : f32
    %564 = vector.broadcast %cst_200 : f32 to vector<8x1xf32>
    %565 = arith.divf %564, %563 : vector<8x1xf32>
    %566 = arith.addf %561, %565 : vector<8x1xf32>
    %cst_201 = arith.constant 4.000000e+00 : f32
    %567 = vector.broadcast %cst_201 : f32 to vector<8x1xf32>
    %568 = arith.addf %544, %567 : vector<8x1xf32>
    %cst_202 = arith.constant 1.000000e+00 : f32
    %569 = vector.broadcast %cst_202 : f32 to vector<8x1xf32>
    %570 = arith.divf %569, %568 : vector<8x1xf32>
    %571 = arith.addf %566, %570 : vector<8x1xf32>
    %cst_203 = arith.constant 5.000000e+00 : f32
    %572 = vector.broadcast %cst_203 : f32 to vector<8x1xf32>
    %573 = arith.addf %544, %572 : vector<8x1xf32>
    %cst_204 = arith.constant 1.000000e+00 : f32
    %574 = vector.broadcast %cst_204 : f32 to vector<8x1xf32>
    %575 = arith.divf %574, %573 : vector<8x1xf32>
    %576 = arith.addf %571, %575 : vector<8x1xf32>
    %cst_205 = arith.constant 6.000000e+00 : f32
    %577 = vector.broadcast %cst_205 : f32 to vector<8x1xf32>
    %578 = arith.addf %544, %577 : vector<8x1xf32>
    %cst_206 = arith.constant 1.000000e+00 : f32
    %579 = vector.broadcast %cst_206 : f32 to vector<8x1xf32>
    %580 = arith.divf %579, %578 : vector<8x1xf32>
    %581 = arith.mulf %580, %580 : vector<8x1xf32>
    %582 = math.log %578 : vector<8x1xf32>
    %cst_207 = arith.constant 5.000000e-01 : f32
    %583 = vector.broadcast %cst_207 : f32 to vector<8x1xf32>
    %584 = arith.mulf %583, %580 : vector<8x1xf32>
    %585 = arith.subf %582, %584 : vector<8x1xf32>
    %cst_208 = arith.constant 0.0039682542 : f32
    %586 = vector.broadcast %cst_208 : f32 to vector<8x1xf32>
    %587 = arith.mulf %581, %586 : vector<8x1xf32>
    %cst_209 = arith.constant 0.00833333377 : f32
    %588 = vector.broadcast %cst_209 : f32 to vector<8x1xf32>
    %589 = arith.subf %588, %587 : vector<8x1xf32>
    %590 = arith.mulf %581, %589 : vector<8x1xf32>
    %cst_210 = arith.constant 0.0833333358 : f32
    %591 = vector.broadcast %cst_210 : f32 to vector<8x1xf32>
    %592 = arith.subf %591, %590 : vector<8x1xf32>
    %593 = arith.mulf %581, %592 : vector<8x1xf32>
    %594 = arith.subf %585, %593 : vector<8x1xf32>
    %595 = arith.subf %594, %576 : vector<8x1xf32>
    %596 = arith.subf %545, %595 : vector<8x1xf32>
    %597 = arith.subf %596, %19 : vector<8x1xf32>
    %cst_211 = arith.constant 1.000000e+00 : f32
    %598 = vector.broadcast %cst_211 : f32 to vector<8x1xf32>
    %599 = arith.divf %598, %544 : vector<8x1xf32>
    %cst_212 = arith.constant 1.000000e+00 : f32
    %600 = vector.broadcast %cst_212 : f32 to vector<8x1xf32>
    %601 = arith.addf %544, %600 : vector<8x1xf32>
    %602 = arith.mulf %601, %601 : vector<8x1xf32>
    %cst_213 = arith.constant 7.000000e+00 : f32
    %603 = vector.broadcast %cst_213 : f32 to vector<8x1xf32>
    %604 = arith.mulf %603, %602 : vector<8x1xf32>
    %cst_214 = arith.constant 1.000000e+00 : f32
    %605 = vector.broadcast %cst_214 : f32 to vector<8x1xf32>
    %606 = arith.divf %605, %604 : vector<8x1xf32>
    %cst_215 = arith.constant 2.000000e-01 : f32
    %607 = vector.broadcast %cst_215 : f32 to vector<8x1xf32>
    %608 = arith.subf %607, %606 : vector<8x1xf32>
    %609 = arith.divf %608, %602 : vector<8x1xf32>
    %cst_216 = arith.constant 1.000000e+00 : f32
    %610 = vector.broadcast %cst_216 : f32 to vector<8x1xf32>
    %611 = arith.subf %610, %609 : vector<8x1xf32>
    %cst_217 = arith.constant 3.000000e+00 : f32
    %612 = vector.broadcast %cst_217 : f32 to vector<8x1xf32>
    %613 = arith.mulf %612, %601 : vector<8x1xf32>
    %614 = arith.divf %611, %613 : vector<8x1xf32>
    %cst_218 = arith.constant 1.000000e+00 : f32
    %615 = vector.broadcast %cst_218 : f32 to vector<8x1xf32>
    %616 = arith.addf %615, %614 : vector<8x1xf32>
    %cst_219 = arith.constant 2.000000e+00 : f32
    %617 = vector.broadcast %cst_219 : f32 to vector<8x1xf32>
    %618 = arith.mulf %617, %601 : vector<8x1xf32>
    %619 = arith.divf %616, %618 : vector<8x1xf32>
    %cst_220 = arith.constant 1.000000e+00 : f32
    %620 = vector.broadcast %cst_220 : f32 to vector<8x1xf32>
    %621 = arith.addf %620, %619 : vector<8x1xf32>
    %622 = arith.divf %621, %601 : vector<8x1xf32>
    %623 = arith.mulf %544, %544 : vector<8x1xf32>
    %cst_221 = arith.constant 1.000000e+00 : f32
    %624 = vector.broadcast %cst_221 : f32 to vector<8x1xf32>
    %625 = arith.divf %624, %623 : vector<8x1xf32>
    %626 = arith.addf %622, %625 : vector<8x1xf32>
    %627 = arith.subf %599, %626 : vector<8x1xf32>
    %628 = arith.divf %597, %627 : vector<8x1xf32>
    %629 = arith.subf %544, %628 : vector<8x1xf32>
    %630 = math.log %629 : vector<8x1xf32>
    %cst_222 = arith.constant 0.000000e+00 : f32
    %631 = vector.broadcast %cst_222 : f32 to vector<8x1xf32>
    %cst_223 = arith.constant 0.000000e+00 : f32
    %632 = vector.broadcast %cst_223 : f32 to vector<8x1xf32>
    %633 = arith.addf %629, %632 : vector<8x1xf32>
    %cst_224 = arith.constant 1.000000e+00 : f32
    %634 = vector.broadcast %cst_224 : f32 to vector<8x1xf32>
    %635 = arith.divf %634, %633 : vector<8x1xf32>
    %636 = arith.addf %631, %635 : vector<8x1xf32>
    %cst_225 = arith.constant 1.000000e+00 : f32
    %637 = vector.broadcast %cst_225 : f32 to vector<8x1xf32>
    %638 = arith.addf %629, %637 : vector<8x1xf32>
    %cst_226 = arith.constant 1.000000e+00 : f32
    %639 = vector.broadcast %cst_226 : f32 to vector<8x1xf32>
    %640 = arith.divf %639, %638 : vector<8x1xf32>
    %641 = arith.addf %636, %640 : vector<8x1xf32>
    %cst_227 = arith.constant 2.000000e+00 : f32
    %642 = vector.broadcast %cst_227 : f32 to vector<8x1xf32>
    %643 = arith.addf %629, %642 : vector<8x1xf32>
    %cst_228 = arith.constant 1.000000e+00 : f32
    %644 = vector.broadcast %cst_228 : f32 to vector<8x1xf32>
    %645 = arith.divf %644, %643 : vector<8x1xf32>
    %646 = arith.addf %641, %645 : vector<8x1xf32>
    %cst_229 = arith.constant 3.000000e+00 : f32
    %647 = vector.broadcast %cst_229 : f32 to vector<8x1xf32>
    %648 = arith.addf %629, %647 : vector<8x1xf32>
    %cst_230 = arith.constant 1.000000e+00 : f32
    %649 = vector.broadcast %cst_230 : f32 to vector<8x1xf32>
    %650 = arith.divf %649, %648 : vector<8x1xf32>
    %651 = arith.addf %646, %650 : vector<8x1xf32>
    %cst_231 = arith.constant 4.000000e+00 : f32
    %652 = vector.broadcast %cst_231 : f32 to vector<8x1xf32>
    %653 = arith.addf %629, %652 : vector<8x1xf32>
    %cst_232 = arith.constant 1.000000e+00 : f32
    %654 = vector.broadcast %cst_232 : f32 to vector<8x1xf32>
    %655 = arith.divf %654, %653 : vector<8x1xf32>
    %656 = arith.addf %651, %655 : vector<8x1xf32>
    %cst_233 = arith.constant 5.000000e+00 : f32
    %657 = vector.broadcast %cst_233 : f32 to vector<8x1xf32>
    %658 = arith.addf %629, %657 : vector<8x1xf32>
    %cst_234 = arith.constant 1.000000e+00 : f32
    %659 = vector.broadcast %cst_234 : f32 to vector<8x1xf32>
    %660 = arith.divf %659, %658 : vector<8x1xf32>
    %661 = arith.addf %656, %660 : vector<8x1xf32>
    %cst_235 = arith.constant 6.000000e+00 : f32
    %662 = vector.broadcast %cst_235 : f32 to vector<8x1xf32>
    %663 = arith.addf %629, %662 : vector<8x1xf32>
    %cst_236 = arith.constant 1.000000e+00 : f32
    %664 = vector.broadcast %cst_236 : f32 to vector<8x1xf32>
    %665 = arith.divf %664, %663 : vector<8x1xf32>
    %666 = arith.mulf %665, %665 : vector<8x1xf32>
    %667 = math.log %663 : vector<8x1xf32>
    %cst_237 = arith.constant 5.000000e-01 : f32
    %668 = vector.broadcast %cst_237 : f32 to vector<8x1xf32>
    %669 = arith.mulf %668, %665 : vector<8x1xf32>
    %670 = arith.subf %667, %669 : vector<8x1xf32>
    %cst_238 = arith.constant 0.0039682542 : f32
    %671 = vector.broadcast %cst_238 : f32 to vector<8x1xf32>
    %672 = arith.mulf %666, %671 : vector<8x1xf32>
    %cst_239 = arith.constant 0.00833333377 : f32
    %673 = vector.broadcast %cst_239 : f32 to vector<8x1xf32>
    %674 = arith.subf %673, %672 : vector<8x1xf32>
    %675 = arith.mulf %666, %674 : vector<8x1xf32>
    %cst_240 = arith.constant 0.0833333358 : f32
    %676 = vector.broadcast %cst_240 : f32 to vector<8x1xf32>
    %677 = arith.subf %676, %675 : vector<8x1xf32>
    %678 = arith.mulf %666, %677 : vector<8x1xf32>
    %679 = arith.subf %670, %678 : vector<8x1xf32>
    %680 = arith.subf %679, %661 : vector<8x1xf32>
    %681 = arith.subf %630, %680 : vector<8x1xf32>
    %682 = arith.subf %681, %19 : vector<8x1xf32>
    %cst_241 = arith.constant 1.000000e+00 : f32
    %683 = vector.broadcast %cst_241 : f32 to vector<8x1xf32>
    %684 = arith.divf %683, %629 : vector<8x1xf32>
    %cst_242 = arith.constant 1.000000e+00 : f32
    %685 = vector.broadcast %cst_242 : f32 to vector<8x1xf32>
    %686 = arith.addf %629, %685 : vector<8x1xf32>
    %687 = arith.mulf %686, %686 : vector<8x1xf32>
    %cst_243 = arith.constant 7.000000e+00 : f32
    %688 = vector.broadcast %cst_243 : f32 to vector<8x1xf32>
    %689 = arith.mulf %688, %687 : vector<8x1xf32>
    %cst_244 = arith.constant 1.000000e+00 : f32
    %690 = vector.broadcast %cst_244 : f32 to vector<8x1xf32>
    %691 = arith.divf %690, %689 : vector<8x1xf32>
    %cst_245 = arith.constant 2.000000e-01 : f32
    %692 = vector.broadcast %cst_245 : f32 to vector<8x1xf32>
    %693 = arith.subf %692, %691 : vector<8x1xf32>
    %694 = arith.divf %693, %687 : vector<8x1xf32>
    %cst_246 = arith.constant 1.000000e+00 : f32
    %695 = vector.broadcast %cst_246 : f32 to vector<8x1xf32>
    %696 = arith.subf %695, %694 : vector<8x1xf32>
    %cst_247 = arith.constant 3.000000e+00 : f32
    %697 = vector.broadcast %cst_247 : f32 to vector<8x1xf32>
    %698 = arith.mulf %697, %686 : vector<8x1xf32>
    %699 = arith.divf %696, %698 : vector<8x1xf32>
    %cst_248 = arith.constant 1.000000e+00 : f32
    %700 = vector.broadcast %cst_248 : f32 to vector<8x1xf32>
    %701 = arith.addf %700, %699 : vector<8x1xf32>
    %cst_249 = arith.constant 2.000000e+00 : f32
    %702 = vector.broadcast %cst_249 : f32 to vector<8x1xf32>
    %703 = arith.mulf %702, %686 : vector<8x1xf32>
    %704 = arith.divf %701, %703 : vector<8x1xf32>
    %cst_250 = arith.constant 1.000000e+00 : f32
    %705 = vector.broadcast %cst_250 : f32 to vector<8x1xf32>
    %706 = arith.addf %705, %704 : vector<8x1xf32>
    %707 = arith.divf %706, %686 : vector<8x1xf32>
    %708 = arith.mulf %629, %629 : vector<8x1xf32>
    %cst_251 = arith.constant 1.000000e+00 : f32
    %709 = vector.broadcast %cst_251 : f32 to vector<8x1xf32>
    %710 = arith.divf %709, %708 : vector<8x1xf32>
    %711 = arith.addf %707, %710 : vector<8x1xf32>
    %712 = arith.subf %684, %711 : vector<8x1xf32>
    %713 = arith.divf %682, %712 : vector<8x1xf32>
    %714 = arith.subf %629, %713 : vector<8x1xf32>
    %715 = math.log %714 : vector<8x1xf32>
    %cst_252 = arith.constant 0.000000e+00 : f32
    %716 = vector.broadcast %cst_252 : f32 to vector<8x1xf32>
    %cst_253 = arith.constant 0.000000e+00 : f32
    %717 = vector.broadcast %cst_253 : f32 to vector<8x1xf32>
    %718 = arith.addf %714, %717 : vector<8x1xf32>
    %cst_254 = arith.constant 1.000000e+00 : f32
    %719 = vector.broadcast %cst_254 : f32 to vector<8x1xf32>
    %720 = arith.divf %719, %718 : vector<8x1xf32>
    %721 = arith.addf %716, %720 : vector<8x1xf32>
    %cst_255 = arith.constant 1.000000e+00 : f32
    %722 = vector.broadcast %cst_255 : f32 to vector<8x1xf32>
    %723 = arith.addf %714, %722 : vector<8x1xf32>
    %cst_256 = arith.constant 1.000000e+00 : f32
    %724 = vector.broadcast %cst_256 : f32 to vector<8x1xf32>
    %725 = arith.divf %724, %723 : vector<8x1xf32>
    %726 = arith.addf %721, %725 : vector<8x1xf32>
    %cst_257 = arith.constant 2.000000e+00 : f32
    %727 = vector.broadcast %cst_257 : f32 to vector<8x1xf32>
    %728 = arith.addf %714, %727 : vector<8x1xf32>
    %cst_258 = arith.constant 1.000000e+00 : f32
    %729 = vector.broadcast %cst_258 : f32 to vector<8x1xf32>
    %730 = arith.divf %729, %728 : vector<8x1xf32>
    %731 = arith.addf %726, %730 : vector<8x1xf32>
    %cst_259 = arith.constant 3.000000e+00 : f32
    %732 = vector.broadcast %cst_259 : f32 to vector<8x1xf32>
    %733 = arith.addf %714, %732 : vector<8x1xf32>
    %cst_260 = arith.constant 1.000000e+00 : f32
    %734 = vector.broadcast %cst_260 : f32 to vector<8x1xf32>
    %735 = arith.divf %734, %733 : vector<8x1xf32>
    %736 = arith.addf %731, %735 : vector<8x1xf32>
    %cst_261 = arith.constant 4.000000e+00 : f32
    %737 = vector.broadcast %cst_261 : f32 to vector<8x1xf32>
    %738 = arith.addf %714, %737 : vector<8x1xf32>
    %cst_262 = arith.constant 1.000000e+00 : f32
    %739 = vector.broadcast %cst_262 : f32 to vector<8x1xf32>
    %740 = arith.divf %739, %738 : vector<8x1xf32>
    %741 = arith.addf %736, %740 : vector<8x1xf32>
    %cst_263 = arith.constant 5.000000e+00 : f32
    %742 = vector.broadcast %cst_263 : f32 to vector<8x1xf32>
    %743 = arith.addf %714, %742 : vector<8x1xf32>
    %cst_264 = arith.constant 1.000000e+00 : f32
    %744 = vector.broadcast %cst_264 : f32 to vector<8x1xf32>
    %745 = arith.divf %744, %743 : vector<8x1xf32>
    %746 = arith.addf %741, %745 : vector<8x1xf32>
    %cst_265 = arith.constant 6.000000e+00 : f32
    %747 = vector.broadcast %cst_265 : f32 to vector<8x1xf32>
    %748 = arith.addf %714, %747 : vector<8x1xf32>
    %cst_266 = arith.constant 1.000000e+00 : f32
    %749 = vector.broadcast %cst_266 : f32 to vector<8x1xf32>
    %750 = arith.divf %749, %748 : vector<8x1xf32>
    %751 = arith.mulf %750, %750 : vector<8x1xf32>
    %752 = math.log %748 : vector<8x1xf32>
    %cst_267 = arith.constant 5.000000e-01 : f32
    %753 = vector.broadcast %cst_267 : f32 to vector<8x1xf32>
    %754 = arith.mulf %753, %750 : vector<8x1xf32>
    %755 = arith.subf %752, %754 : vector<8x1xf32>
    %cst_268 = arith.constant 0.0039682542 : f32
    %756 = vector.broadcast %cst_268 : f32 to vector<8x1xf32>
    %757 = arith.mulf %751, %756 : vector<8x1xf32>
    %cst_269 = arith.constant 0.00833333377 : f32
    %758 = vector.broadcast %cst_269 : f32 to vector<8x1xf32>
    %759 = arith.subf %758, %757 : vector<8x1xf32>
    %760 = arith.mulf %751, %759 : vector<8x1xf32>
    %cst_270 = arith.constant 0.0833333358 : f32
    %761 = vector.broadcast %cst_270 : f32 to vector<8x1xf32>
    %762 = arith.subf %761, %760 : vector<8x1xf32>
    %763 = arith.mulf %751, %762 : vector<8x1xf32>
    %764 = arith.subf %755, %763 : vector<8x1xf32>
    %765 = arith.subf %764, %746 : vector<8x1xf32>
    %766 = arith.subf %715, %765 : vector<8x1xf32>
    %767 = arith.subf %766, %19 : vector<8x1xf32>
    %cst_271 = arith.constant 1.000000e+00 : f32
    %768 = vector.broadcast %cst_271 : f32 to vector<8x1xf32>
    %769 = arith.divf %768, %714 : vector<8x1xf32>
    %cst_272 = arith.constant 1.000000e+00 : f32
    %770 = vector.broadcast %cst_272 : f32 to vector<8x1xf32>
    %771 = arith.addf %714, %770 : vector<8x1xf32>
    %772 = arith.mulf %771, %771 : vector<8x1xf32>
    %cst_273 = arith.constant 7.000000e+00 : f32
    %773 = vector.broadcast %cst_273 : f32 to vector<8x1xf32>
    %774 = arith.mulf %773, %772 : vector<8x1xf32>
    %cst_274 = arith.constant 1.000000e+00 : f32
    %775 = vector.broadcast %cst_274 : f32 to vector<8x1xf32>
    %776 = arith.divf %775, %774 : vector<8x1xf32>
    %cst_275 = arith.constant 2.000000e-01 : f32
    %777 = vector.broadcast %cst_275 : f32 to vector<8x1xf32>
    %778 = arith.subf %777, %776 : vector<8x1xf32>
    %779 = arith.divf %778, %772 : vector<8x1xf32>
    %cst_276 = arith.constant 1.000000e+00 : f32
    %780 = vector.broadcast %cst_276 : f32 to vector<8x1xf32>
    %781 = arith.subf %780, %779 : vector<8x1xf32>
    %cst_277 = arith.constant 3.000000e+00 : f32
    %782 = vector.broadcast %cst_277 : f32 to vector<8x1xf32>
    %783 = arith.mulf %782, %771 : vector<8x1xf32>
    %784 = arith.divf %781, %783 : vector<8x1xf32>
    %cst_278 = arith.constant 1.000000e+00 : f32
    %785 = vector.broadcast %cst_278 : f32 to vector<8x1xf32>
    %786 = arith.addf %785, %784 : vector<8x1xf32>
    %cst_279 = arith.constant 2.000000e+00 : f32
    %787 = vector.broadcast %cst_279 : f32 to vector<8x1xf32>
    %788 = arith.mulf %787, %771 : vector<8x1xf32>
    %789 = arith.divf %786, %788 : vector<8x1xf32>
    %cst_280 = arith.constant 1.000000e+00 : f32
    %790 = vector.broadcast %cst_280 : f32 to vector<8x1xf32>
    %791 = arith.addf %790, %789 : vector<8x1xf32>
    %792 = arith.divf %791, %771 : vector<8x1xf32>
    %793 = arith.mulf %714, %714 : vector<8x1xf32>
    %cst_281 = arith.constant 1.000000e+00 : f32
    %794 = vector.broadcast %cst_281 : f32 to vector<8x1xf32>
    %795 = arith.divf %794, %793 : vector<8x1xf32>
    %796 = arith.addf %792, %795 : vector<8x1xf32>
    %797 = arith.subf %769, %796 : vector<8x1xf32>
    %798 = arith.divf %767, %797 : vector<8x1xf32>
    %799 = arith.subf %714, %798 : vector<8x1xf32>
    %800 = math.log %799 : vector<8x1xf32>
    %cst_282 = arith.constant 0.000000e+00 : f32
    %801 = vector.broadcast %cst_282 : f32 to vector<8x1xf32>
    %cst_283 = arith.constant 0.000000e+00 : f32
    %802 = vector.broadcast %cst_283 : f32 to vector<8x1xf32>
    %803 = arith.addf %799, %802 : vector<8x1xf32>
    %cst_284 = arith.constant 1.000000e+00 : f32
    %804 = vector.broadcast %cst_284 : f32 to vector<8x1xf32>
    %805 = arith.divf %804, %803 : vector<8x1xf32>
    %806 = arith.addf %801, %805 : vector<8x1xf32>
    %cst_285 = arith.constant 1.000000e+00 : f32
    %807 = vector.broadcast %cst_285 : f32 to vector<8x1xf32>
    %808 = arith.addf %799, %807 : vector<8x1xf32>
    %cst_286 = arith.constant 1.000000e+00 : f32
    %809 = vector.broadcast %cst_286 : f32 to vector<8x1xf32>
    %810 = arith.divf %809, %808 : vector<8x1xf32>
    %811 = arith.addf %806, %810 : vector<8x1xf32>
    %cst_287 = arith.constant 2.000000e+00 : f32
    %812 = vector.broadcast %cst_287 : f32 to vector<8x1xf32>
    %813 = arith.addf %799, %812 : vector<8x1xf32>
    %cst_288 = arith.constant 1.000000e+00 : f32
    %814 = vector.broadcast %cst_288 : f32 to vector<8x1xf32>
    %815 = arith.divf %814, %813 : vector<8x1xf32>
    %816 = arith.addf %811, %815 : vector<8x1xf32>
    %cst_289 = arith.constant 3.000000e+00 : f32
    %817 = vector.broadcast %cst_289 : f32 to vector<8x1xf32>
    %818 = arith.addf %799, %817 : vector<8x1xf32>
    %cst_290 = arith.constant 1.000000e+00 : f32
    %819 = vector.broadcast %cst_290 : f32 to vector<8x1xf32>
    %820 = arith.divf %819, %818 : vector<8x1xf32>
    %821 = arith.addf %816, %820 : vector<8x1xf32>
    %cst_291 = arith.constant 4.000000e+00 : f32
    %822 = vector.broadcast %cst_291 : f32 to vector<8x1xf32>
    %823 = arith.addf %799, %822 : vector<8x1xf32>
    %cst_292 = arith.constant 1.000000e+00 : f32
    %824 = vector.broadcast %cst_292 : f32 to vector<8x1xf32>
    %825 = arith.divf %824, %823 : vector<8x1xf32>
    %826 = arith.addf %821, %825 : vector<8x1xf32>
    %cst_293 = arith.constant 5.000000e+00 : f32
    %827 = vector.broadcast %cst_293 : f32 to vector<8x1xf32>
    %828 = arith.addf %799, %827 : vector<8x1xf32>
    %cst_294 = arith.constant 1.000000e+00 : f32
    %829 = vector.broadcast %cst_294 : f32 to vector<8x1xf32>
    %830 = arith.divf %829, %828 : vector<8x1xf32>
    %831 = arith.addf %826, %830 : vector<8x1xf32>
    %cst_295 = arith.constant 6.000000e+00 : f32
    %832 = vector.broadcast %cst_295 : f32 to vector<8x1xf32>
    %833 = arith.addf %799, %832 : vector<8x1xf32>
    %cst_296 = arith.constant 1.000000e+00 : f32
    %834 = vector.broadcast %cst_296 : f32 to vector<8x1xf32>
    %835 = arith.divf %834, %833 : vector<8x1xf32>
    %836 = arith.mulf %835, %835 : vector<8x1xf32>
    %837 = math.log %833 : vector<8x1xf32>
    %cst_297 = arith.constant 5.000000e-01 : f32
    %838 = vector.broadcast %cst_297 : f32 to vector<8x1xf32>
    %839 = arith.mulf %838, %835 : vector<8x1xf32>
    %840 = arith.subf %837, %839 : vector<8x1xf32>
    %cst_298 = arith.constant 0.0039682542 : f32
    %841 = vector.broadcast %cst_298 : f32 to vector<8x1xf32>
    %842 = arith.mulf %836, %841 : vector<8x1xf32>
    %cst_299 = arith.constant 0.00833333377 : f32
    %843 = vector.broadcast %cst_299 : f32 to vector<8x1xf32>
    %844 = arith.subf %843, %842 : vector<8x1xf32>
    %845 = arith.mulf %836, %844 : vector<8x1xf32>
    %cst_300 = arith.constant 0.0833333358 : f32
    %846 = vector.broadcast %cst_300 : f32 to vector<8x1xf32>
    %847 = arith.subf %846, %845 : vector<8x1xf32>
    %848 = arith.mulf %836, %847 : vector<8x1xf32>
    %849 = arith.subf %840, %848 : vector<8x1xf32>
    %850 = arith.subf %849, %831 : vector<8x1xf32>
    %851 = arith.subf %800, %850 : vector<8x1xf32>
    %852 = arith.subf %851, %19 : vector<8x1xf32>
    %cst_301 = arith.constant 1.000000e+00 : f32
    %853 = vector.broadcast %cst_301 : f32 to vector<8x1xf32>
    %854 = arith.divf %853, %799 : vector<8x1xf32>
    %cst_302 = arith.constant 1.000000e+00 : f32
    %855 = vector.broadcast %cst_302 : f32 to vector<8x1xf32>
    %856 = arith.addf %799, %855 : vector<8x1xf32>
    %857 = arith.mulf %856, %856 : vector<8x1xf32>
    %cst_303 = arith.constant 7.000000e+00 : f32
    %858 = vector.broadcast %cst_303 : f32 to vector<8x1xf32>
    %859 = arith.mulf %858, %857 : vector<8x1xf32>
    %cst_304 = arith.constant 1.000000e+00 : f32
    %860 = vector.broadcast %cst_304 : f32 to vector<8x1xf32>
    %861 = arith.divf %860, %859 : vector<8x1xf32>
    %cst_305 = arith.constant 2.000000e-01 : f32
    %862 = vector.broadcast %cst_305 : f32 to vector<8x1xf32>
    %863 = arith.subf %862, %861 : vector<8x1xf32>
    %864 = arith.divf %863, %857 : vector<8x1xf32>
    %cst_306 = arith.constant 1.000000e+00 : f32
    %865 = vector.broadcast %cst_306 : f32 to vector<8x1xf32>
    %866 = arith.subf %865, %864 : vector<8x1xf32>
    %cst_307 = arith.constant 3.000000e+00 : f32
    %867 = vector.broadcast %cst_307 : f32 to vector<8x1xf32>
    %868 = arith.mulf %867, %856 : vector<8x1xf32>
    %869 = arith.divf %866, %868 : vector<8x1xf32>
    %cst_308 = arith.constant 1.000000e+00 : f32
    %870 = vector.broadcast %cst_308 : f32 to vector<8x1xf32>
    %871 = arith.addf %870, %869 : vector<8x1xf32>
    %cst_309 = arith.constant 2.000000e+00 : f32
    %872 = vector.broadcast %cst_309 : f32 to vector<8x1xf32>
    %873 = arith.mulf %872, %856 : vector<8x1xf32>
    %874 = arith.divf %871, %873 : vector<8x1xf32>
    %cst_310 = arith.constant 1.000000e+00 : f32
    %875 = vector.broadcast %cst_310 : f32 to vector<8x1xf32>
    %876 = arith.addf %875, %874 : vector<8x1xf32>
    %877 = arith.divf %876, %856 : vector<8x1xf32>
    %878 = arith.mulf %799, %799 : vector<8x1xf32>
    %cst_311 = arith.constant 1.000000e+00 : f32
    %879 = vector.broadcast %cst_311 : f32 to vector<8x1xf32>
    %880 = arith.divf %879, %878 : vector<8x1xf32>
    %881 = arith.addf %877, %880 : vector<8x1xf32>
    %882 = arith.subf %854, %881 : vector<8x1xf32>
    %883 = arith.divf %852, %882 : vector<8x1xf32>
    %884 = arith.subf %799, %883 : vector<8x1xf32>
    %cst_312 = arith.constant 1.000000e-07 : f32
    %cst_313 = arith.constant 1.800000e+01 : f32
    %885 = vector.broadcast %cst_312 : f32 to vector<8x1xf32>
    %886 = arith.maximumf %885, %884 : vector<8x1xf32>
    %887 = vector.broadcast %cst_313 : f32 to vector<8x1xf32>
    %888 = arith.minimumf %887, %886 : vector<8x1xf32>
    %889 = tpu.reciprocal %15 : vector<8x1xf32> -> vector<8x1xf32>
    %890 = arith.mulf %888, %889 : vector<8x1xf32>
    %cst_314 = arith.constant 1.000000e+00 : f32
    %891 = vector.broadcast %cst_314 : f32 to vector<8x1xf32>
    %cst_315 = arith.constant 1.000000e+00 : f32
    %892 = vector.broadcast %cst_315 : f32 to vector<8x1xf32>
    %893 = arith.addf %888, %892 : vector<8x1xf32>
    %cst_316 = arith.constant 676.520386 : f32
    %894 = vector.broadcast %cst_316 : f32 to vector<8x1xf32>
    %895 = arith.divf %894, %893 : vector<8x1xf32>
    %896 = arith.addf %891, %895 : vector<8x1xf32>
    %cst_317 = arith.constant 2.000000e+00 : f32
    %897 = vector.broadcast %cst_317 : f32 to vector<8x1xf32>
    %898 = arith.addf %888, %897 : vector<8x1xf32>
    %cst_318 = arith.constant -1259.13916 : f32
    %899 = vector.broadcast %cst_318 : f32 to vector<8x1xf32>
    %900 = arith.divf %899, %898 : vector<8x1xf32>
    %901 = arith.addf %896, %900 : vector<8x1xf32>
    %cst_319 = arith.constant 3.000000e+00 : f32
    %902 = vector.broadcast %cst_319 : f32 to vector<8x1xf32>
    %903 = arith.addf %888, %902 : vector<8x1xf32>
    %cst_320 = arith.constant 771.323425 : f32
    %904 = vector.broadcast %cst_320 : f32 to vector<8x1xf32>
    %905 = arith.divf %904, %903 : vector<8x1xf32>
    %906 = arith.addf %901, %905 : vector<8x1xf32>
    %cst_321 = arith.constant 4.000000e+00 : f32
    %907 = vector.broadcast %cst_321 : f32 to vector<8x1xf32>
    %908 = arith.addf %888, %907 : vector<8x1xf32>
    %cst_322 = arith.constant -176.615036 : f32
    %909 = vector.broadcast %cst_322 : f32 to vector<8x1xf32>
    %910 = arith.divf %909, %908 : vector<8x1xf32>
    %911 = arith.addf %906, %910 : vector<8x1xf32>
    %cst_323 = arith.constant 5.000000e+00 : f32
    %912 = vector.broadcast %cst_323 : f32 to vector<8x1xf32>
    %913 = arith.addf %888, %912 : vector<8x1xf32>
    %cst_324 = arith.constant 12.5073433 : f32
    %914 = vector.broadcast %cst_324 : f32 to vector<8x1xf32>
    %915 = arith.divf %914, %913 : vector<8x1xf32>
    %916 = arith.addf %911, %915 : vector<8x1xf32>
    %cst_325 = arith.constant 6.000000e+00 : f32
    %917 = vector.broadcast %cst_325 : f32 to vector<8x1xf32>
    %918 = arith.addf %888, %917 : vector<8x1xf32>
    %cst_326 = arith.constant -0.138571098 : f32
    %919 = vector.broadcast %cst_326 : f32 to vector<8x1xf32>
    %920 = arith.divf %919, %918 : vector<8x1xf32>
    %921 = arith.addf %916, %920 : vector<8x1xf32>
    %cst_327 = arith.constant 7.000000e+00 : f32
    %922 = vector.broadcast %cst_327 : f32 to vector<8x1xf32>
    %923 = arith.addf %888, %922 : vector<8x1xf32>
    %cst_328 = arith.constant 9.98436917E-6 : f32
    %924 = vector.broadcast %cst_328 : f32 to vector<8x1xf32>
    %925 = arith.divf %924, %923 : vector<8x1xf32>
    %926 = arith.addf %921, %925 : vector<8x1xf32>
    %cst_329 = arith.constant 8.000000e+00 : f32
    %927 = vector.broadcast %cst_329 : f32 to vector<8x1xf32>
    %928 = arith.addf %888, %927 : vector<8x1xf32>
    %cst_330 = arith.constant 1.50563267E-7 : f32
    %929 = vector.broadcast %cst_330 : f32 to vector<8x1xf32>
    %930 = arith.divf %929, %928 : vector<8x1xf32>
    %931 = arith.addf %926, %930 : vector<8x1xf32>
    %cst_331 = arith.constant 8.000000e+00 : f32
    %932 = vector.broadcast %cst_331 : f32 to vector<8x1xf32>
    %933 = arith.addf %888, %932 : vector<8x1xf32>
    %cst_332 = arith.constant 5.000000e-01 : f32
    %934 = vector.broadcast %cst_332 : f32 to vector<8x1xf32>
    %935 = arith.subf %933, %934 : vector<8x1xf32>
    %cst_333 = arith.constant 5.000000e-01 : f32
    %936 = vector.broadcast %cst_333 : f32 to vector<8x1xf32>
    %937 = arith.addf %888, %936 : vector<8x1xf32>
    %938 = math.powf %935, %937 : vector<8x1xf32>
    %cst_334 = arith.constant 2.50662827 : f32
    %939 = vector.broadcast %cst_334 : f32 to vector<8x1xf32>
    %940 = arith.mulf %939, %938 : vector<8x1xf32>
    %cst_335 = arith.constant 0.000000e+00 : f32
    %941 = vector.broadcast %cst_335 : f32 to vector<8x1xf32>
    %942 = arith.subf %941, %935 : vector<8x1xf32>
    %943 = math.exp %942 : vector<8x1xf32>
    %944 = arith.mulf %940, %943 : vector<8x1xf32>
    %945 = arith.mulf %944, %931 : vector<8x1xf32>
    %946 = arith.divf %945, %888 : vector<8x1xf32>
    %947 = arith.mulf %946, %888 : vector<8x1xf32>
    %cst_336 = arith.constant 1.000000e+00 : f32
    %948 = vector.broadcast %cst_336 : f32 to vector<8x1xf32>
    %949 = arith.divf %948, %947 : vector<8x1xf32>
    %cst_337 = arith.constant 1.000000e+00 : f32
    %950 = vector.broadcast %cst_337 : f32 to vector<8x1xf32>
    %951 = arith.addf %888, %950 : vector<8x1xf32>
    %952 = arith.mulf %947, %951 : vector<8x1xf32>
    %cst_338 = arith.constant 1.000000e+00 : f32
    %953 = vector.broadcast %cst_338 : f32 to vector<8x1xf32>
    %954 = arith.divf %953, %952 : vector<8x1xf32>
    %cst_339 = arith.constant 2.000000e+00 : f32
    %955 = vector.broadcast %cst_339 : f32 to vector<8x1xf32>
    %956 = arith.addf %888, %955 : vector<8x1xf32>
    %957 = arith.mulf %952, %956 : vector<8x1xf32>
    %cst_340 = arith.constant 1.000000e+00 : f32
    %958 = vector.broadcast %cst_340 : f32 to vector<8x1xf32>
    %959 = arith.divf %958, %957 : vector<8x1xf32>
    %cst_341 = arith.constant 3.000000e+00 : f32
    %960 = vector.broadcast %cst_341 : f32 to vector<8x1xf32>
    %961 = arith.addf %888, %960 : vector<8x1xf32>
    %962 = arith.mulf %957, %961 : vector<8x1xf32>
    %cst_342 = arith.constant 1.000000e+00 : f32
    %963 = vector.broadcast %cst_342 : f32 to vector<8x1xf32>
    %964 = arith.divf %963, %962 : vector<8x1xf32>
    %cst_343 = arith.constant 4.000000e+00 : f32
    %965 = vector.broadcast %cst_343 : f32 to vector<8x1xf32>
    %966 = arith.addf %888, %965 : vector<8x1xf32>
    %967 = arith.mulf %962, %966 : vector<8x1xf32>
    %cst_344 = arith.constant 1.000000e+00 : f32
    %968 = vector.broadcast %cst_344 : f32 to vector<8x1xf32>
    %969 = arith.divf %968, %967 : vector<8x1xf32>
    %cst_345 = arith.constant 5.000000e+00 : f32
    %970 = vector.broadcast %cst_345 : f32 to vector<8x1xf32>
    %971 = arith.addf %888, %970 : vector<8x1xf32>
    %972 = arith.mulf %967, %971 : vector<8x1xf32>
    %cst_346 = arith.constant 1.000000e+00 : f32
    %973 = vector.broadcast %cst_346 : f32 to vector<8x1xf32>
    %974 = arith.divf %973, %972 : vector<8x1xf32>
    %cst_347 = arith.constant 6.000000e+00 : f32
    %975 = vector.broadcast %cst_347 : f32 to vector<8x1xf32>
    %976 = arith.addf %888, %975 : vector<8x1xf32>
    %977 = arith.mulf %972, %976 : vector<8x1xf32>
    %cst_348 = arith.constant 1.000000e+00 : f32
    %978 = vector.broadcast %cst_348 : f32 to vector<8x1xf32>
    %979 = arith.divf %978, %977 : vector<8x1xf32>
    %cst_349 = arith.constant 7.000000e+00 : f32
    %980 = vector.broadcast %cst_349 : f32 to vector<8x1xf32>
    %981 = arith.addf %888, %980 : vector<8x1xf32>
    %982 = arith.mulf %977, %981 : vector<8x1xf32>
    %cst_350 = arith.constant 1.000000e+00 : f32
    %983 = vector.broadcast %cst_350 : f32 to vector<8x1xf32>
    %984 = arith.divf %983, %982 : vector<8x1xf32>
    %985 = vector.broadcast %890 : vector<8x1xf32> to vector<8x256xf32>
    %986 = arith.mulf %6, %985 : vector<8x256xf32>
    %987 = math.log %890 : vector<8x1xf32>
    %988 = vector.broadcast %987 : vector<8x1xf32> to vector<8x256xf32>
    %989 = arith.addf %9, %988 : vector<8x256xf32>
    %990 = vector.broadcast %984 : vector<8x1xf32> to vector<8x256xf32>
    %991 = arith.mulf %990, %986 : vector<8x256xf32>
    %992 = vector.broadcast %979 : vector<8x1xf32> to vector<8x256xf32>
    %993 = arith.addf %991, %992 : vector<8x256xf32>
    %994 = arith.mulf %993, %986 : vector<8x256xf32>
    %995 = vector.broadcast %974 : vector<8x1xf32> to vector<8x256xf32>
    %996 = arith.addf %994, %995 : vector<8x256xf32>
    %997 = arith.mulf %996, %986 : vector<8x256xf32>
    %998 = vector.broadcast %969 : vector<8x1xf32> to vector<8x256xf32>
    %999 = arith.addf %997, %998 : vector<8x256xf32>
    %1000 = arith.mulf %999, %986 : vector<8x256xf32>
    %1001 = vector.broadcast %964 : vector<8x1xf32> to vector<8x256xf32>
    %1002 = arith.addf %1000, %1001 : vector<8x256xf32>
    %1003 = arith.mulf %1002, %986 : vector<8x256xf32>
    %1004 = vector.broadcast %959 : vector<8x1xf32> to vector<8x256xf32>
    %1005 = arith.addf %1003, %1004 : vector<8x256xf32>
    %1006 = arith.mulf %1005, %986 : vector<8x256xf32>
    %1007 = vector.broadcast %954 : vector<8x1xf32> to vector<8x256xf32>
    %1008 = arith.addf %1006, %1007 : vector<8x256xf32>
    %1009 = arith.mulf %1008, %986 : vector<8x256xf32>
    %1010 = vector.broadcast %949 : vector<8x1xf32> to vector<8x256xf32>
    %1011 = arith.addf %1009, %1010 : vector<8x256xf32>
    %1012 = vector.broadcast %888 : vector<8x1xf32> to vector<8x256xf32>
    %1013 = arith.mulf %1012, %989 : vector<8x256xf32>
    %1014 = arith.subf %1013, %986 : vector<8x256xf32>
    %1015 = math.exp %1014 : vector<8x256xf32>
    %1016 = arith.mulf %1015, %1011 : vector<8x256xf32>
    %1017 = math.absf %1016 : vector<8x256xf32>
    %cst_351 = arith.constant 3.40282347E+38 : f32
    %1018 = vector.broadcast %cst_351 : f32 to vector<8x256xf32>
    %1019 = arith.cmpf ole, %1017, %1018 : vector<8x256xf32>
    %cst_352 = arith.constant 0.000000e+00 : f32
    %1020 = vector.broadcast %cst_352 : f32 to vector<8x256xf32>
    %1021 = arith.select %1019, %1016, %1020 : vector<8x256xi1>, vector<8x256xf32>
    %c0_353 = arith.constant 0 : index
    %c0_354 = arith.constant 0 : index
    %1022 = vector.load %arg2[%c0_353, %c0_354] : memref<8x256xf32, #tpu.memory_space<vmem>>, vector<8x256xf32>
    tpu.vector_store %arg2[%c0_353, %c0_354], %1021 {strides = array<i32>} : memref<8x256xf32, #tpu.memory_space<vmem>>, vector<8x256xf32>,
    return
  }
  func.func @transform_0(%arg0: i32) -> (i32, i32) {
    %c0_i32 = arith.constant 0 : i32
    %c0_i32_0 = arith.constant 0 : i32
    return %arg0, %c0_i32 : i32, i32
  }
  func.func @transform_1(%arg0: i32) -> (i32, i32) {
    %c0_i32 = arith.constant 0 : i32
    %c0_i32_0 = arith.constant 0 : i32
    return %arg0, %c0_i32 : i32, i32
  }
}

</mosaic_0001>

<bundles_post_ra>
// kernel: tpu_custom_call.1
= control target key start
LH: loop header
LB: loop body
LE: loop exit
PB: predicated region body
PF: predicated region fallthrough
CT: control target
= control target key end

     0   :  { %6 = vsyncpa [#allocation3], 0  ;;  %s7015_s0 = inlined_call_operand.hbm [shape: f32[8,256], index: 0, kind: input, shape index: {}]   ;;  %s7016_s1 = inlined_call_operand.hbm [shape: f32[8,256], index: 1, kind: output, shape index: {}]  }
   0x1   :  { %7 = vsyncpa [#allocation4], 0  ;;  %s13_s8 = sshll.u32 %s7015_s0, 4  ;;  %s3493_s9 = smov [#allocation2]   ;;  %s14_s8 = int_to_ptr.hbm [resolvable:$true] %s13_s8 }
   0x2   :  { %s15_s10 = sshll.u32 %s3493_s9, 4  ;;  %s16_s10 = int_to_ptr.vmem [resolvable:$true] %s15_s10 }
   0x3   :  { %18 = dma.hbm_to_vmem [thread:$0]  %s14_s8, 256, %s16_s10, [#allocation3]  }
   0x4   :  { %3489 = dma.done.wait [#allocation3], 256  }
   0x5   :  { %3490 = vsyncadd [#allocation3], 4294967040  ;;  %v23_v0 = vld [vmem:[#allocation2] sm:$0xff]  ;;  %v24_v1 = vld [vmem:[#allocation2 + $0x8] sm:$0xff]  ;;  %s3496_s0 = smov [#allocation5]   ;;  %s2968_s14 = sshll.u32 %s7016_s1, 4  ;;  %s2969_s14 = int_to_ptr.hbm [resolvable:$true] %s2968_s14 }
   0x6   :  { %v25_v2 = vmin.f32 %v23_v0, %v24_v1  ;;  %s2966_s11 = sshll.u32 %s3496_s0, 4  ;;  %s2967_s11 = int_to_ptr.vmem [resolvable:$true] %s2966_s11 }
   0x8   :  { %26 = vmin.xlane.f32.xlu0 %v25_v2 }
  0x7b   :  { %v27_v3 = vpop.xlane.xlu0 %26 }
  0x7c   :  { %v28_v4 = vsub.f32 %v23_v0, %v27_v3  ;;  %v29_v5 = vsub.f32 %v24_v1, %v27_v3 }
  0x7e   :  { %v3510_v6 = vadd.f32 1e-07, %v28_v4  ;;  %v3512_v7 = vadd.f32 1e-07, %v29_v5 }
  0x80   :  { %v32_v8 = vadd.f32 1e-07, %v3510_v6  ;;  %v33_v9 = vadd.f32 1e-07, %v3512_v7 }
  0x82   :  { %v38_v10 = vadd.f32 %v33_v9, %v32_v8  ;;  %3085 = vlog2.f32 %v32_v8 }
  0x83   :  { %3087 = vlog2.f32 %v33_v9 }
  0x84   :  { %39 = vadd.xlane.f32.xlu0 %v38_v10 }
  0x88   :  { %v3086_v11 = vpop.eup %3085 }
  0x89   :  { %v3088_v12 = vpop.eup %3087  ;;  %v3516_v13 = vmul.f32 0.6931472, %v3086_v11 }
  0x8a   :  { %v3518_v14 = vmul.f32 0.6931472, %v3088_v12 }
  0x8c   :  { %v41_v15 = vadd.f32 %v3518_v14, %v3516_v13 }
  0x8e   :  { %42 = vadd.xlane.f32.xlu1 %v41_v15 }
  0xf7   :  { %v40_v16 = vpop.xlane.xlu0 %39 }
  0xf8   :  { %v3522_v17 = vmul.f32 0.00390625, %v40_v16 }
  0xfa   :  { %3089 = vlog2.f32 %v3522_v17 }
 0x100   :  { %v3090_v18 = vpop.eup %3089 }
 0x101   :  { %v43_v19 = vpop.xlane.xlu1 %42  ;;  %v46_v20 = vmul.f32 0.6931472, %v3090_v18 }
 0x102   :  { %v47_v21 = vmul.f32 0.00390625, %v43_v19 }
 0x104   :  { %v3525_v22 = vsub.f32 %v46_v20, %v47_v21 }
 0x106   :  { %v2978_v23 = vadd.f32 -3.0, %v3525_v22  ;;  %v51_v25 = vmul.f32 24.0, %v3525_v22  ;;  %v67_v27 = vmul.f32 12.0, %v3525_v22  ;;  %v65_v44 = vsub.f32 3.0, %v3525_v22 }
 0x108   :  { %v50_v24 = vmul.f32 %v2978_v23, %v2978_v23  ;;  %v79_v43 = vand.u32 2147483648, %v67_v27  ;;  %vm73_vm3 = vweird.f32 %v67_v27  ;;  %v77_v45 = vand.u32 2147483647, %v67_v27 }
 0x10a   :  { %v52_v26 = vadd.f32 %v51_v25, %v50_v24  ;;  %v80_v48 = vor.u32 1.1754944e-38, %v79_v43  ;;  %vm78_vm5 = vcmp.eq.f32.partialorder %v77_v45, 8.507059e+37 }
 0x10c   :  { %3091 = vrsqrt.f32 %v52_v26  ;;  %vm60_vm0 = vcmp.eq.f32.partialorder %v52_v26, inf  ;;  %v63_v40 = vand.u32 2147483648, %v52_v26  ;;  %vm62_vm1 = vcmp.eq.f32.partialorder %v52_v26, 0.0 }
 0x10d   :  { %3093 = vrcp.f32 %v67_v27 }
 0x112   :  { %v3092_v28 = vpop.eup %3091 }
 0x113   :  { %v54_v29 = vmul.f32 %v3092_v28, %v52_v26  ;;  %v3094_v30 = vpop.eup %3093 }
 0x114   :  { %v69_v33 = vmul.f32 %v3094_v30, %v67_v27  ;;  %vm74_vm2 = vweird.f32 %v3094_v30 }
 0x115   :  { %v55_v31 = vmul.f32 %v3092_v28, %v54_v29  ;;  %vm75_vm4 = vmor %vm73_vm3, %vm74_vm2 }
 0x116   :  { %v70_v36 = vsub.f32 1.0, %v69_v33 }
 0x117   :  { %v56_v32 = vmul.f32 0.5, %v55_v31 }
 0x118   :  { %v71_v38 = vmul.f32 %v3094_v30, %v70_v36 }
 0x119   :  { %v57_v34 = vsub.f32 1.5, %v56_v32 }
 0x11a   :  { %v72_v41 = vadd.f32 %v3094_v30, %v71_v38 }
 0x11b   :  { %v58_v35 = vmul.f32 %v3092_v28, %v57_v34 }
 0x11c   :  { %v76_v47 = vsel %vm75_vm4, %v3094_v30, %v72_v41 }
 0x11d   :  { %v59_v37 = vmul.f32 %v58_v35, %v52_v26  ;;  %v81_v49 = vsel %vm78_vm5, %v80_v48, %v76_v47 }
 0x11f   :  { %v61_v39 = vsel %vm60_vm0, %v52_v26, %v59_v37 }
 0x120   :  { %v64_v42 = vsel %vm62_vm1, %v63_v40, %v61_v39 }
 0x121   :  { %v66_v46 = vadd.f32 %v65_v44, %v64_v42 }
 0x123   :  { %v82_v50 = vmul.f32 %v81_v49, %v66_v46 }
 0x125   :  { %v3531_v51 = vadd.f32 1e-07, %v82_v50 }
 0x127   :  { %v3534_v52 = vadd.f32 1.0, %v3531_v51  ;;  %v3537_v53 = vadd.f32 6.0, %v3531_v51  ;;  %3095 = vrcp.f32 %v3531_v51  ;;  %v3543_v54 = vadd.f32 2.0, %v3531_v51 }
 0x128   :  { %v3546_v55 = vadd.f32 3.0, %v3531_v51  ;;  %v3572_v0 = vadd.f32 4.0, %v3531_v51  ;;  %v3581_v3 = vadd.f32 5.0, %v3531_v51  ;;  %v96_v11 = vand.u32 2147483647, %v3531_v51 }
 0x129   :  { %3097 = vrcp.f32 %v3534_v52  ;;  %v3555_v58 = vmul.f32 %v3534_v52, %v3534_v52  ;;  %v3569_v63 = vmul.f32 3.0, %v3534_v52  ;;  %v3578_v2 = vmul.f32 2.0, %v3534_v52 }
 0x12a   :  { %3099 = vrcp.f32 %v3537_v53  ;;  %v98_v12 = vand.u32 2147483648, %v3531_v51  ;;  %v113_v16 = vand.u32 2147483647, %v3534_v52  ;;  %v115_v18 = vand.u32 2147483648, %v3534_v52 }
 0x12b   :  { %3101 = vrcp.f32 %v3543_v54  ;;  %v3565_v62 = vmul.f32 7.0, %v3555_v58  ;;  %vm194_vm6 = vweird.f32 %v3537_v53  ;;  %v198_v26 = vand.u32 2147483647, %v3537_v53 }
 0x12c   :  { %3103 = vrcp.f32 %v3546_v55  ;;  %v200_v27 = vand.u32 2147483648, %v3537_v53  ;;  %v3623_v32 = vmul.f32 %v3531_v51, %v3531_v51  ;;  %v260_v36 = vand.u32 2147483647, %v3555_v58 }
 0x12d   :  { %v3548_v56 = vpop.eup %3095  ;;  %3105 = vrcp.f32 %v3555_v58  ;;  %v244_v35 = vand.u32 2147483647, %v3565_v62  ;;  %v246_v39 = vand.u32 2147483648, %v3565_v62  ;;  %vm240_vm10 = vweird.f32 %v3565_v62 }
 0x12e   :  { %v88_v60 = vmul.f32 %v3548_v56, %v3531_v51  ;;  %3107 = vrcp.f32 %v3565_v62  ;;  %vm256_vm11 = vweird.f32 %v3555_v58  ;;  %v262_v46 = vand.u32 2147483648, %v3555_v58 }
 0x12f   :  { %v3550_v57 = vpop.eup %3097  ;;  %3109 = vrcp.f32 %v3569_v63  ;;  %vm245_vm14 = vcmp.eq.f32.partialorder %v244_v35, 8.507059e+37  ;;  %vm3651_vm15 = vcmp.eq.f32.partialorder %v260_v36, 8.507059e+37  ;;  %vm273_vm0 = vweird.f32 %v3569_v63 }
 0x130   :  { %v3557_v59 = vpop.eup %3099  ;;  %v105_v61 = vmul.f32 %v3550_v57, %v3534_v52  ;;  %v89_v5 = vsub.f32 1.0, %v88_v60  ;;  %3111 = vrcp.f32 %v3572_v0  ;;  %vm109_vm3 = vweird.f32 %v3534_v52 }
 0x131   :  { %v190_v1 = vmul.f32 %v3557_v59, %v3537_v53  ;;  %v3583_v4 = vpop.eup %3101  ;;  %3113 = vrcp.f32 %v3578_v2  ;;  %vm195_vm7 = vweird.f32 %v3557_v59  ;;  %vm92_vm4 = vweird.f32 %v3531_v51 }
 0x132   :  { %v106_v8 = vsub.f32 1.0, %v105_v61  ;;  %v3586_v9 = vpop.eup %3103  ;;  %3115 = vrcp.f32 %v3581_v3  ;;  %v3600_v21 = vmul.f32 %v3548_v56, %v89_v5  ;;  %v3607_v24 = vmul.f32 %v3583_v4, %v3543_v54  ;;  %vm3667_vm2 = vmor %vm194_vm6, %vm195_vm7 }
 0x133   :  { %v3589_v10 = vpop.eup %3105  ;;  %v191_v15 = vsub.f32 1.0, %v190_v1  ;;  %v3611_v25 = vmul.f32 %v3586_v9, %v3546_v55  ;;  %3117 = vrcp.f32 %v3623_v32  ;;  %v247_v61 = vor.u32 1.1754944e-38, %v246_v39 }
 0x134   :  { %v252_v19 = vmul.f32 %v3589_v10, %v3555_v58  ;;  %v3108_v20 = vpop.eup %3107  ;;  %v3603_v23 = vmul.f32 %v3550_v57, %v106_v8  ;;  %vm257_vm8 = vweird.f32 %v3589_v10  ;;  %vm199_vm5 = vcmp.eq.f32.partialorder %v198_v26, 8.507059e+37 }
 0x135   :  { %v236_v28 = vmul.f32 %v3108_v20, %v3565_v62  ;;  %v3617_v29 = vpop.eup %3109  ;;  %v192_v30 = vmul.f32 %v3557_v59, %v191_v15  ;;  %vm241_vm9 = vweird.f32 %v3108_v20  ;;  %vm3646_vm12 = vmor %vm256_vm11, %vm257_vm8  ;;  %v201_v36 = vor.u32 1.1754944e-38, %v200_v27 }
 0x136   :  { %v253_v31 = vsub.f32 1.0, %v252_v19  ;;  %v3625_v33 = vpop.eup %3111  ;;  %v269_v37 = vmul.f32 %v3617_v29, %v3569_v63  ;;  %vm242_vm13 = vmor %vm240_vm10, %vm241_vm9  ;;  %vm274_vm1 = vweird.f32 %v3617_v29  ;;  %vm290_vm8 = vweird.f32 %v3578_v2 }
 0x137   :  { %v237_v34 = vsub.f32 1.0, %v236_v28  ;;  %v3631_v38 = vpop.eup %3113  ;;  %v193_v47 = vadd.f32 %v3557_v59, %v192_v30  ;;  %v279_v28 = vand.u32 2147483648, %v3569_v63  ;;  %vm3687_vm6 = vmor %vm273_vm0, %vm274_vm1  ;;  %vm93_vm10 = vweird.f32 %v3548_v56 }
 0x138   :  { %v254_v40 = vmul.f32 %v3589_v10, %v253_v31  ;;  %v3637_v41 = vpop.eup %3115  ;;  %v270_v43 = vsub.f32 1.0, %v269_v37  ;;  %v286_v44 = vmul.f32 %v3631_v38, %v3578_v2  ;;  %vm291_vm7 = vweird.f32 %v3631_v38 }
 0x139   :  { %v238_v42 = vmul.f32 %v3108_v20, %v237_v34  ;;  %v3661_v8 = vpop.eup %3117  ;;  %v197_v30 = vsel %vm3667_vm2, %v3557_v59, %v193_v47  ;;  %v277_v34 = vand.u32 2147483647, %v3569_v63  ;;  %v296_v63 = vand.u32 2147483648, %v3578_v2  ;;  %vm3753_vm2 = vmor %vm92_vm4, %vm93_vm10 }
 0x13a   :  { %v255_v45 = vadd.f32 %v3589_v10, %v254_v40  ;;  %v271_v50 = vmul.f32 %v3617_v29, %v270_v43  ;;  %v287_v60 = vsub.f32 1.0, %v286_v44  ;;  %v304_v35 = vmul.f32 %v3661_v8, %v3623_v32 }
 0x13b   :  { %v239_v48 = vadd.f32 %v3108_v20, %v238_v42  ;;  %v3696_v42 = vsel %vm199_vm5, %v201_v36, %v197_v30  ;;  %v280_v43 = vor.u32 1.1754944e-38, %v279_v28  ;;  %vm278_vm9 = vcmp.eq.f32.partialorder %v277_v34, 8.507059e+37 }
 0x13c   :  { %v259_v1 = vsel %vm3646_vm12, %v3589_v10, %v255_v45  ;;  %v272_v5 = vadd.f32 %v3617_v29, %v271_v50  ;;  %v288_v10 = vmul.f32 %v3631_v38, %v287_v60  ;;  %v305_v27 = vsub.f32 1.0, %v304_v35  ;;  %vm3707_vm12 = vmor %vm290_vm8, %vm291_vm7 }
 0x13d   :  { %v243_v58 = vsel %vm242_vm13, %v3108_v20, %v239_v48  ;;  %v263_v20 = vor.u32 1.1754944e-38, %v262_v46  ;;  %v294_v45 = vand.u32 2147483647, %v3578_v2  ;;  %vm110_vm11 = vweird.f32 %v3550_v57 }
 0x13e   :  { %v248_v19 = vsel %vm245_vm14, %v247_v61, %v243_v58  ;;  %v276_v40 = vsel %vm3687_vm6, %v3617_v29, %v272_v5  ;;  %v289_v26 = vadd.f32 %v3631_v38, %v288_v10  ;;  %v306_v46 = vmul.f32 %v3661_v8, %v305_v27  ;;  %vm3737_vm0 = vmor %vm109_vm3, %vm110_vm11 }
 0x13f   :  { %v250_v31 = vsub.f32 0.2, %v248_v19  ;;  %v264_v37 = vsel %vm3651_vm15, %v263_v20, %v259_v1  ;;  %v123_v29 = vsub.f32 1.0, %v3607_v24  ;;  %v281_v47 = vsel %vm278_vm9, %v280_v43, %v276_v40 }
 0x140   :  { %v91_v49 = vadd.f32 %v3548_v56, %v3600_v21  ;;  %v108_v2 = vadd.f32 %v3550_v57, %v3603_v23  ;;  %v293_v60 = vsel %vm3707_vm12, %v3631_v38, %v289_v26  ;;  %vm3720_vm13 = vcmp.eq.f32.partialorder %v96_v11, 8.507059e+37 }
 0x141   :  { %v265_v59 = vmul.f32 %v264_v37, %v250_v31  ;;  %v140_v61 = vsub.f32 1.0, %v3611_v25  ;;  %v156_v62 = vmul.f32 %v3625_v33, %v3572_v0  ;;  %v3729_v21 = vmul.f32 %v3696_v42, %v3696_v42 }
 0x142   :  { %v297_v23 = vor.u32 1.1754944e-38, %v296_v63  ;;  %vm295_vm14 = vcmp.eq.f32.partialorder %v294_v45, 8.507059e+37  ;;  %v307_v38 = vadd.f32 %v3661_v8, %v306_v46  ;;  %vm309_vm15 = vweird.f32 %v3661_v8 }
 0x143   :  { %v266_v44 = vsub.f32 1.0, %v265_v59  ;;  %vm3743_vm1 = vcmp.eq.f32.partialorder %v113_v16, 8.507059e+37  ;;  %v124_v1 = vmul.f32 %v3583_v4, %v123_v29  ;;  %v314_v15 = vand.u32 2147483648, %v3623_v32 }
 0x144   :  { %v298_v5 = vsel %vm295_vm14, %v297_v23, %v293_v60  ;;  %v112_v16 = vsel %vm3737_vm0, %v3550_v57, %v108_v2  ;;  %vm308_vm3 = vweird.f32 %v3623_v32  ;;  %v312_v28 = vand.u32 2147483647, %v3623_v32 }
 0x145   :  { %v282_v50 = vmul.f32 %v281_v47, %v266_v44  ;;  %v95_v10 = vsel %vm3753_vm2, %v3548_v56, %v91_v49  ;;  %v116_v30 = vor.u32 1.1754944e-38, %v115_v18  ;;  %vm127_vm4 = vweird.f32 %v3583_v4  ;;  %vm3771_vm5 = vmor %vm308_vm3, %vm309_vm15 }
 0x146   :  { %v209_v31 = vmul.f32 0.003968254, %v3729_v21  ;;  %v141_v34 = vmul.f32 %v3586_v9, %v140_v61  ;;  %v157_v32 = vsub.f32 1.0, %v156_v62  ;;  %v311_v56 = vsel %vm3771_vm5, %v3661_v8, %v307_v38 }
 0x147   :  { %v283_v58 = vadd.f32 1.0, %v282_v50  ;;  %v117_v52 = vsel %vm3743_vm1, %v116_v30, %v112_v16  ;;  %v125_v18 = vadd.f32 %v3583_v4, %v124_v1  ;;  %v173_v36 = vmul.f32 %v3637_v41, %v3581_v3 }
 0x148   :  { %v315_v37 = vor.u32 1.1754944e-38, %v314_v15  ;;  %v99_v39 = vor.u32 1.1754944e-38, %v98_v12  ;;  %v132_v59 = vand.u32 2147483648, %v3543_v54  ;;  %vm313_vm6 = vcmp.eq.f32.partialorder %v312_v28, 8.507059e+37 }
 0x149   :  { %v299_v20 = vmul.f32 %v298_v5, %v283_v58  ;;  %vm126_vm7 = vweird.f32 %v3543_v54  ;;  %v130_v8 = vand.u32 2147483647, %v3543_v54  ;;  %v210_v26 = vsub.f32 0.008333334, %v209_v31 }
 0x14a   :  { %v316_v27 = vsel %vm313_vm6, %v315_v37, %v311_v56  ;;  %v100_v43 = vsel %vm3720_vm13, %v99_v39, %v95_v10  ;;  %vm3793_vm8 = vmor %vm126_vm7, %vm127_vm4  ;;  %v142_v12 = vadd.f32 %v3586_v9, %v141_v34  ;;  %vm144_vm9 = vweird.f32 %v3586_v9 }
 0x14b   :  { %v300_v35 = vadd.f32 1.0, %v299_v20  ;;  %v119_v45 = vadd.f32 %v117_v52, %v100_v43  ;;  %v129_v54 = vsel %vm3793_vm8, %v3583_v4, %v125_v18  ;;  %v158_v46 = vmul.f32 %v3625_v33, %v157_v32 }
 0x14c   :  { %v174_v29 = vsub.f32 1.0, %v173_v36  ;;  %v133_v47 = vor.u32 1.1754944e-38, %v132_v59  ;;  %v149_v48 = vand.u32 2147483648, %v3546_v55  ;;  %3119 = vlog2.f32 %v3537_v53 }
 0x14d   :  { %v301_v40 = vmul.f32 %v300_v35, %v117_v52  ;;  %vm131_vm10 = vcmp.eq.f32.partialorder %v130_v8, 8.507059e+37  ;;  %vm143_vm11 = vweird.f32 %v3546_v55  ;;  %v147_v2 = vand.u32 2147483647, %v3546_v55 }
 0x14e   :  { %v211_v50 = vmul.f32 %v210_v26, %v3729_v21  ;;  %v134_v60 = vsel %vm131_vm10, %v133_v47, %v129_v54  ;;  %vm145_vm12 = vmor %vm143_vm11, %vm144_vm9  ;;  %vm161_vm13 = vweird.f32 %v3625_v33  ;;  %v159_v53 = vadd.f32 %v3625_v33, %v158_v46 }
 0x14f   :  { %v318_v44 = vadd.f32 %v316_v27, %v301_v40  ;;  %v136_v4 = vadd.f32 %v134_v60, %v119_v45  ;;  %v146_v24 = vsel %vm145_vm12, %v3586_v9, %v142_v12  ;;  %v175_v61 = vmul.f32 %v3637_v41, %v174_v29 }
 0x150   :  { %v150_v62 = vor.u32 1.1754944e-38, %v149_v48  ;;  %v164_v23 = vand.u32 2147483647, %v3572_v0  ;;  %v166_v55 = vand.u32 2147483648, %v3572_v0  ;;  %vm148_vm14 = vcmp.eq.f32.partialorder %v147_v2, 8.507059e+37 }
 0x151   :  { %v319_v49 = vsub.f32 %v100_v43, %v318_v44  ;;  %vm160_vm15 = vweird.f32 %v3572_v0  ;;  %v212_v58 = vsub.f32 0.083333336, %v211_v50  ;;  %vm178_vm1 = vweird.f32 %v3637_v41 }
 0x152   :  { %v3120_v38 = vpop.eup %3119  ;;  %v151_v11 = vsel %vm148_vm14, %v150_v62, %v146_v24  ;;  %vm3817_vm0 = vmor %vm160_vm15, %vm161_vm13  ;;  %v176_v5 = vadd.f32 %v3637_v41, %v175_v61  ;;  %v207_v15 = vmul.f32 0.5, %v3696_v42  ;;  %vm165_vm2 = vcmp.eq.f32.partialorder %v164_v23, 8.507059e+37 }
 0x153   :  { %3121 = vrcp.f32 %v319_v49  ;;  %v153_v9 = vadd.f32 %v151_v11, %v136_v4  ;;  %v163_v1 = vsel %vm3817_vm0, %v3625_v33, %v159_v53  ;;  %v167_v0 = vor.u32 1.1754944e-38, %v166_v55 }
 0x154   :  { %vm177_vm3 = vweird.f32 %v3581_v3  ;;  %v183_v16 = vand.u32 2147483648, %v3581_v3  ;;  %v181_v20 = vand.u32 2147483647, %v3581_v3  ;;  %v206_v28 = vmul.f32 0.6931472, %v3120_v38 }
 0x155   :  { %v213_v10 = vmul.f32 %v212_v58, %v3729_v21  ;;  %3123 = vlog2.f32 %v3531_v51  ;;  %v168_v33 = vsel %vm165_vm2, %v167_v0, %v163_v1  ;;  %vm179_vm4 = vmor %vm177_vm3, %vm178_vm1  ;;  %v331_v37 = vand.u32 2147483648, %v319_v49 }
 0x156   :  { %v170_v42 = vadd.f32 %v168_v33, %v153_v9  ;;  %v180_v31 = vsel %vm179_vm4, %v3637_v41, %v176_v5  ;;  %v208_v57 = vsub.f32 %v206_v28, %v207_v15  ;;  %v184_v32 = vor.u32 1.1754944e-38, %v183_v16 }
 0x157   :  { %vm182_vm5 = vcmp.eq.f32.partialorder %v181_v20, 8.507059e+37  ;;  %vm325_vm7 = vweird.f32 %v319_v49  ;;  %v329_v59 = vand.u32 2147483647, %v319_v49  ;;  %v332_v41 = vor.u32 1.1754944e-38, %v331_v37 }
 0x158   :  { %v214_v35 = vsub.f32 %v208_v57, %v213_v10  ;;  %v185_v3 = vsel %vm182_vm5, %v184_v32, %v180_v31 }
 0x159   :  { %v3122_v19 = vpop.eup %3121  ;;  %v187_v52 = vadd.f32 %v185_v3, %v170_v42  ;;  %vm330_vm9 = vcmp.eq.f32.partialorder %v329_v59, 8.507059e+37 }
 0x15a   :  { %v321_v30 = vmul.f32 %v3122_v19, %v319_v49  ;;  %vm326_vm6 = vweird.f32 %v3122_v19 }
 0x15b   :  { %v3124_v18 = vpop.eup %3123  ;;  %v215_v21 = vsub.f32 %v214_v35, %v187_v52  ;;  %vm327_vm8 = vmor %vm325_vm7, %vm326_vm6 }
 0x15c   :  { %v322_v34 = vsub.f32 1.0, %v321_v30  ;;  %v85_v39 = vmul.f32 0.6931472, %v3124_v18 }
 0x15e   :  { %v323_v56 = vmul.f32 %v3122_v19, %v322_v34  ;;  %v216_v40 = vsub.f32 %v85_v39, %v215_v21 }
 0x160   :  { %v324_v36 = vadd.f32 %v3122_v19, %v323_v56  ;;  %v217_v27 = vsub.f32 %v216_v40, %v3525_v22 }
 0x162   :  { %v328_v8 = vsel %vm327_vm8, %v3122_v19, %v324_v36 }
 0x163   :  { %v333_v26 = vsel %vm330_vm9, %v332_v41, %v328_v8 }
 0x164   :  { %v334_v43 = vmul.f32 %v333_v26, %v217_v27 }
 0x166   :  { %v3837_v63 = vsub.f32 %v3531_v51, %v334_v43 }
 0x168   :  { %v3840_v12 = vadd.f32 1.0, %v3837_v63  ;;  %v3843_v44 = vadd.f32 6.0, %v3837_v63  ;;  %3125 = vrcp.f32 %v3837_v63  ;;  %v3849_v45 = vadd.f32 2.0, %v3837_v63 }
 0x169   :  { %v3852_v54 = vadd.f32 3.0, %v3837_v63  ;;  %v3878_v60 = vadd.f32 4.0, %v3837_v63  ;;  %v3887_v53 = vadd.f32 5.0, %v3837_v63  ;;  %v348_v38 = vand.u32 2147483647, %v3837_v63 }
 0x16a   :  { %3127 = vrcp.f32 %v3840_v12  ;;  %v3861_v29 = vmul.f32 %v3840_v12, %v3840_v12  ;;  %v3875_v50 = vmul.f32 3.0, %v3840_v12  ;;  %v3884_v24 = vmul.f32 2.0, %v3840_v12 }
 0x16b   :  { %3129 = vrcp.f32 %v3843_v44  ;;  %v350_v11 = vand.u32 2147483648, %v3837_v63  ;;  %v365_v9 = vand.u32 2147483647, %v3840_v12  ;;  %v367_v1 = vand.u32 2147483648, %v3840_v12 }
 0x16c   :  { %3131 = vrcp.f32 %v3849_v45  ;;  %v3871_v2 = vmul.f32 7.0, %v3861_v29  ;;  %vm446_vm10 = vweird.f32 %v3843_v44  ;;  %v450_v28 = vand.u32 2147483647, %v3843_v44 }
 0x16d   :  { %3133 = vrcp.f32 %v3852_v54  ;;  %v452_v10 = vand.u32 2147483648, %v3843_v44  ;;  %v3929_v57 = vmul.f32 %v3837_v63, %v3837_v63  ;;  %v512_v56 = vand.u32 2147483647, %v3861_v29 }
 0x16e   :  { %v3854_v51 = vpop.eup %3125  ;;  %3135 = vrcp.f32 %v3861_v29  ;;  %v496_v35 = vand.u32 2147483647, %v3871_v2  ;;  %v498_v18 = vand.u32 2147483648, %v3871_v2  ;;  %vm492_vm14 = vweird.f32 %v3871_v2 }
 0x16f   :  { %v340_v48 = vmul.f32 %v3854_v51, %v3837_v63  ;;  %3137 = vrcp.f32 %v3871_v2  ;;  %vm508_vm15 = vweird.f32 %v3861_v29  ;;  %v514_v8 = vand.u32 2147483648, %v3861_v29 }
 0x170   :  { %v3856_v46 = vpop.eup %3127  ;;  %3139 = vrcp.f32 %v3875_v50  ;;  %vm497_vm2 = vcmp.eq.f32.partialorder %v496_v35, 8.507059e+37  ;;  %vm3957_vm3 = vcmp.eq.f32.partialorder %v512_v56, 8.507059e+37  ;;  %vm525_vm4 = vweird.f32 %v3875_v50 }
 0x171   :  { %v3863_v47 = vpop.eup %3129  ;;  %v357_v49 = vmul.f32 %v3856_v46, %v3840_v12  ;;  %v341_v62 = vsub.f32 1.0, %v340_v48  ;;  %3141 = vrcp.f32 %v3878_v60  ;;  %vm361_vm7 = vweird.f32 %v3840_v12 }
 0x172   :  { %v442_v4 = vmul.f32 %v3863_v47, %v3843_v44  ;;  %v3889_v61 = vpop.eup %3131  ;;  %3143 = vrcp.f32 %v3884_v24  ;;  %vm447_vm11 = vweird.f32 %v3863_v47  ;;  %vm344_vm8 = vweird.f32 %v3837_v63 }
 0x173   :  { %v358_v23 = vsub.f32 1.0, %v357_v49  ;;  %v3892_v55 = vpop.eup %3133  ;;  %3145 = vrcp.f32 %v3887_v53  ;;  %v3906_v19 = vmul.f32 %v3854_v51, %v341_v62  ;;  %v3913_v16 = vmul.f32 %v3889_v61, %v3849_v45  ;;  %vm3973_vm6 = vmor %vm446_vm10, %vm447_vm11 }
 0x174   :  { %v3895_v58 = vpop.eup %3135  ;;  %v443_v25 = vsub.f32 1.0, %v442_v4  ;;  %v3917_v20 = vmul.f32 %v3892_v55, %v3852_v54  ;;  %3147 = vrcp.f32 %v3929_v57  ;;  %v499_v49 = vor.u32 1.1754944e-38, %v498_v18 }
 0x175   :  { %v504_v5 = vmul.f32 %v3895_v58, %v3861_v29  ;;  %v3138_v15 = vpop.eup %3137  ;;  %v3909_v0 = vmul.f32 %v3856_v46, %v358_v23  ;;  %vm509_vm12 = vweird.f32 %v3895_v58  ;;  %vm451_vm9 = vcmp.eq.f32.partialorder %v450_v28, 8.507059e+37 }
 0x176   :  { %v488_v30 = vmul.f32 %v3138_v15, %v3871_v2  ;;  %v3923_v33 = vpop.eup %3139  ;;  %v444_v42 = vmul.f32 %v3863_v47, %v443_v25  ;;  %vm493_vm13 = vweird.f32 %v3138_v15  ;;  %vm3952_vm0 = vmor %vm508_vm15, %vm509_vm12  ;;  %v453_v56 = vor.u32 1.1754944e-38, %v452_v10 }
 0x177   :  { %v505_v31 = vsub.f32 1.0, %v504_v5  ;;  %v3931_v34 = vpop.eup %3141  ;;  %v521_v3 = vmul.f32 %v3923_v33, %v3875_v50  ;;  %vm494_vm1 = vmor %vm492_vm14, %vm493_vm13  ;;  %vm526_vm5 = vweird.f32 %v3923_v33  ;;  %vm542_vm12 = vweird.f32 %v3884_v24 }
 0x178   :  { %v489_v32 = vsub.f32 1.0, %v488_v30  ;;  %v3937_v52 = vpop.eup %3143  ;;  %v445_v41 = vadd.f32 %v3863_v47, %v444_v42  ;;  %v531_v30 = vand.u32 2147483648, %v3875_v50  ;;  %vm3993_vm10 = vmor %vm525_vm4, %vm526_vm5  ;;  %vm345_vm14 = vweird.f32 %v3854_v51 }
 0x179   :  { %v506_v21 = vmul.f32 %v3895_v58, %v505_v31  ;;  %v3943_v36 = vpop.eup %3145  ;;  %v522_v39 = vsub.f32 1.0, %v521_v3  ;;  %v538_v59 = vmul.f32 %v3937_v52, %v3884_v24  ;;  %vm543_vm11 = vweird.f32 %v3937_v52 }
 0x17a   :  { %v490_v37 = vmul.f32 %v3138_v15, %v489_v32  ;;  %v3967_v23 = vpop.eup %3147  ;;  %v449_v42 = vsel %vm3973_vm6, %v3863_v47, %v445_v41  ;;  %v529_v32 = vand.u32 2147483647, %v3875_v50  ;;  %v548_v50 = vand.u32 2147483648, %v3884_v24  ;;  %vm4059_vm6 = vmor %vm344_vm8, %vm345_vm14 }
 0x17b   :  { %v507_v40 = vadd.f32 %v3895_v58, %v506_v21  ;;  %v523_v43 = vmul.f32 %v3923_v33, %v522_v39  ;;  %v539_v48 = vsub.f32 1.0, %v538_v59  ;;  %v556_v35 = vmul.f32 %v3967_v23, %v3929_v57 }
 0x17c   :  { %v491_v26 = vadd.f32 %v3138_v15, %v490_v37  ;;  %v4002_v37 = vsel %vm451_vm9, %v453_v56, %v449_v42  ;;  %v532_v39 = vor.u32 1.1754944e-38, %v531_v30  ;;  %vm530_vm13 = vcmp.eq.f32.partialorder %v529_v32, 8.507059e+37 }
 0x17d   :  { %v511_v4 = vsel %vm3952_vm0, %v3895_v58, %v507_v40  ;;  %v524_v62 = vadd.f32 %v3923_v33, %v523_v43  ;;  %v540_v58 = vmul.f32 %v3937_v52, %v539_v48  ;;  %v557_v10 = vsub.f32 1.0, %v556_v35  ;;  %vm4013_vm0 = vmor %vm542_vm12, %vm543_vm11 }
 0x17e   :  { %v495_v29 = vsel %vm494_vm1, %v3138_v15, %v491_v26  ;;  %v515_v15 = vor.u32 1.1754944e-38, %v514_v8  ;;  %v546_v40 = vand.u32 2147483647, %v3884_v24  ;;  %vm362_vm15 = vweird.f32 %v3856_v46 }
 0x17f   :  { %v500_v5 = vsel %vm497_vm2, %v499_v49, %v495_v29  ;;  %v528_v21 = vsel %vm3993_vm10, %v3923_v33, %v524_v62  ;;  %v541_v28 = vadd.f32 %v3937_v52, %v540_v58  ;;  %v558_v8 = vmul.f32 %v3967_v23, %v557_v10  ;;  %vm4043_vm4 = vmor %vm361_vm7, %vm362_vm15 }
 0x180   :  { %v502_v31 = vsub.f32 0.2, %v500_v5  ;;  %v516_v3 = vsel %vm3957_vm3, %v515_v15, %v511_v4  ;;  %v375_v33 = vsub.f32 1.0, %v3913_v16  ;;  %v533_v41 = vsel %vm530_vm13, %v532_v39, %v528_v21 }
 0x181   :  { %v343_v27 = vadd.f32 %v3854_v51, %v3906_v19  ;;  %v360_v24 = vadd.f32 %v3856_v46, %v3909_v0  ;;  %v545_v48 = vsel %vm4013_vm0, %v3937_v52, %v541_v28  ;;  %vm4026_vm1 = vcmp.eq.f32.partialorder %v348_v38, 8.507059e+37 }
 0x182   :  { %v517_v47 = vmul.f32 %v516_v3, %v502_v31  ;;  %v392_v49 = vsub.f32 1.0, %v3917_v20  ;;  %v408_v2 = vmul.f32 %v3931_v34, %v3878_v60  ;;  %v4035_v19 = vmul.f32 %v4002_v37, %v4002_v37 }
 0x183   :  { %v549_v0 = vor.u32 1.1754944e-38, %v548_v50  ;;  %vm547_vm2 = vcmp.eq.f32.partialorder %v546_v40, 8.507059e+37  ;;  %v559_v52 = vadd.f32 %v3967_v23, %v558_v8  ;;  %vm561_vm3 = vweird.f32 %v3967_v23 }
 0x184   :  { %v518_v59 = vsub.f32 1.0, %v517_v47  ;;  %vm4049_vm5 = vcmp.eq.f32.partialorder %v365_v9, 8.507059e+37  ;;  %v376_v4 = vmul.f32 %v3889_v61, %v375_v33  ;;  %v566_v25 = vand.u32 2147483648, %v3929_v57 }
 0x185   :  { %v550_v62 = vsel %vm547_vm2, %v549_v0, %v545_v48  ;;  %v364_v9 = vsel %vm4043_vm4, %v3856_v46, %v360_v24  ;;  %vm560_vm7 = vweird.f32 %v3929_v57  ;;  %v564_v30 = vand.u32 2147483647, %v3929_v57 }
 0x186   :  { %v534_v43 = vmul.f32 %v533_v41, %v518_v59  ;;  %v347_v58 = vsel %vm4059_vm6, %v3854_v51, %v343_v27  ;;  %v368_v42 = vor.u32 1.1754944e-38, %v367_v1  ;;  %vm379_vm8 = vweird.f32 %v3889_v61  ;;  %vm4077_vm9 = vmor %vm560_vm7, %vm561_vm3 }
 0x187   :  { %v461_v31 = vmul.f32 0.003968254, %v4035_v19  ;;  %v393_v32 = vmul.f32 %v3892_v55, %v392_v49  ;;  %v409_v57 = vsub.f32 1.0, %v408_v2  ;;  %v563_v51 = vsel %vm4077_vm9, %v3967_v23, %v559_v52 }
 0x188   :  { %v535_v29 = vadd.f32 1.0, %v534_v43  ;;  %v369_v12 = vsel %vm4049_vm5, %v368_v42, %v364_v9  ;;  %v377_v1 = vadd.f32 %v3889_v61, %v376_v4  ;;  %v425_v56 = vmul.f32 %v3943_v36, %v3887_v53 }
 0x189   :  { %v567_v3 = vor.u32 1.1754944e-38, %v566_v25  ;;  %v351_v18 = vor.u32 1.1754944e-38, %v350_v11  ;;  %v384_v47 = vand.u32 2147483648, %v3849_v45  ;;  %vm565_vm10 = vcmp.eq.f32.partialorder %v564_v30, 8.507059e+37 }
 0x18a   :  { %v551_v15 = vmul.f32 %v550_v62, %v535_v29  ;;  %vm378_vm11 = vweird.f32 %v3849_v45  ;;  %v382_v23 = vand.u32 2147483647, %v3849_v45  ;;  %v462_v28 = vsub.f32 0.008333334, %v461_v31 }
 0x18b   :  { %v568_v10 = vsel %vm565_vm10, %v567_v3, %v563_v51  ;;  %v352_v39 = vsel %vm4026_vm1, %v351_v18, %v347_v58  ;;  %vm4099_vm12 = vmor %vm378_vm11, %vm379_vm8  ;;  %v394_v11 = vadd.f32 %v3892_v55, %v393_v32  ;;  %vm396_vm13 = vweird.f32 %v3892_v55 }
 0x18c   :  { %v552_v35 = vadd.f32 1.0, %v551_v15  ;;  %v371_v40 = vadd.f32 %v369_v12, %v352_v39  ;;  %v381_v45 = vsel %vm4099_vm12, %v3889_v61, %v377_v1  ;;  %v410_v8 = vmul.f32 %v3931_v34, %v409_v57 }
 0x18d   :  { %v426_v33 = vsub.f32 1.0, %v425_v56  ;;  %v385_v41 = vor.u32 1.1754944e-38, %v384_v47  ;;  %v401_v26 = vand.u32 2147483648, %v3852_v54  ;;  %3149 = vlog2.f32 %v3843_v44 }
 0x18e   :  { %v553_v21 = vmul.f32 %v552_v35, %v369_v12  ;;  %vm383_vm14 = vcmp.eq.f32.partialorder %v382_v23, 8.507059e+37  ;;  %vm395_vm15 = vweird.f32 %v3852_v54  ;;  %v399_v24 = vand.u32 2147483647, %v3852_v54 }
 0x18f   :  { %v463_v43 = vmul.f32 %v462_v28, %v4035_v19  ;;  %v386_v48 = vsel %vm383_vm14, %v385_v41, %v381_v45  ;;  %vm397_vm0 = vmor %vm395_vm15, %vm396_vm13  ;;  %vm413_vm1 = vweird.f32 %v3931_v34  ;;  %v411_v44 = vadd.f32 %v3931_v34, %v410_v8 }
 0x190   :  { %v570_v59 = vadd.f32 %v568_v10, %v553_v21  ;;  %v388_v61 = vadd.f32 %v386_v48, %v371_v40  ;;  %v398_v16 = vsel %vm397_vm0, %v3892_v55, %v394_v11  ;;  %v427_v49 = vmul.f32 %v3943_v36, %v426_v33 }
 0x191   :  { %v402_v2 = vor.u32 1.1754944e-38, %v401_v26  ;;  %v416_v0 = vand.u32 2147483647, %v3878_v60  ;;  %v418_v54 = vand.u32 2147483648, %v3878_v60  ;;  %vm400_vm2 = vcmp.eq.f32.partialorder %v399_v24, 8.507059e+37 }
 0x192   :  { %v571_v27 = vsub.f32 %v352_v39, %v570_v59  ;;  %vm412_vm3 = vweird.f32 %v3878_v60  ;;  %v464_v29 = vsub.f32 0.083333336, %v463_v43  ;;  %vm430_vm5 = vweird.f32 %v3943_v36 }
 0x193   :  { %v3150_v52 = vpop.eup %3149  ;;  %v403_v38 = vsel %vm400_vm2, %v402_v2, %v398_v16  ;;  %vm4123_vm4 = vmor %vm412_vm3, %vm413_vm1  ;;  %v428_v62 = vadd.f32 %v3943_v36, %v427_v49  ;;  %v459_v25 = vmul.f32 0.5, %v4002_v37  ;;  %vm417_vm6 = vcmp.eq.f32.partialorder %v416_v0, 8.507059e+37 }
 0x194   :  { %3151 = vrcp.f32 %v571_v27  ;;  %v405_v55 = vadd.f32 %v403_v38, %v388_v61  ;;  %v415_v4 = vsel %vm4123_vm4, %v3931_v34, %v411_v44  ;;  %v419_v60 = vor.u32 1.1754944e-38, %v418_v54 }
 0x195   :  { %vm429_vm7 = vweird.f32 %v3887_v53  ;;  %v435_v9 = vand.u32 2147483648, %v3887_v53  ;;  %v433_v15 = vand.u32 2147483647, %v3887_v53  ;;  %v458_v30 = vmul.f32 0.6931472, %v3150_v52 }
 0x196   :  { %v465_v58 = vmul.f32 %v464_v29, %v4035_v19  ;;  %3153 = vlog2.f32 %v3837_v63  ;;  %v420_v34 = vsel %vm417_vm6, %v419_v60, %v415_v4  ;;  %vm431_vm8 = vmor %vm429_vm7, %vm430_vm5  ;;  %v583_v3 = vand.u32 2147483648, %v571_v27 }
 0x197   :  { %v422_v37 = vadd.f32 %v420_v34, %v405_v55  ;;  %v432_v31 = vsel %vm431_vm8, %v3943_v36, %v428_v62  ;;  %v460_v46 = vsub.f32 %v458_v30, %v459_v25  ;;  %v436_v57 = vor.u32 1.1754944e-38, %v435_v9 }
 0x198   :  { %vm434_vm9 = vcmp.eq.f32.partialorder %v433_v15, 8.507059e+37  ;;  %vm577_vm11 = vweird.f32 %v571_v27  ;;  %v581_v47 = vand.u32 2147483647, %v571_v27  ;;  %v584_v36 = vor.u32 1.1754944e-38, %v583_v3 }
 0x199   :  { %v466_v35 = vsub.f32 %v460_v46, %v465_v58  ;;  %v437_v53 = vsel %vm434_vm9, %v436_v57, %v432_v31 }
 0x19a   :  { %v3152_v5 = vpop.eup %3151  ;;  %v439_v12 = vadd.f32 %v437_v53, %v422_v37  ;;  %vm582_vm13 = vcmp.eq.f32.partialorder %v581_v47, 8.507059e+37 }
 0x19b   :  { %v573_v42 = vmul.f32 %v3152_v5, %v571_v27  ;;  %vm578_vm10 = vweird.f32 %v3152_v5 }
 0x19c   :  { %v3154_v1 = vpop.eup %3153  ;;  %v467_v19 = vsub.f32 %v466_v35, %v439_v12  ;;  %vm579_vm12 = vmor %vm577_vm11, %vm578_vm10 }
 0x19d   :  { %v574_v32 = vsub.f32 1.0, %v573_v42  ;;  %v337_v18 = vmul.f32 0.6931472, %v3154_v1 }
 0x19f   :  { %v575_v51 = vmul.f32 %v3152_v5, %v574_v32  ;;  %v468_v21 = vsub.f32 %v337_v18, %v467_v19 }
 0x1a1   :  { %v576_v56 = vadd.f32 %v3152_v5, %v575_v51  ;;  %v469_v10 = vsub.f32 %v468_v21, %v3525_v22 }
 0x1a3   :  { %v580_v23 = vsel %vm579_vm12, %v3152_v5, %v576_v56 }
 0x1a4   :  { %v585_v28 = vsel %vm582_vm13, %v584_v36, %v580_v23 }
 0x1a5   :  { %v586_v39 = vmul.f32 %v585_v28, %v469_v10 }
 0x1a7   :  { %v4143_v50 = vsub.f32 %v3837_v63, %v586_v39 }
 0x1a9   :  { %v4146_v11 = vadd.f32 1.0, %v4143_v50  ;;  %v4149_v59 = vadd.f32 6.0, %v4143_v50  ;;  %3155 = vrcp.f32 %v4143_v50  ;;  %v4155_v40 = vadd.f32 2.0, %v4143_v50 }
 0x1aa   :  { %v4158_v45 = vadd.f32 3.0, %v4143_v50  ;;  %v4184_v48 = vadd.f32 4.0, %v4143_v50  ;;  %v4193_v44 = vadd.f32 5.0, %v4143_v50  ;;  %v600_v52 = vand.u32 2147483647, %v4143_v50 }
 0x1ab   :  { %3157 = vrcp.f32 %v4146_v11  ;;  %v4167_v33 = vmul.f32 %v4146_v11, %v4146_v11  ;;  %v4181_v43 = vmul.f32 3.0, %v4146_v11  ;;  %v4190_v16 = vmul.f32 2.0, %v4146_v11 }
 0x1ac   :  { %3159 = vrcp.f32 %v4149_v59  ;;  %v602_v38 = vand.u32 2147483648, %v4143_v50  ;;  %v617_v55 = vand.u32 2147483647, %v4146_v11  ;;  %v619_v4 = vand.u32 2147483648, %v4146_v11 }
 0x1ad   :  { %3161 = vrcp.f32 %v4155_v40  ;;  %v4177_v24 = vmul.f32 7.0, %v4167_v33  ;;  %vm698_vm14 = vweird.f32 %v4149_v59  ;;  %v702_v30 = vand.u32 2147483647, %v4149_v59 }
 0x1ae   :  { %3163 = vrcp.f32 %v4158_v45  ;;  %v704_v58 = vand.u32 2147483648, %v4149_v59  ;;  %v4235_v46 = vmul.f32 %v4143_v50, %v4143_v50  ;;  %v764_v51 = vand.u32 2147483647, %v4167_v33 }
 0x1af   :  { %v4160_v63 = vpop.eup %3155  ;;  %3165 = vrcp.f32 %v4167_v33  ;;  %v748_v35 = vand.u32 2147483647, %v4177_v24  ;;  %v750_v1 = vand.u32 2147483648, %v4177_v24  ;;  %vm744_vm2 = vweird.f32 %v4177_v24 }
 0x1b0   :  { %v592_v26 = vmul.f32 %v4160_v63, %v4143_v50  ;;  %3167 = vrcp.f32 %v4177_v24  ;;  %vm760_vm3 = vweird.f32 %v4167_v33  ;;  %v766_v23 = vand.u32 2147483648, %v4167_v33 }
 0x1b1   :  { %v4162_v8 = vpop.eup %3157  ;;  %3169 = vrcp.f32 %v4181_v43  ;;  %vm749_vm6 = vcmp.eq.f32.partialorder %v748_v35, 8.507059e+37  ;;  %vm4263_vm7 = vcmp.eq.f32.partialorder %v764_v51, 8.507059e+37  ;;  %vm777_vm8 = vweird.f32 %v4181_v43 }
 0x1b2   :  { %v4169_v41 = vpop.eup %3159  ;;  %v609_v27 = vmul.f32 %v4162_v8, %v4146_v11  ;;  %v593_v2 = vsub.f32 1.0, %v592_v26  ;;  %3171 = vrcp.f32 %v4184_v48  ;;  %vm613_vm11 = vweird.f32 %v4146_v11 }
 0x1b3   :  { %v694_v61 = vmul.f32 %v4169_v41, %v4149_v59  ;;  %v4195_v49 = vpop.eup %3161  ;;  %3173 = vrcp.f32 %v4190_v16  ;;  %vm699_vm15 = vweird.f32 %v4169_v41  ;;  %vm596_vm12 = vweird.f32 %v4143_v50 }
 0x1b4   :  { %v610_v0 = vsub.f32 1.0, %v609_v27  ;;  %v4198_v54 = vpop.eup %3163  ;;  %3175 = vrcp.f32 %v4193_v44  ;;  %v4212_v5 = vmul.f32 %v4160_v63, %v593_v2  ;;  %v4219_v9 = vmul.f32 %v4195_v49, %v4155_v40  ;;  %vm4279_vm10 = vmor %vm698_vm14, %vm699_vm15 }
 0x1b5   :  { %v4201_v29 = vpop.eup %3165  ;;  %v695_v20 = vsub.f32 1.0, %v694_v61  ;;  %v4223_v15 = vmul.f32 %v4198_v54, %v4158_v45  ;;  %3177 = vrcp.f32 %v4235_v46  ;;  %v751_v27 = vor.u32 1.1754944e-38, %v750_v1 }
 0x1b6   :  { %v756_v62 = vmul.f32 %v4201_v29, %v4167_v33  ;;  %v3168_v25 = vpop.eup %3167  ;;  %v4215_v60 = vmul.f32 %v4162_v8, %v610_v0  ;;  %vm761_vm0 = vweird.f32 %v4201_v29  ;;  %vm703_vm13 = vcmp.eq.f32.partialorder %v702_v30, 8.507059e+37 }
 0x1b7   :  { %v740_v42 = vmul.f32 %v3168_v25, %v4177_v24  ;;  %v4229_v34 = vpop.eup %3169  ;;  %v696_v37 = vmul.f32 %v4169_v41, %v695_v20  ;;  %vm745_vm1 = vweird.f32 %v3168_v25  ;;  %vm4258_vm4 = vmor %vm760_vm3, %vm761_vm0  ;;  %v705_v51 = vor.u32 1.1754944e-38, %v704_v58 }
 0x1b8   :  { %v757_v31 = vsub.f32 1.0, %v756_v62  ;;  %v4237_v32 = vpop.eup %3171  ;;  %v773_v53 = vmul.f32 %v4229_v34, %v4181_v43  ;;  %vm746_vm5 = vmor %vm744_vm2, %vm745_vm1  ;;  %vm778_vm9 = vweird.f32 %v4229_v34  ;;  %vm794_vm0 = vweird.f32 %v4190_v16 }
 0x1b9   :  { %v741_v57 = vsub.f32 1.0, %v740_v42  ;;  %v4243_v12 = vpop.eup %3173  ;;  %v697_v36 = vadd.f32 %v4169_v41, %v696_v37  ;;  %v783_v42 = vand.u32 2147483648, %v4181_v43  ;;  %vm4299_vm14 = vmor %vm777_vm8, %vm778_vm9  ;;  %vm597_vm2 = vweird.f32 %v4160_v63 }
 0x1ba   :  { %v758_v19 = vmul.f32 %v4201_v29, %v757_v31  ;;  %v4249_v56 = vpop.eup %3175  ;;  %v774_v18 = vsub.f32 1.0, %v773_v53  ;;  %v790_v47 = vmul.f32 %v4243_v12, %v4190_v16  ;;  %vm795_vm15 = vweird.f32 %v4243_v12 }
 0x1bb   :  { %v742_v3 = vmul.f32 %v3168_v25, %v741_v57  ;;  %v4273_v0 = vpop.eup %3177  ;;  %v701_v37 = vsel %vm4279_vm10, %v4169_v41, %v697_v36  ;;  %v781_v57 = vand.u32 2147483647, %v4181_v43  ;;  %v800_v43 = vand.u32 2147483648, %v4190_v16  ;;  %vm4365_vm10 = vmor %vm596_vm12, %vm597_vm2 }
 0x1bc   :  { %v759_v21 = vadd.f32 %v4201_v29, %v758_v19  ;;  %v775_v39 = vmul.f32 %v4229_v34, %v774_v18  ;;  %v791_v26 = vsub.f32 1.0, %v790_v47  ;;  %v808_v35 = vmul.f32 %v4273_v0, %v4235_v46 }
 0x1bd   :  { %v743_v28 = vadd.f32 %v3168_v25, %v742_v3  ;;  %v4308_v3 = vsel %vm703_vm13, %v705_v51, %v701_v37  ;;  %v784_v18 = vor.u32 1.1754944e-38, %v783_v42  ;;  %vm782_vm1 = vcmp.eq.f32.partialorder %v781_v57, 8.507059e+37 }
 0x1be   :  { %v763_v61 = vsel %vm4258_vm4, %v4201_v29, %v759_v21  ;;  %v776_v2 = vadd.f32 %v4229_v34, %v775_v39  ;;  %v792_v29 = vmul.f32 %v4243_v12, %v791_v26  ;;  %v809_v58 = vsub.f32 1.0, %v808_v35  ;;  %vm4319_vm4 = vmor %vm794_vm0, %vm795_vm15 }
 0x1bf   :  { %v747_v33 = vsel %vm746_vm5, %v3168_v25, %v743_v28  ;;  %v767_v25 = vor.u32 1.1754944e-38, %v766_v23  ;;  %v798_v21 = vand.u32 2147483647, %v4190_v16  ;;  %vm614_vm3 = vweird.f32 %v4162_v8 }
 0x1c0   :  { %v752_v62 = vsel %vm749_vm6, %v751_v27, %v747_v33  ;;  %v780_v19 = vsel %vm4299_vm14, %v4229_v34, %v776_v2  ;;  %v793_v30 = vadd.f32 %v4243_v12, %v792_v29  ;;  %v810_v23 = vmul.f32 %v4273_v0, %v809_v58  ;;  %vm4349_vm8 = vmor %vm613_vm11, %vm614_vm3 }
 0x1c1   :  { %v754_v31 = vsub.f32 0.2, %v752_v62  ;;  %v768_v53 = vsel %vm4263_vm7, %v767_v25, %v763_v61  ;;  %v627_v34 = vsub.f32 1.0, %v4219_v9  ;;  %v785_v36 = vsel %vm782_vm1, %v784_v18, %v780_v19 }
 0x1c2   :  { %v595_v10 = vadd.f32 %v4160_v63, %v4212_v5  ;;  %v612_v16 = vadd.f32 %v4162_v8, %v4215_v60  ;;  %v797_v26 = vsel %vm4319_vm4, %v4243_v12, %v793_v30  ;;  %vm4332_vm5 = vcmp.eq.f32.partialorder %v600_v52, 8.507059e+37 }
 0x1c3   :  { %v769_v41 = vmul.f32 %v768_v53, %v754_v31  ;;  %v644_v27 = vsub.f32 1.0, %v4223_v15  ;;  %v660_v24 = vmul.f32 %v4237_v32, %v4184_v48  ;;  %v4341_v5 = vmul.f32 %v4308_v3, %v4308_v3 }
 0x1c4   :  { %v801_v60 = vor.u32 1.1754944e-38, %v800_v43  ;;  %vm799_vm6 = vcmp.eq.f32.partialorder %v798_v21, 8.507059e+37  ;;  %v811_v12 = vadd.f32 %v4273_v0, %v810_v23  ;;  %vm813_vm7 = vweird.f32 %v4273_v0 }
 0x1c5   :  { %v770_v47 = vsub.f32 1.0, %v769_v41  ;;  %vm4355_vm9 = vcmp.eq.f32.partialorder %v617_v55, 8.507059e+37  ;;  %v628_v61 = vmul.f32 %v4195_v49, %v627_v34  ;;  %v818_v20 = vand.u32 2147483648, %v4235_v46 }
 0x1c6   :  { %v802_v2 = vsel %vm799_vm6, %v801_v60, %v797_v26  ;;  %v616_v55 = vsel %vm4349_vm8, %v4162_v8, %v612_v16  ;;  %vm812_vm11 = vweird.f32 %v4235_v46  ;;  %v816_v42 = vand.u32 2147483647, %v4235_v46 }
 0x1c7   :  { %v786_v39 = vmul.f32 %v785_v36, %v770_v47  ;;  %v599_v29 = vsel %vm4365_vm10, %v4160_v63, %v595_v10  ;;  %v620_v37 = vor.u32 1.1754944e-38, %v619_v4  ;;  %vm631_vm12 = vweird.f32 %v4195_v49  ;;  %vm4383_vm13 = vmor %vm812_vm11, %vm813_vm7 }
 0x1c8   :  { %v713_v31 = vmul.f32 0.003968254, %v4341_v5  ;;  %v645_v57 = vmul.f32 %v4198_v54, %v644_v27  ;;  %v661_v46 = vsub.f32 1.0, %v660_v24  ;;  %v815_v63 = vsel %vm4383_vm13, %v4273_v0, %v811_v12 }
 0x1c9   :  { %v787_v33 = vadd.f32 1.0, %v786_v39  ;;  %v621_v11 = vsel %vm4355_vm9, %v620_v37, %v616_v55  ;;  %v629_v4 = vadd.f32 %v4195_v49, %v628_v61  ;;  %v677_v51 = vmul.f32 %v4249_v56, %v4193_v44 }
 0x1ca   :  { %v819_v53 = vor.u32 1.1754944e-38, %v818_v20  ;;  %v603_v1 = vor.u32 1.1754944e-38, %v602_v38  ;;  %v636_v41 = vand.u32 2147483648, %v4155_v40  ;;  %vm817_vm14 = vcmp.eq.f32.partialorder %v816_v42, 8.507059e+37 }
 0x1cb   :  { %v803_v25 = vmul.f32 %v802_v2, %v787_v33  ;;  %vm630_vm15 = vweird.f32 %v4155_v40  ;;  %v634_v0 = vand.u32 2147483647, %v4155_v40  ;;  %v714_v30 = vsub.f32 0.008333334, %v713_v31 }
 0x1cc   :  { %v820_v58 = vsel %vm817_vm14, %v819_v53, %v815_v63  ;;  %v604_v18 = vsel %vm4332_vm5, %v603_v1, %v599_v29  ;;  %vm4405_vm0 = vmor %vm630_vm15, %vm631_vm12  ;;  %v646_v38 = vadd.f32 %v4198_v54, %v645_v57  ;;  %vm648_vm1 = vweird.f32 %v4198_v54 }
 0x1cd   :  { %v804_v35 = vadd.f32 1.0, %v803_v25  ;;  %v623_v21 = vadd.f32 %v621_v11, %v604_v18  ;;  %v633_v40 = vsel %vm4405_vm0, %v4195_v49, %v629_v4  ;;  %v662_v23 = vmul.f32 %v4237_v32, %v661_v46 }
 0x1ce   :  { %v678_v34 = vsub.f32 1.0, %v677_v51  ;;  %v637_v36 = vor.u32 1.1754944e-38, %v636_v41  ;;  %v653_v28 = vand.u32 2147483648, %v4158_v45  ;;  %3179 = vlog2.f32 %v4149_v59 }
 0x1cf   :  { %v805_v19 = vmul.f32 %v804_v35, %v621_v11  ;;  %vm635_vm2 = vcmp.eq.f32.partialorder %v634_v0, 8.507059e+37  ;;  %vm647_vm3 = vweird.f32 %v4158_v45  ;;  %v651_v16 = vand.u32 2147483647, %v4158_v45 }
 0x1d0   :  { %v715_v39 = vmul.f32 %v714_v30, %v4341_v5  ;;  %v638_v26 = vsel %vm635_vm2, %v637_v36, %v633_v40  ;;  %vm649_vm4 = vmor %vm647_vm3, %vm648_vm1  ;;  %vm665_vm5 = vweird.f32 %v4237_v32  ;;  %v663_v59 = vadd.f32 %v4237_v32, %v662_v23 }
 0x1d1   :  { %v822_v47 = vadd.f32 %v820_v58, %v805_v19  ;;  %v640_v49 = vadd.f32 %v638_v26, %v623_v21  ;;  %v650_v9 = vsel %vm649_vm4, %v4198_v54, %v646_v38  ;;  %v679_v27 = vmul.f32 %v4249_v56, %v678_v34 }
 0x1d2   :  { %v654_v24 = vor.u32 1.1754944e-38, %v653_v28  ;;  %v668_v60 = vand.u32 2147483647, %v4184_v48  ;;  %v670_v45 = vand.u32 2147483648, %v4184_v48  ;;  %vm652_vm6 = vcmp.eq.f32.partialorder %v651_v16, 8.507059e+37 }
 0x1d3   :  { %v823_v10 = vsub.f32 %v604_v18, %v822_v47  ;;  %vm664_vm7 = vweird.f32 %v4184_v48  ;;  %v716_v33 = vsub.f32 0.083333336, %v715_v39  ;;  %vm682_vm9 = vweird.f32 %v4249_v56 }
 0x1d4   :  { %v3180_v12 = vpop.eup %3179  ;;  %v655_v52 = vsel %vm652_vm6, %v654_v24, %v650_v9  ;;  %vm4429_vm8 = vmor %vm664_vm7, %vm665_vm5  ;;  %v680_v2 = vadd.f32 %v4249_v56, %v679_v27  ;;  %v711_v20 = vmul.f32 0.5, %v4308_v3  ;;  %vm669_vm10 = vcmp.eq.f32.partialorder %v668_v60, 8.507059e+37 }
 0x1d5   :  { %3181 = vrcp.f32 %v823_v10  ;;  %v657_v54 = vadd.f32 %v655_v52, %v640_v49  ;;  %v667_v61 = vsel %vm4429_vm8, %v4237_v32, %v663_v59  ;;  %v671_v48 = vor.u32 1.1754944e-38, %v670_v45 }
 0x1d6   :  { %vm681_vm11 = vweird.f32 %v4193_v44  ;;  %v687_v55 = vand.u32 2147483648, %v4193_v44  ;;  %v685_v25 = vand.u32 2147483647, %v4193_v44  ;;  %v710_v42 = vmul.f32 0.6931472, %v3180_v12 }
 0x1d7   :  { %v717_v29 = vmul.f32 %v716_v33, %v4341_v5  ;;  %3183 = vlog2.f32 %v4143_v50  ;;  %v672_v32 = vsel %vm669_vm10, %v671_v48, %v667_v61  ;;  %vm683_vm12 = vmor %vm681_vm11, %vm682_vm9  ;;  %v835_v53 = vand.u32 2147483648, %v823_v10 }
 0x1d8   :  { %v674_v3 = vadd.f32 %v672_v32, %v657_v54  ;;  %v684_v31 = vsel %vm683_vm12, %v4249_v56, %v680_v2  ;;  %v712_v8 = vsub.f32 %v710_v42, %v711_v20  ;;  %v688_v46 = vor.u32 1.1754944e-38, %v687_v55 }
 0x1d9   :  { %vm686_vm13 = vcmp.eq.f32.partialorder %v685_v25, 8.507059e+37  ;;  %vm829_vm15 = vweird.f32 %v823_v10  ;;  %v833_v41 = vand.u32 2147483647, %v823_v10  ;;  %v836_v56 = vor.u32 1.1754944e-38, %v835_v53 }
 0x1da   :  { %v718_v35 = vsub.f32 %v712_v8, %v717_v29  ;;  %v689_v44 = vsel %vm686_vm13, %v688_v46, %v684_v31 }
 0x1db   :  { %v3182_v62 = vpop.eup %3181  ;;  %v691_v11 = vadd.f32 %v689_v44, %v674_v3  ;;  %vm834_vm1 = vcmp.eq.f32.partialorder %v833_v41, 8.507059e+37 }
 0x1dc   :  { %v825_v37 = vmul.f32 %v3182_v62, %v823_v10  ;;  %vm830_vm14 = vweird.f32 %v3182_v62 }
 0x1dd   :  { %v3184_v4 = vpop.eup %3183  ;;  %v719_v5 = vsub.f32 %v718_v35, %v691_v11  ;;  %vm831_vm0 = vmor %vm829_vm15, %vm830_vm14 }
 0x1de   :  { %v826_v57 = vsub.f32 1.0, %v825_v37  ;;  %v589_v1 = vmul.f32 0.6931472, %v3184_v4 }
 0x1e0   :  { %v827_v63 = vmul.f32 %v3182_v62, %v826_v57  ;;  %v720_v19 = vsub.f32 %v589_v1, %v719_v5 }
 0x1e2   :  { %v828_v51 = vadd.f32 %v3182_v62, %v827_v63  ;;  %v721_v58 = vsub.f32 %v720_v19, %v3525_v22 }
 0x1e4   :  { %v832_v0 = vsel %vm831_vm0, %v3182_v62, %v828_v51 }
 0x1e5   :  { %v837_v30 = vsel %vm834_vm1, %v836_v56, %v832_v0 }
 0x1e6   :  { %v838_v18 = vmul.f32 %v837_v30, %v721_v58 }
 0x1e8   :  { %v4449_v43 = vsub.f32 %v4143_v50, %v838_v18 }
 0x1ea   :  { %v4452_v38 = vadd.f32 1.0, %v4449_v43  ;;  %v4455_v47 = vadd.f32 6.0, %v4449_v43  ;;  %3185 = vrcp.f32 %v4449_v43  ;;  %v4461_v21 = vadd.f32 2.0, %v4449_v43 }
 0x1eb   :  { %v4464_v40 = vadd.f32 3.0, %v4449_v43  ;;  %v4490_v26 = vadd.f32 4.0, %v4449_v43  ;;  %v4499_v59 = vadd.f32 5.0, %v4449_v43  ;;  %v852_v12 = vand.u32 2147483647, %v4449_v43 }
 0x1ec   :  { %3187 = vrcp.f32 %v4452_v38  ;;  %v4473_v34 = vmul.f32 %v4452_v38, %v4452_v38  ;;  %v4487_v39 = vmul.f32 3.0, %v4452_v38  ;;  %v4496_v9 = vmul.f32 2.0, %v4452_v38 }
 0x1ed   :  { %3189 = vrcp.f32 %v4455_v47  ;;  %v854_v52 = vand.u32 2147483648, %v4449_v43  ;;  %v869_v54 = vand.u32 2147483647, %v4452_v38  ;;  %v871_v61 = vand.u32 2147483648, %v4452_v38 }
 0x1ee   :  { %3191 = vrcp.f32 %v4461_v21  ;;  %v4483_v16 = vmul.f32 7.0, %v4473_v34  ;;  %vm950_vm2 = vweird.f32 %v4455_v47  ;;  %v954_v42 = vand.u32 2147483647, %v4455_v47 }
 0x1ef   :  { %3193 = vrcp.f32 %v4464_v40  ;;  %v956_v29 = vand.u32 2147483648, %v4455_v47  ;;  %v4541_v8 = vmul.f32 %v4449_v43, %v4449_v43  ;;  %v1016_v63 = vand.u32 2147483647, %v4473_v34 }
 0x1f0   :  { %v4466_v50 = vpop.eup %3185  ;;  %3195 = vrcp.f32 %v4473_v34  ;;  %v1000_v35 = vand.u32 2147483647, %v4483_v16  ;;  %v1002_v4 = vand.u32 2147483648, %v4483_v16  ;;  %vm996_vm6 = vweird.f32 %v4483_v16 }
 0x1f1   :  { %v844_v28 = vmul.f32 %v4466_v50, %v4449_v43  ;;  %3197 = vrcp.f32 %v4483_v16  ;;  %vm1012_vm7 = vweird.f32 %v4473_v34  ;;  %v1018_v0 = vand.u32 2147483648, %v4473_v34 }
 0x1f2   :  { %v4468_v23 = vpop.eup %3187  ;;  %3199 = vrcp.f32 %v4487_v39  ;;  %vm1001_vm10 = vcmp.eq.f32.partialorder %v1000_v35, 8.507059e+37  ;;  %vm4569_vm11 = vcmp.eq.f32.partialorder %v1016_v63, 8.507059e+37  ;;  %vm1029_vm12 = vweird.f32 %v4487_v39 }
 0x1f3   :  { %v4475_v36 = vpop.eup %3189  ;;  %v861_v10 = vmul.f32 %v4468_v23, %v4452_v38  ;;  %v845_v24 = vsub.f32 1.0, %v844_v28  ;;  %3201 = vrcp.f32 %v4490_v26  ;;  %vm865_vm15 = vweird.f32 %v4452_v38 }
 0x1f4   :  { %v946_v49 = vmul.f32 %v4475_v36, %v4455_v47  ;;  %v4501_v27 = vpop.eup %3191  ;;  %3203 = vrcp.f32 %v4496_v9  ;;  %vm951_vm3 = vweird.f32 %v4475_v36  ;;  %vm848_vm0 = vweird.f32 %v4449_v43 }
 0x1f5   :  { %v862_v60 = vsub.f32 1.0, %v861_v10  ;;  %v4504_v45 = vpop.eup %3193  ;;  %3205 = vrcp.f32 %v4499_v59  ;;  %v4518_v62 = vmul.f32 %v4466_v50, %v845_v24  ;;  %v4525_v55 = vmul.f32 %v4501_v27, %v4461_v21  ;;  %vm4585_vm14 = vmor %vm950_vm2, %vm951_vm3 }
 0x1f6   :  { %v4507_v33 = vpop.eup %3195  ;;  %v947_v15 = vsub.f32 1.0, %v946_v49  ;;  %v4529_v25 = vmul.f32 %v4504_v45, %v4464_v40  ;;  %3207 = vrcp.f32 %v4541_v8  ;;  %v1003_v10 = vor.u32 1.1754944e-38, %v1002_v4 }
 0x1f7   :  { %v1008_v2 = vmul.f32 %v4507_v33, %v4473_v34  ;;  %v3198_v20 = vpop.eup %3197  ;;  %v4521_v48 = vmul.f32 %v4468_v23, %v862_v60  ;;  %vm1013_vm4 = vweird.f32 %v4507_v33  ;;  %vm955_vm1 = vcmp.eq.f32.partialorder %v954_v42, 8.507059e+37 }
 0x1f8   :  { %v992_v37 = vmul.f32 %v3198_v20, %v4483_v16  ;;  %v4535_v32 = vpop.eup %3199  ;;  %v948_v3 = vmul.f32 %v4475_v36, %v947_v15  ;;  %vm997_vm5 = vweird.f32 %v3198_v20  ;;  %vm4564_vm8 = vmor %vm1012_vm7, %vm1013_vm4  ;;  %v957_v63 = vor.u32 1.1754944e-38, %v956_v29 }
 0x1f9   :  { %v1009_v31 = vsub.f32 1.0, %v1008_v2  ;;  %v4543_v57 = vpop.eup %3201  ;;  %v1025_v44 = vmul.f32 %v4535_v32, %v4487_v39  ;;  %vm998_vm9 = vmor %vm996_vm6, %vm997_vm5  ;;  %vm1030_vm13 = vweird.f32 %v4535_v32  ;;  %vm1046_vm4 = vweird.f32 %v4496_v9 }
 0x1fa   :  { %v993_v46 = vsub.f32 1.0, %v992_v37  ;;  %v4549_v11 = vpop.eup %3203  ;;  %v949_v56 = vadd.f32 %v4475_v36, %v948_v3  ;;  %v1035_v37 = vand.u32 2147483648, %v4487_v39  ;;  %vm4605_vm2 = vmor %vm1029_vm12, %vm1030_vm13  ;;  %vm849_vm6 = vweird.f32 %v4466_v50 }
 0x1fb   :  { %v1010_v5 = vmul.f32 %v4507_v33, %v1009_v31  ;;  %v4555_v51 = vpop.eup %3205  ;;  %v1026_v1 = vsub.f32 1.0, %v1025_v44  ;;  %v1042_v41 = vmul.f32 %v4549_v11, %v4496_v9  ;;  %vm1047_vm3 = vweird.f32 %v4549_v11 }
 0x1fc   :  { %v994_v53 = vmul.f32 %v3198_v20, %v993_v46  ;;  %v4579_v60 = vpop.eup %3207  ;;  %v953_v3 = vsel %vm4585_vm14, %v4475_v36, %v949_v56  ;;  %v1033_v46 = vand.u32 2147483647, %v4487_v39  ;;  %v1052_v39 = vand.u32 2147483648, %v4496_v9  ;;  %vm4671_vm14 = vmor %vm848_vm0, %vm849_vm6 }
 0x1fd   :  { %v1011_v19 = vadd.f32 %v4507_v33, %v1010_v5  ;;  %v1027_v18 = vmul.f32 %v4535_v32, %v1026_v1  ;;  %v1043_v28 = vsub.f32 1.0, %v1042_v41  ;;  %v1060_v35 = vmul.f32 %v4579_v60, %v4541_v8 }
 0x1fe   :  { %v995_v30 = vadd.f32 %v3198_v20, %v994_v53  ;;  %v4614_v53 = vsel %vm955_vm1, %v957_v63, %v953_v3  ;;  %v1036_v1 = vor.u32 1.1754944e-38, %v1035_v37  ;;  %vm1034_vm5 = vcmp.eq.f32.partialorder %v1033_v46, 8.507059e+37 }
 0x1ff   :  { %v1015_v49 = vsel %vm4564_vm8, %v4507_v33, %v1011_v19  ;;  %v1028_v24 = vadd.f32 %v4535_v32, %v1027_v18  ;;  %v1044_v33 = vmul.f32 %v4549_v11, %v1043_v28  ;;  %v1061_v29 = vsub.f32 1.0, %v1060_v35  ;;  %vm4625_vm8 = vmor %vm1046_vm4, %vm1047_vm3 }
 0x200   :  { %v999_v34 = vsel %vm998_vm9, %v3198_v20, %v995_v30  ;;  %v1019_v20 = vor.u32 1.1754944e-38, %v1018_v0  ;;  %v1050_v19 = vand.u32 2147483647, %v4496_v9  ;;  %vm866_vm7 = vweird.f32 %v4468_v23 }
 0x201   :  { %v1004_v2 = vsel %vm1001_vm10, %v1003_v10, %v999_v34  ;;  %v1032_v5 = vsel %vm4605_vm2, %v4535_v32, %v1028_v24  ;;  %v1045_v42 = vadd.f32 %v4549_v11, %v1044_v33  ;;  %v1062_v0 = vmul.f32 %v4579_v60, %v1061_v29  ;;  %vm4655_vm12 = vmor %vm865_vm15, %vm866_vm7 }
 0x202   :  { %v1006_v31 = vsub.f32 0.2, %v1004_v2  ;;  %v1020_v44 = vsel %vm4569_vm11, %v1019_v20, %v1015_v49  ;;  %v879_v32 = vsub.f32 1.0, %v4525_v55  ;;  %v1037_v56 = vsel %vm1034_vm5, %v1036_v1, %v1032_v5 }
 0x203   :  { %v847_v58 = vadd.f32 %v4466_v50, %v4518_v62  ;;  %v864_v9 = vadd.f32 %v4468_v23, %v4521_v48  ;;  %v1049_v28 = vsel %vm4625_vm8, %v4549_v11, %v1045_v42  ;;  %vm4638_vm9 = vcmp.eq.f32.partialorder %v852_v12, 8.507059e+37 }
 0x204   :  { %v1021_v36 = vmul.f32 %v1020_v44, %v1006_v31  ;;  %v896_v10 = vsub.f32 1.0, %v4529_v25  ;;  %v912_v16 = vmul.f32 %v4543_v57, %v4490_v26  ;;  %v4647_v62 = vmul.f32 %v4614_v53, %v4614_v53 }
 0x205   :  { %v1053_v48 = vor.u32 1.1754944e-38, %v1052_v39  ;;  %vm1051_vm10 = vcmp.eq.f32.partialorder %v1050_v19, 8.507059e+37  ;;  %v1063_v11 = vadd.f32 %v4579_v60, %v1062_v0  ;;  %vm1065_vm11 = vweird.f32 %v4579_v60 }
 0x206   :  { %v1022_v41 = vsub.f32 1.0, %v1021_v36  ;;  %vm4661_vm13 = vcmp.eq.f32.partialorder %v869_v54, 8.507059e+37  ;;  %v880_v49 = vmul.f32 %v4501_v27, %v879_v32  ;;  %v1070_v15 = vand.u32 2147483648, %v4541_v8 }
 0x207   :  { %v1054_v24 = vsel %vm1051_vm10, %v1053_v48, %v1049_v28  ;;  %v868_v54 = vsel %vm4655_vm12, %v4468_v23, %v864_v9  ;;  %vm1064_vm15 = vweird.f32 %v4541_v8  ;;  %v1068_v37 = vand.u32 2147483647, %v4541_v8 }
 0x208   :  { %v1038_v18 = vmul.f32 %v1037_v56, %v1022_v41  ;;  %v851_v33 = vsel %vm4671_vm14, %v4466_v50, %v847_v58  ;;  %v872_v3 = vor.u32 1.1754944e-38, %v871_v61  ;;  %vm883_vm0 = vweird.f32 %v4501_v27  ;;  %vm4689_vm1 = vmor %vm1064_vm15, %vm1065_vm11 }
 0x209   :  { %v965_v31 = vmul.f32 0.003968254, %v4647_v62  ;;  %v897_v46 = vmul.f32 %v4504_v45, %v896_v10  ;;  %v913_v8 = vsub.f32 1.0, %v912_v16  ;;  %v1067_v50 = vsel %vm4689_vm1, %v4579_v60, %v1063_v11 }
 0x20a   :  { %v1039_v34 = vadd.f32 1.0, %v1038_v18  ;;  %v873_v38 = vsel %vm4661_vm13, %v872_v3, %v868_v54  ;;  %v881_v61 = vadd.f32 %v4501_v27, %v880_v49  ;;  %v929_v63 = vmul.f32 %v4555_v51, %v4499_v59 }
 0x20b   :  { %v1071_v44 = vor.u32 1.1754944e-38, %v1070_v15  ;;  %v855_v4 = vor.u32 1.1754944e-38, %v854_v52  ;;  %v888_v36 = vand.u32 2147483648, %v4461_v21  ;;  %vm1069_vm2 = vcmp.eq.f32.partialorder %v1068_v37, 8.507059e+37 }
 0x20c   :  { %v1055_v20 = vmul.f32 %v1054_v24, %v1039_v34  ;;  %vm882_vm3 = vweird.f32 %v4461_v21  ;;  %v886_v60 = vand.u32 2147483647, %v4461_v21  ;;  %v966_v42 = vsub.f32 0.008333334, %v965_v31 }
 0x20d   :  { %v1072_v29 = vsel %vm1069_vm2, %v1071_v44, %v1067_v50  ;;  %v856_v1 = vsel %vm4638_vm9, %v855_v4, %v851_v33  ;;  %vm4711_vm4 = vmor %vm882_vm3, %vm883_vm0  ;;  %v898_v52 = vadd.f32 %v4504_v45, %v897_v46  ;;  %vm900_vm5 = vweird.f32 %v4504_v45 }
 0x20e   :  { %v1056_v35 = vadd.f32 1.0, %v1055_v20  ;;  %v875_v19 = vadd.f32 %v873_v38, %v856_v1  ;;  %v885_v21 = vsel %vm4711_vm4, %v4501_v27, %v881_v61  ;;  %v914_v0 = vmul.f32 %v4543_v57, %v913_v8 }
 0x20f   :  { %v930_v32 = vsub.f32 1.0, %v929_v63  ;;  %v889_v56 = vor.u32 1.1754944e-38, %v888_v36  ;;  %v905_v30 = vand.u32 2147483648, %v4464_v40  ;;  %3209 = vlog2.f32 %v4455_v47 }
 0x210   :  { %v1057_v5 = vmul.f32 %v1056_v35, %v873_v38  ;;  %vm887_vm6 = vcmp.eq.f32.partialorder %v886_v60, 8.507059e+37  ;;  %vm899_vm7 = vweird.f32 %v4464_v40  ;;  %v903_v9 = vand.u32 2147483647, %v4464_v40 }
 0x211   :  { %v967_v18 = vmul.f32 %v966_v42, %v4647_v62  ;;  %v890_v28 = vsel %vm887_vm6, %v889_v56, %v885_v21  ;;  %vm901_vm8 = vmor %vm899_vm7, %vm900_vm5  ;;  %vm917_vm9 = vweird.f32 %v4543_v57  ;;  %v915_v47 = vadd.f32 %v4543_v57, %v914_v0 }
 0x212   :  { %v1074_v41 = vadd.f32 %v1072_v29, %v1057_v5  ;;  %v892_v27 = vadd.f32 %v890_v28, %v875_v19  ;;  %v902_v55 = vsel %vm901_vm8, %v4504_v45, %v898_v52  ;;  %v931_v10 = vmul.f32 %v4555_v51, %v930_v32 }
 0x213   :  { %v906_v16 = vor.u32 1.1754944e-38, %v905_v30  ;;  %v920_v48 = vand.u32 2147483647, %v4490_v26  ;;  %v922_v40 = vand.u32 2147483648, %v4490_v26  ;;  %vm904_vm10 = vcmp.eq.f32.partialorder %v903_v9, 8.507059e+37 }
 0x214   :  { %v1075_v58 = vsub.f32 %v856_v1, %v1074_v41  ;;  %vm916_vm11 = vweird.f32 %v4490_v26  ;;  %v968_v34 = vsub.f32 0.083333336, %v967_v18  ;;  %vm934_vm13 = vweird.f32 %v4555_v51 }
 0x215   :  { %v3210_v11 = vpop.eup %3209  ;;  %v907_v12 = vsel %vm904_vm10, %v906_v16, %v902_v55  ;;  %vm4735_vm12 = vmor %vm916_vm11, %vm917_vm9  ;;  %v932_v24 = vadd.f32 %v4555_v51, %v931_v10  ;;  %v963_v15 = vmul.f32 0.5, %v4614_v53  ;;  %vm921_vm14 = vcmp.eq.f32.partialorder %v920_v48, 8.507059e+37 }
 0x216   :  { %3211 = vrcp.f32 %v1075_v58  ;;  %v909_v45 = vadd.f32 %v907_v12, %v892_v27  ;;  %v919_v49 = vsel %vm4735_vm12, %v4543_v57, %v915_v47  ;;  %v923_v26 = vor.u32 1.1754944e-38, %v922_v40 }
 0x217   :  { %vm933_vm15 = vweird.f32 %v4499_v59  ;;  %v939_v54 = vand.u32 2147483648, %v4499_v59  ;;  %v937_v20 = vand.u32 2147483647, %v4499_v59  ;;  %v962_v37 = vmul.f32 0.6931472, %v3210_v11 }
 0x218   :  { %v969_v33 = vmul.f32 %v968_v34, %v4647_v62  ;;  %3213 = vlog2.f32 %v4449_v43  ;;  %v924_v57 = vsel %vm921_vm14, %v923_v26, %v919_v49  ;;  %vm935_vm0 = vmor %vm933_vm15, %vm934_vm13  ;;  %v1087_v44 = vand.u32 2147483648, %v1075_v58 }
 0x219   :  { %v926_v53 = vadd.f32 %v924_v57, %v909_v45  ;;  %v936_v31 = vsel %vm935_vm0, %v4555_v51, %v932_v24  ;;  %v964_v23 = vsub.f32 %v962_v37, %v963_v15  ;;  %v940_v8 = vor.u32 1.1754944e-38, %v939_v54 }
 0x21a   :  { %vm938_vm1 = vcmp.eq.f32.partialorder %v937_v20, 8.507059e+37  ;;  %vm1081_vm3 = vweird.f32 %v1075_v58  ;;  %v1085_v36 = vand.u32 2147483647, %v1075_v58  ;;  %v1088_v51 = vor.u32 1.1754944e-38, %v1087_v44 }
 0x21b   :  { %v970_v35 = vsub.f32 %v964_v23, %v969_v33  ;;  %v941_v59 = vsel %vm938_vm1, %v940_v8, %v936_v31 }
 0x21c   :  { %v3212_v2 = vpop.eup %3211  ;;  %v943_v38 = vadd.f32 %v941_v59, %v926_v53  ;;  %vm1086_vm5 = vcmp.eq.f32.partialorder %v1085_v36, 8.507059e+37 }
 0x21d   :  { %v1077_v3 = vmul.f32 %v3212_v2, %v1075_v58  ;;  %vm1082_vm2 = vweird.f32 %v3212_v2 }
 0x21e   :  { %v3214_v61 = vpop.eup %3213  ;;  %v971_v62 = vsub.f32 %v970_v35, %v943_v38  ;;  %vm1083_vm4 = vmor %vm1081_vm3, %vm1082_vm2 }
 0x21f   :  { %v1078_v46 = vsub.f32 1.0, %v1077_v3  ;;  %v841_v4 = vmul.f32 0.6931472, %v3214_v61 }
 0x221   :  { %v1079_v50 = vmul.f32 %v3212_v2, %v1078_v46  ;;  %v972_v5 = vsub.f32 %v841_v4, %v971_v62 }
 0x223   :  { %v1080_v63 = vadd.f32 %v3212_v2, %v1079_v50  ;;  %v973_v29 = vsub.f32 %v972_v5, %v3525_v22 }
 0x225   :  { %v1084_v60 = vsel %vm1083_vm4, %v3212_v2, %v1080_v63 }
 0x226   :  { %v1089_v42 = vsel %vm1086_vm5, %v1088_v51, %v1084_v60 }
 0x227   :  { %v1090_v1 = vmul.f32 %v1089_v42, %v973_v29 }
 0x229   :  { %v4755_v39 = vsub.f32 %v4449_v43, %v1090_v1 }
 0x22b   :  { %v4758_v52 = vadd.f32 1.0, %v4755_v39  ;;  %v4761_v41 = vadd.f32 6.0, %v4755_v39  ;;  %3215 = vrcp.f32 %v4755_v39  ;;  %v4767_v19 = vadd.f32 2.0, %v4755_v39 }
 0x22c   :  { %v4770_v21 = vadd.f32 3.0, %v4755_v39  ;;  %v4799_v55 = vadd.f32 4.0, %v4755_v39  ;;  %v1104_v34 = vand.u32 2147483647, %v4755_v39  ;;  %v4810_v11 = vadd.f32 5.0, %v4755_v39 }
 0x22d   :  { %3217 = vrcp.f32 %v4758_v52  ;;  %v4779_v32 = vmul.f32 %v4758_v52, %v4758_v52  ;;  %v4791_v18 = vmul.f32 3.0, %v4758_v52  ;;  %v4796_v27 = vmul.f32 2.0, %v4758_v52 }
 0x22e   :  { %3219 = vrcp.f32 %v4761_v41  ;;  %v1121_v25 = vand.u32 2147483647, %v4758_v52  ;;  %v1123_v45 = vand.u32 2147483648, %v4758_v52  ;;  %vm1202_vm6 = vweird.f32 %v4761_v41 }
 0x22f   :  { %3221 = vrcp.f32 %v4767_v19  ;;  %v1242_v9 = vmul.f32 7.0, %v4779_v32  ;;  %v1206_v20 = vand.u32 2147483647, %v4761_v41  ;;  %v1208_v37 = vand.u32 2147483648, %v4761_v41 }
 0x230   :  { %3223 = vrcp.f32 %v4770_v21  ;;  %v4841_v31 = vmul.f32 %v4755_v39, %v4755_v39  ;;  %v1268_v8 = vand.u32 2147483647, %v4779_v32  ;;  %vm1264_vm11 = vweird.f32 %v4779_v32 }
 0x231   :  { %v4772_v43 = vpop.eup %3215  ;;  %3225 = vrcp.f32 %v4779_v32  ;;  %v1252_v46 = vand.u32 2147483647, %v1242_v9  ;;  %v1254_v59 = vand.u32 2147483648, %v1242_v9  ;;  %vm1248_vm10 = vweird.f32 %v1242_v9 }
 0x232   :  { %v1096_v30 = vmul.f32 %v4772_v43, %v4755_v39  ;;  %3227 = vrcp.f32 %v1242_v9  ;;  %v1270_v36 = vand.u32 2147483648, %v4779_v32  ;;  %vm4864_vm15 = vcmp.eq.f32.partialorder %v1268_v8, 8.507059e+37 }
 0x233   :  { %v4774_v0 = vpop.eup %3217  ;;  %3229 = vrcp.f32 %v4791_v18  ;;  %vm1253_vm14 = vcmp.eq.f32.partialorder %v1252_v46, 8.507059e+37  ;;  %v1255_v1 = vor.u32 1.1754944e-38, %v1254_v59  ;;  %vm1281_vm0 = vweird.f32 %v4791_v18 }
 0x234   :  { %v4781_v56 = vpop.eup %3219  ;;  %v1113_v58 = vmul.f32 %v4774_v0, %v4758_v52  ;;  %v1097_v10 = vsub.f32 1.0, %v1096_v30  ;;  %3231 = vrcp.f32 %v4796_v27  ;;  %vm1117_vm3 = vweird.f32 %v4758_v52 }
 0x235   :  { %v1198_v28 = vmul.f32 %v4781_v56, %v4761_v41  ;;  %v4801_v47 = vpop.eup %3221  ;;  %3233 = vrcp.f32 %v4799_v55  ;;  %vm1203_vm7 = vweird.f32 %v4781_v56  ;;  %vm1100_vm4 = vweird.f32 %v4755_v39 }
 0x236   :  { %v1114_v16 = vsub.f32 1.0, %v1113_v58  ;;  %v4804_v48 = vpop.eup %3223  ;;  %v4819_v15 = vmul.f32 %v4772_v43, %v1097_v10  ;;  %v4826_v26 = vmul.f32 %v4801_v47, %v4767_v19  ;;  %3235 = vrcp.f32 %v4841_v31  ;;  %vm4880_vm2 = vmor %vm1202_vm6, %vm1203_vm7 }
 0x237   :  { %v4806_v40 = vpop.eup %3225  ;;  %v1199_v12 = vsub.f32 1.0, %v1198_v28  ;;  %v4830_v54 = vmul.f32 %v4804_v48, %v4770_v21  ;;  %vm1207_vm5 = vcmp.eq.f32.partialorder %v1206_v20, 8.507059e+37  ;;  %3237 = vrcp.f32 %v4810_v11 }
 0x238   :  { %v1260_v49 = vmul.f32 %v4806_v40, %v4779_v32  ;;  %v3228_v24 = vpop.eup %3227  ;;  %v4822_v2 = vmul.f32 %v4774_v0, %v1114_v16  ;;  %vm1265_vm8 = vweird.f32 %v4806_v40  ;;  %3239 = vlog2.f32 %v4761_v41 }
 0x239   :  { %v1244_v33 = vmul.f32 %v3228_v24, %v1242_v9  ;;  %v4835_v3 = vpop.eup %3229  ;;  %v1200_v57 = vmul.f32 %v4781_v56, %v1199_v12  ;;  %vm1249_vm9 = vweird.f32 %v3228_v24  ;;  %vm4859_vm12 = vmor %vm1264_vm11, %vm1265_vm8  ;;  %v1271_v12 = vor.u32 1.1754944e-38, %v1270_v36 }
 0x23a   :  { %v1261_v53 = vsub.f32 1.0, %v1260_v49  ;;  %v1277_v35 = vmul.f32 %v4835_v3, %v4791_v18  ;;  %v4846_v50 = vpop.eup %3231  ;;  %vm1250_vm13 = vmor %vm1248_vm10, %vm1249_vm9  ;;  %vm1282_vm1 = vweird.f32 %v4835_v3  ;;  %v1287_v49 = vand.u32 2147483648, %v4791_v18 }
 0x23b   :  { %v1245_v23 = vsub.f32 1.0, %v1244_v33  ;;  %v4851_v61 = vpop.eup %3233  ;;  %v1294_v44 = vmul.f32 %v4846_v50, %v4796_v27  ;;  %v1201_v5 = vadd.f32 %v4781_v56, %v1200_v57  ;;  %v1285_v57 = vand.u32 2147483647, %v4791_v18  ;;  %vm4900_vm6 = vmor %vm1281_vm0, %vm1282_vm1 }
 0x23c   :  { %v1262_v38 = vmul.f32 %v4806_v40, %v1261_v53  ;;  %v1278_v63 = vsub.f32 1.0, %v1277_v35  ;;  %v4874_v28 = vpop.eup %3235  ;;  %vm1299_vm7 = vweird.f32 %v4846_v50  ;;  %vm1298_vm8 = vweird.f32 %v4796_v27 }
 0x23d   :  { %v1246_v62 = vmul.f32 %v3228_v24, %v1245_v23  ;;  %v1295_v29 = vsub.f32 1.0, %v1294_v44  ;;  %v1312_v53 = vmul.f32 %v4874_v28, %v4841_v31  ;;  %v1209_v23 = vor.u32 1.1754944e-38, %v1208_v37  ;;  %vm4920_vm11 = vmor %vm1298_vm8, %vm1299_vm7 }
 0x23e   :  { %v1263_v4 = vadd.f32 %v4806_v40, %v1262_v38  ;;  %v1279_v42 = vmul.f32 %v4835_v3, %v1278_v63  ;;  %v1288_v38 = vor.u32 1.1754944e-38, %v1287_v49  ;;  %v1304_v18 = vand.u32 2147483648, %v4796_v27 }
 0x23f   :  { %v1247_v60 = vadd.f32 %v3228_v24, %v1246_v62  ;;  %v1313_v37 = vsub.f32 1.0, %v1312_v53  ;;  %vm1286_vm9 = vcmp.eq.f32.partialorder %v1285_v57, 8.507059e+37  ;;  %v1302_v63 = vand.u32 2147483647, %v4796_v27 }
 0x240   :  { %v1267_v58 = vsel %vm4859_vm12, %v4806_v40, %v1263_v4  ;;  %v1280_v9 = vadd.f32 %v4835_v3, %v1279_v42  ;;  %v1296_v40 = vmul.f32 %v4846_v50, %v1295_v29  ;;  %vm1101_vm10 = vweird.f32 %v4772_v43 }
 0x241   :  { %v1251_v32 = vsel %vm1250_vm13, %v3228_v24, %v1247_v60  ;;  %v1205_v24 = vsel %vm4880_vm2, %v4781_v56, %v1201_v5  ;;  %v1272_v46 = vsel %vm4864_vm15, %v1271_v12, %v1267_v58  ;;  %v1314_v44 = vmul.f32 %v4874_v28, %v1313_v37  ;;  %vm4953_vm0 = vmor %vm1100_vm4, %vm1101_vm10  ;;  %v4962_v12 = vpop.eup %3237 }
 0x242   :  { %v1256_v16 = vsel %vm1253_vm14, %v1255_v1, %v1251_v32  ;;  %v1284_v35 = vsel %vm4900_vm6, %v4835_v3, %v1280_v9  ;;  %v1297_v20 = vadd.f32 %v4846_v50, %v1296_v40  ;;  %v4909_v59 = vsel %vm1207_vm5, %v1209_v23, %v1205_v24 }
 0x243   :  { %v1258_v33 = vsub.f32 0.2, %v1256_v16  ;;  %v1131_v3 = vsub.f32 1.0, %v4826_v26  ;;  %v1289_v4 = vsel %vm1286_vm9, %v1288_v38, %v1284_v35  ;;  %v1116_v5 = vadd.f32 %v4774_v0, %v4822_v2 }
 0x244   :  { %vm1118_vm12 = vweird.f32 %v4774_v0  ;;  %v1301_v60 = vsel %vm4920_vm11, %v4846_v50, %v1297_v20  ;;  %v1099_v26 = vadd.f32 %v4772_v43, %v4819_v15  ;;  %v1148_v51 = vsub.f32 1.0, %v4830_v54  ;;  %v3240_v50 = vpop.eup %3239 }
 0x245   :  { %v1273_v56 = vmul.f32 %v1272_v46, %v1258_v33  ;;  %v4935_v42 = vmul.f32 %v4909_v59, %v4909_v59  ;;  %v1305_v29 = vor.u32 1.1754944e-38, %v1304_v18  ;;  %vm1303_vm13 = vcmp.eq.f32.partialorder %v1302_v63, 8.507059e+37  ;;  %vm4941_vm15 = vmor %vm1117_vm3, %vm1118_vm12 }
 0x246   :  { %v1315_v2 = vadd.f32 %v4874_v28, %v1314_v44  ;;  %vm1317_vm14 = vweird.f32 %v4874_v28  ;;  %v1132_v15 = vmul.f32 %v4801_v47, %v1131_v3  ;;  %v1164_v54 = vmul.f32 %v4851_v61, %v4799_v55 }
 0x247   :  { %v1274_v62 = vsub.f32 1.0, %v1273_v56  ;;  %v1306_v30 = vsel %vm1303_vm13, %v1305_v29, %v1301_v60  ;;  %v1322_v32 = vand.u32 2147483648, %v4841_v31  ;;  %v1120_v9 = vsel %vm4941_vm15, %v4774_v0, %v1116_v5 }
 0x248   :  { %vm1316_vm1 = vweird.f32 %v4841_v31  ;;  %v1320_v16 = vand.u32 2147483647, %v4841_v31  ;;  %v1106_v49 = vand.u32 2147483648, %v4755_v39  ;;  %vm1122_vm2 = vcmp.eq.f32.partialorder %v1121_v25, 8.507059e+37 }
 0x249   :  { %v1290_v27 = vmul.f32 %v1289_v4, %v1274_v62  ;;  %v1124_v40 = vor.u32 1.1754944e-38, %v1123_v45  ;;  %vm1135_vm3 = vweird.f32 %v4801_v47  ;;  %vm4972_vm4 = vmor %vm1316_vm1, %vm1317_vm14  ;;  %v1103_v31 = vsel %vm4953_vm0, %v4772_v43, %v1099_v26 }
 0x24a   :  { %v1217_v24 = vmul.f32 0.003968254, %v4935_v42  ;;  %v1319_v52 = vsel %vm4972_vm4, %v4874_v28, %v1315_v2  ;;  %v1149_v45 = vmul.f32 %v4804_v48, %v1148_v51  ;;  %v1165_v57 = vsub.f32 1.0, %v1164_v54 }
 0x24b   :  { %v1291_v1 = vadd.f32 1.0, %v1290_v27  ;;  %v1125_v25 = vsel %vm1122_vm2, %v1124_v40, %v1120_v9  ;;  %v1323_v53 = vor.u32 1.1754944e-38, %v1322_v32  ;;  %v1133_v23 = vadd.f32 %v4801_v47, %v1132_v15 }
 0x24c   :  { %v1181_v46 = vmul.f32 %v4962_v12, %v4810_v11  ;;  %vm1321_vm5 = vcmp.eq.f32.partialorder %v1320_v16, 8.507059e+37  ;;  %vm1105_vm6 = vcmp.eq.f32.partialorder %v1104_v34, 8.507059e+37  ;;  %v1107_v43 = vor.u32 1.1754944e-38, %v1106_v49 }
 0x24d   :  { %v1307_v10 = vmul.f32 %v1306_v30, %v1291_v1  ;;  %v1140_v56 = vand.u32 2147483648, %v4767_v19  ;;  %v1324_v35 = vsel %vm1321_vm5, %v1323_v53, %v1319_v52  ;;  %vm1134_vm7 = vweird.f32 %v4767_v19 }
 0x24e   :  { %v1138_v28 = vand.u32 2147483647, %v4767_v19  ;;  %v1218_v20 = vsub.f32 0.008333334, %v1217_v24  ;;  %v1108_v38 = vsel %vm1105_vm6, %v1107_v43, %v1103_v31  ;;  %vm4994_vm8 = vmor %vm1134_vm7, %vm1135_vm3  ;;  %v1150_v62 = vadd.f32 %v4804_v48, %v1149_v45 }
 0x24f   :  { %v1308_v33 = vadd.f32 1.0, %v1307_v10  ;;  %vm1152_vm9 = vweird.f32 %v4804_v48  ;;  %v1166_v34 = vmul.f32 %v4851_v61, %v1165_v57  ;;  %v1127_v63 = vadd.f32 %v1125_v25, %v1108_v38 }
 0x250   :  { %v1137_v19 = vsel %vm4994_vm8, %v4801_v47, %v1133_v23  ;;  %v1182_v44 = vsub.f32 1.0, %v1181_v46  ;;  %v1141_v4 = vor.u32 1.1754944e-38, %v1140_v56  ;;  %vm1151_vm10 = vweird.f32 %v4770_v21 }
 0x251   :  { %v1309_v8 = vmul.f32 %v1308_v33, %v1125_v25  ;;  %v1157_v36 = vand.u32 2147483648, %v4770_v21  ;;  %vm1139_vm11 = vcmp.eq.f32.partialorder %v1138_v28, 8.507059e+37  ;;  %v1155_v5 = vand.u32 2147483647, %v4770_v21  ;;  %vm1153_vm12 = vmor %vm1151_vm10, %vm1152_vm9 }
 0x252   :  { %v1219_v27 = vmul.f32 %v1218_v20, %v4935_v42  ;;  %v1142_v60 = vsel %vm1139_vm11, %v1141_v4, %v1137_v19  ;;  %vm1169_vm13 = vweird.f32 %v4851_v61  ;;  %v1154_v26 = vsel %vm1153_vm12, %v4804_v48, %v1150_v62 }
 0x253   :  { %v1326_v37 = vadd.f32 %v1324_v35, %v1309_v8  ;;  %v1144_v47 = vadd.f32 %v1142_v60, %v1127_v63  ;;  %v1167_v51 = vadd.f32 %v4851_v61, %v1166_v34  ;;  %v1183_v41 = vmul.f32 %v4962_v12, %v1182_v44 }
 0x254   :  { %v1158_v29 = vor.u32 1.1754944e-38, %v1157_v36  ;;  %v1172_v21 = vand.u32 2147483647, %v4799_v55  ;;  %v1174_v1 = vand.u32 2147483648, %v4799_v55  ;;  %vm1156_vm14 = vcmp.eq.f32.partialorder %v1155_v5, 8.507059e+37 }
 0x255   :  { %v5004_v3 = vsub.f32 %v1108_v38, %v1326_v37  ;;  %vm1168_vm15 = vweird.f32 %v4799_v55  ;;  %v1220_v2 = vsub.f32 0.083333336, %v1219_v27  ;;  %vm1186_vm1 = vweird.f32 %v4962_v12 }
 0x256   :  { %v1159_v15 = vsel %vm1156_vm14, %v1158_v29, %v1154_v26  ;;  %vm5021_vm0 = vmor %vm1168_vm15, %vm1169_vm13  ;;  %v1184_v58 = vadd.f32 %v4962_v12, %v1183_v41  ;;  %v1215_v9 = vmul.f32 0.5, %v4909_v59  ;;  %vm1173_vm2 = vcmp.eq.f32.partialorder %v1172_v21, 8.507059e+37 }
 0x257   :  { %3241 = vrcp.f32 %v5004_v3  ;;  %v1161_v30 = vadd.f32 %v1159_v15, %v1144_v47  ;;  %v1171_v32 = vsel %vm5021_vm0, %v4851_v61, %v1167_v51  ;;  %v1175_v55 = vor.u32 1.1754944e-38, %v1174_v1 }
 0x258   :  { %v1191_v10 = vand.u32 2147483648, %v4810_v11  ;;  %vm1185_vm3 = vweird.f32 %v4810_v11  ;;  %v1189_v49 = vand.u32 2147483647, %v4810_v11  ;;  %v1214_v40 = vmul.f32 0.6931472, %v3240_v50 }
 0x259   :  { %v1221_v0 = vmul.f32 %v1220_v2, %v4935_v42  ;;  %3243 = vlog2.f32 %v4755_v39  ;;  %v1176_v61 = vsel %vm1173_vm2, %v1175_v55, %v1171_v32  ;;  %vm1187_vm4 = vmor %vm1185_vm3, %vm1186_vm1  ;;  %v1339_v46 = vand.u32 2147483648, %v5004_v3 }
 0x25a   :  { %v1178_v31 = vadd.f32 %v1176_v61, %v1161_v30  ;;  %v1188_v24 = vsel %vm1187_vm4, %v4962_v12, %v1184_v58  ;;  %v1216_v33 = vsub.f32 %v1214_v40, %v1215_v9  ;;  %v1192_v52 = vor.u32 1.1754944e-38, %v1191_v10 }
 0x25b   :  { %vm1190_vm5 = vcmp.eq.f32.partialorder %v1189_v49, 8.507059e+37  ;;  %vm1333_vm7 = vweird.f32 %v5004_v3  ;;  %v1337_v43 = vand.u32 2147483647, %v5004_v3  ;;  %v1340_v35 = vor.u32 1.1754944e-38, %v1339_v46 }
 0x25c   :  { %v1222_v25 = vsub.f32 %v1216_v33, %v1221_v0  ;;  %v1193_v57 = vsel %vm1190_vm5, %v1192_v52, %v1188_v24 }
 0x25d   :  { %v3242_v48 = vpop.eup %3241  ;;  %v1195_v11 = vadd.f32 %v1193_v57, %v1178_v31  ;;  %vm1338_vm9 = vcmp.eq.f32.partialorder %v1337_v43, 8.507059e+37 }
 0x25e   :  { %v1329_v16 = vmul.f32 %v3242_v48, %v5004_v3  ;;  %vm1334_vm6 = vweird.f32 %v3242_v48 }
 0x25f   :  { %v3244_v53 = vpop.eup %3243  ;;  %v1223_v23 = vsub.f32 %v1222_v25, %v1195_v11  ;;  %vm1335_vm8 = vmor %vm1333_vm7, %vm1334_vm6 }
 0x260   :  { %v1330_v59 = vsub.f32 1.0, %v1329_v16  ;;  %v1093_v8 = vmul.f32 0.6931472, %v3244_v53 }
 0x262   :  { %v1331_v45 = vmul.f32 %v3242_v48, %v1330_v59  ;;  %v1224_v12 = vsub.f32 %v1093_v8, %v1223_v23 }
 0x264   :  { %v1332_v42 = vadd.f32 %v3242_v48, %v1331_v45  ;;  %v1225_v20 = vsub.f32 %v1224_v12, %v3525_v22 }
 0x266   :  { %v1336_v56 = vsel %vm1335_vm8, %v3242_v48, %v1332_v42 }
 0x267   :  { %v1341_v28 = vsel %vm1338_vm9, %v1340_v35, %v1336_v56 }
 0x268   :  { %v1342_v37 = vmul.f32 %v1341_v28, %v1225_v20 }
 0x26a   :  { %v5045_v38 = vsub.f32 %v4755_v39, %v1342_v37 }
 0x26c   :  { %v5048_v18 = vadd.f32 1.0, %v5045_v38  ;;  %v5051_v62 = vadd.f32 6.0, %v5045_v38  ;;  %3245 = vrcp.f32 %v5045_v38  ;;  %v5057_v34 = vadd.f32 2.0, %v5045_v38 }
 0x26d   :  { %v5060_v63 = vadd.f32 3.0, %v5045_v38  ;;  %v5091_v51 = vadd.f32 4.0, %v5045_v38  ;;  %v1358_v50 = vand.u32 2147483648, %v5045_v38  ;;  %v5101_v15 = vadd.f32 5.0, %v5045_v38 }
 0x26e   :  { %3247 = vrcp.f32 %v5048_v18  ;;  %v5069_v44 = vmul.f32 %v5048_v18, %v5048_v18  ;;  %v5077_v36 = vmul.f32 3.0, %v5048_v18  ;;  %v5086_v47 = vmul.f32 2.0, %v5048_v18 }
 0x26f   :  { %3249 = vrcp.f32 %v5051_v62  ;;  %v1373_v30 = vand.u32 2147483647, %v5048_v18  ;;  %v1375_v32 = vand.u32 2147483648, %v5048_v18  ;;  %v1460_v0 = vand.u32 2147483648, %v5051_v62 }
 0x270   :  { %3251 = vrcp.f32 %v5057_v34  ;;  %v1494_v4 = vmul.f32 7.0, %v5069_v44  ;;  %v5128_v59 = vmul.f32 %v5045_v38, %v5045_v38  ;;  %v1520_v33 = vand.u32 2147483647, %v5069_v44 }
 0x271   :  { %3253 = vrcp.f32 %v5060_v63  ;;  %vm1454_vm10 = vweird.f32 %v5051_v62  ;;  %vm1516_vm14 = vweird.f32 %v5069_v44  ;;  %v1522_v8 = vand.u32 2147483648, %v5069_v44 }
 0x272   :  { %v5062_v39 = vpop.eup %3245  ;;  %3255 = vrcp.f32 %v5069_v44  ;;  %v1504_v24 = vand.u32 2147483647, %v1494_v4  ;;  %v1506_v45 = vand.u32 2147483648, %v1494_v4  ;;  %vm1500_vm15 = vweird.f32 %v1494_v4 }
 0x273   :  { %v1348_v5 = vmul.f32 %v5062_v39, %v5045_v38  ;;  %3257 = vrcp.f32 %v1494_v4  ;;  %vm5153_vm3 = vcmp.eq.f32.partialorder %v1520_v33, 8.507059e+37  ;;  %vm1369_vm5 = vweird.f32 %v5048_v18 }
 0x274   :  { %v5064_v19 = vpop.eup %3247  ;;  %3259 = vrcp.f32 %v5077_v36  ;;  %vm1505_vm2 = vcmp.eq.f32.partialorder %v1504_v24, 8.507059e+37  ;;  %v1507_v20 = vor.u32 1.1754944e-38, %v1506_v45  ;;  %vm1533_vm6 = vweird.f32 %v5077_v36 }
 0x275   :  { %v5071_v3 = vpop.eup %3249  ;;  %v1365_v27 = vmul.f32 %v5064_v19, %v5048_v18  ;;  %v1349_v29 = vsub.f32 1.0, %v1348_v5  ;;  %3261 = vrcp.f32 %v5086_v47  ;;  %vm1353_vm7 = vweird.f32 %v5062_v39 }
 0x276   :  { %v1450_v60 = vmul.f32 %v5071_v3, %v5051_v62  ;;  %v5088_v26 = vpop.eup %3251  ;;  %3263 = vrcp.f32 %v5091_v51  ;;  %vm1455_vm13 = vweird.f32 %v5071_v3 }
 0x277   :  { %v5094_v41 = vpop.eup %3253  ;;  %v1366_v21 = vsub.f32 1.0, %v1365_v27  ;;  %v5109_v58 = vmul.f32 %v5088_v26, %v5057_v34  ;;  %v5113_v9 = vmul.f32 %v5062_v39, %v1349_v29  ;;  %3265 = vrcp.f32 %v5128_v59 }
 0x278   :  { %v5096_v1 = vpop.eup %3255  ;;  %v1451_v2 = vsub.f32 1.0, %v1450_v60  ;;  %v5120_v10 = vmul.f32 %v5094_v41, %v5060_v63  ;;  %v1523_v29 = vor.u32 1.1754944e-38, %v1522_v8  ;;  %3267 = vrcp.f32 %v5101_v15 }
 0x279   :  { %v1512_v54 = vmul.f32 %v5096_v1, %v5069_v44  ;;  %v3258_v48 = vpop.eup %3257  ;;  %v5116_v55 = vmul.f32 %v5064_v19, %v1366_v21  ;;  %vm1517_vm11 = vweird.f32 %v5096_v1  ;;  %v1539_v21 = vand.u32 2147483648, %v5077_v36 }
 0x27a   :  { %v1496_v16 = vmul.f32 %v3258_v48, %v1494_v4  ;;  %v5122_v49 = vpop.eup %3259  ;;  %v1452_v40 = vmul.f32 %v5071_v3, %v1451_v2  ;;  %vm1501_vm12 = vweird.f32 %v3258_v48  ;;  %vm5147_vm0 = vmor %vm1516_vm14, %vm1517_vm11  ;;  %3269 = vlog2.f32 %v5051_v62 }
 0x27b   :  { %v1513_v61 = vsub.f32 1.0, %v1512_v54  ;;  %v1529_v52 = vmul.f32 %v5122_v49, %v5077_v36  ;;  %v5133_v25 = vpop.eup %3261  ;;  %vm1502_vm1 = vmor %vm1500_vm15, %vm1501_vm12  ;;  %vm1534_vm4 = vweird.f32 %v5122_v49  ;;  %vm1550_vm12 = vweird.f32 %v5086_v47 }
 0x27c   :  { %v1497_v31 = vsub.f32 1.0, %v1496_v16  ;;  %v1546_v23 = vmul.f32 %v5133_v25, %v5086_v47  ;;  %v5141_v42 = vpop.eup %3263  ;;  %v1453_v28 = vadd.f32 %v5071_v3, %v1452_v40  ;;  %v1458_v16 = vand.u32 2147483647, %v5051_v62  ;;  %vm5177_vm8 = vmor %vm1533_vm6, %vm1534_vm4 }
 0x27d   :  { %v1514_v57 = vmul.f32 %v5096_v1, %v1513_v61  ;;  %v1530_v53 = vsub.f32 1.0, %v1529_v52  ;;  %v5162_v27 = vpop.eup %3265  ;;  %v1461_v40 = vor.u32 1.1754944e-38, %v1460_v0  ;;  %vm1551_vm9 = vweird.f32 %v5133_v25  ;;  %vm5186_vm11 = vmor %vm1454_vm10, %vm1455_vm13 }
 0x27e   :  { %v1498_v11 = vmul.f32 %v3258_v48, %v1497_v31  ;;  %v1547_v35 = vsub.f32 1.0, %v1546_v23  ;;  %v1457_v45 = vsel %vm5186_vm11, %v5071_v3, %v1453_v28  ;;  %v1554_v23 = vand.u32 2147483647, %v5086_v47  ;;  %vm5205_vm15 = vmor %vm1550_vm12, %vm1551_vm9 }
 0x27f   :  { %v1515_v46 = vadd.f32 %v5096_v1, %v1514_v57  ;;  %v1531_v56 = vmul.f32 %v5122_v49, %v1530_v53  ;;  %v1540_v57 = vor.u32 1.1754944e-38, %v1539_v21  ;;  %vm1370_vm13 = vweird.f32 %v5064_v19 }
 0x280   :  { %v1499_v43 = vadd.f32 %v3258_v48, %v1498_v11  ;;  %v1548_v2 = vmul.f32 %v5133_v25, %v1547_v35  ;;  %v1556_v11 = vand.u32 2147483648, %v5086_v47  ;;  %vm1459_vm14 = vcmp.eq.f32.partialorder %v1458_v16, 8.507059e+37 }
 0x281   :  { %v1519_v44 = vsel %vm5147_vm0, %v5096_v1, %v1515_v46  ;;  %v1532_v4 = vadd.f32 %v5122_v49, %v1531_v56  ;;  %v1564_v1 = vmul.f32 %v5162_v27, %v5128_v59  ;;  %v1368_v8 = vadd.f32 %v5064_v19, %v5116_v55 }
 0x282   :  { %v1503_v5 = vsel %vm1502_vm1, %v3258_v48, %v1499_v43  ;;  %v1537_v48 = vand.u32 2147483647, %v5077_v36  ;;  %v1524_v61 = vsel %vm5153_vm3, %v1523_v29, %v1519_v44  ;;  %v1549_v33 = vadd.f32 %v5133_v25, %v1548_v2  ;;  %v5242_v29 = vpop.eup %3267 }
 0x283   :  { %v1508_v60 = vsel %vm1505_vm2, %v1507_v20, %v1503_v5  ;;  %v1536_v24 = vsel %vm5177_vm8, %v5122_v49, %v1532_v4  ;;  %v1565_v52 = vsub.f32 1.0, %v1564_v1  ;;  %v5211_v43 = vsel %vm1459_vm14, %v1461_v40, %v1457_v45  ;;  %vm5226_vm2 = vmor %vm1369_vm5, %vm1370_vm13  ;;  %v3270_v55 = vpop.eup %3269 }
 0x284   :  { %v1510_v54 = vsub.f32 0.2, %v1508_v60  ;;  %vm1538_vm10 = vcmp.eq.f32.partialorder %v1537_v48, 8.507059e+37  ;;  %v1553_v12 = vsel %vm5205_vm15, %v5133_v25, %v1549_v33  ;;  %v1351_v56 = vadd.f32 %v5062_v39, %v5113_v9 }
 0x285   :  { %v1566_v46 = vmul.f32 %v5162_v27, %v1565_v52  ;;  %v1541_v49 = vsel %vm1538_vm10, %v1540_v57, %v1536_v24  ;;  %v1383_v35 = vsub.f32 1.0, %v5109_v58  ;;  %v1400_v28 = vsub.f32 1.0, %v5120_v10 }
 0x286   :  { %v1525_v0 = vmul.f32 %v1524_v61, %v1510_v54  ;;  %v1557_v20 = vor.u32 1.1754944e-38, %v1556_v11  ;;  %vm1555_vm0 = vcmp.eq.f32.partialorder %v1554_v23, 8.507059e+37  ;;  %vm1569_vm1 = vweird.f32 %v5162_v27 }
 0x287   :  { %v1567_v5 = vadd.f32 %v5162_v27, %v1566_v46  ;;  %v1416_v58 = vmul.f32 %v5141_v42, %v5091_v51  ;;  %v5234_v9 = vmul.f32 %v5211_v43, %v5211_v43  ;;  %v1574_v25 = vand.u32 2147483648, %v5128_v59 }
 0x288   :  { %v1526_v53 = vsub.f32 1.0, %v1525_v0  ;;  %v1558_v10 = vsel %vm1555_vm0, %v1557_v20, %v1553_v12  ;;  %v1372_v44 = vsel %vm5226_vm2, %v5064_v19, %v1368_v8  ;;  %vm1568_vm3 = vweird.f32 %v5128_v59 }
 0x289   :  { %v1572_v60 = vand.u32 2147483647, %v5128_v59  ;;  %vm1352_vm4 = vweird.f32 %v5045_v38  ;;  %v1356_v21 = vand.u32 2147483647, %v5045_v38  ;;  %v1376_v2 = vor.u32 1.1754944e-38, %v1375_v32  ;;  %vm5251_vm5 = vmor %vm1568_vm3, %vm1569_vm1 }
 0x28a   :  { %v1542_v47 = vmul.f32 %v1541_v49, %v1526_v53  ;;  %v1384_v54 = vmul.f32 %v5088_v26, %v1383_v35  ;;  %vm5257_vm6 = vmor %vm1352_vm4, %vm1353_vm7  ;;  %v1359_v48 = vor.u32 1.1754944e-38, %v1358_v50  ;;  %vm1374_vm8 = vcmp.eq.f32.partialorder %v1373_v30, 8.507059e+37 }
 0x28b   :  { %v1571_v1 = vsel %vm5251_vm5, %v5162_v27, %v1567_v5  ;;  %v1355_v16 = vsel %vm5257_vm6, %v5062_v39, %v1351_v56  ;;  %v1377_v40 = vsel %vm1374_vm8, %v1376_v2, %v1372_v44  ;;  %v1469_v61 = vmul.f32 0.003968254, %v5234_v9 }
 0x28c   :  { %v1543_v37 = vadd.f32 1.0, %v1542_v47  ;;  %v1575_v31 = vor.u32 1.1754944e-38, %v1574_v25  ;;  %v1401_v36 = vmul.f32 %v5094_v41, %v1400_v28  ;;  %v1417_v0 = vsub.f32 1.0, %v1416_v58 }
 0x28d   :  { %vm1573_vm7 = vcmp.eq.f32.partialorder %v1572_v60, 8.507059e+37  ;;  %v1385_v18 = vadd.f32 %v5088_v26, %v1384_v54  ;;  %vm1387_vm9 = vweird.f32 %v5088_v26  ;;  %v1433_v30 = vmul.f32 %v5242_v29, %v5101_v15 }
 0x28e   :  { %v1559_v4 = vmul.f32 %v1558_v10, %v1543_v37  ;;  %v1576_v27 = vsel %vm1573_vm7, %v1575_v31, %v1571_v1  ;;  %vm1357_vm11 = vcmp.eq.f32.partialorder %v1356_v21, 8.507059e+37  ;;  %v1392_v39 = vand.u32 2147483648, %v5057_v34 }
 0x28f   :  { %v1360_v33 = vsel %vm1357_vm11, %v1359_v48, %v1355_v16  ;;  %vm1386_vm12 = vweird.f32 %v5057_v34  ;;  %v1390_v52 = vand.u32 2147483647, %v5057_v34  ;;  %v1470_v45 = vsub.f32 0.008333334, %v1469_v61 }
 0x290   :  { %v1560_v32 = vadd.f32 1.0, %v1559_v4  ;;  %vm5280_vm10 = vmor %vm1386_vm12, %vm1387_vm9  ;;  %v1402_v11 = vadd.f32 %v5094_v41, %v1401_v36  ;;  %vm1404_vm13 = vweird.f32 %v5094_v41  ;;  %v1418_v53 = vmul.f32 %v5141_v42, %v1417_v0 }
 0x291   :  { %v1379_v46 = vadd.f32 %v1377_v40, %v1360_v33  ;;  %v1389_v49 = vsel %vm5280_vm10, %v5088_v26, %v1385_v18  ;;  %v1434_v3 = vsub.f32 1.0, %v1433_v30  ;;  %v1393_v34 = vor.u32 1.1754944e-38, %v1392_v39 }
 0x292   :  { %v1561_v50 = vmul.f32 %v1560_v32, %v1377_v40  ;;  %v1409_v8 = vand.u32 2147483648, %v5060_v63  ;;  %vm1391_vm14 = vcmp.eq.f32.partialorder %v1390_v52, 8.507059e+37  ;;  %vm1403_vm15 = vweird.f32 %v5060_v63 }
 0x293   :  { %v1407_v47 = vand.u32 2147483647, %v5060_v63  ;;  %v1471_v12 = vmul.f32 %v1470_v45, %v5234_v9  ;;  %v1394_v56 = vsel %vm1391_vm14, %v1393_v34, %v1389_v49  ;;  %vm5300_vm0 = vmor %vm1403_vm15, %vm1404_vm13  ;;  %v1419_v62 = vadd.f32 %v5141_v42, %v1418_v53 }
 0x294   :  { %v1578_v24 = vadd.f32 %v1576_v27, %v1561_v50  ;;  %vm1421_vm1 = vweird.f32 %v5141_v42  ;;  %v1396_v35 = vadd.f32 %v1394_v56, %v1379_v46  ;;  %v1406_v28 = vsel %vm5300_vm0, %v5094_v41, %v1402_v11 }
 0x295   :  { %v1435_v63 = vmul.f32 %v5242_v29, %v1434_v3  ;;  %v1410_v20 = vor.u32 1.1754944e-38, %v1409_v8  ;;  %vm1420_vm2 = vweird.f32 %v5091_v51  ;;  %v1424_v37 = vand.u32 2147483647, %v5091_v51 }
 0x296   :  { %v5287_v23 = vsub.f32 %v1360_v33, %v1578_v24  ;;  %v1426_v5 = vand.u32 2147483648, %v5091_v51  ;;  %vm1408_vm3 = vcmp.eq.f32.partialorder %v1407_v47, 8.507059e+37  ;;  %vm5313_vm4 = vmor %vm1420_vm2, %vm1421_vm1  ;;  %v1472_v10 = vsub.f32 0.083333336, %v1471_v12 }
 0x297   :  { %v1411_v44 = vsel %vm1408_vm3, %v1410_v20, %v1406_v28  ;;  %v1423_v41 = vsel %vm5313_vm4, %v5141_v42, %v1419_v62  ;;  %vm1438_vm5 = vweird.f32 %v5242_v29  ;;  %v1436_v60 = vadd.f32 %v5242_v29, %v1435_v63 }
 0x298   :  { %3271 = vrcp.f32 %v5287_v23  ;;  %v1413_v4 = vadd.f32 %v1411_v44, %v1396_v35  ;;  %v1467_v51 = vmul.f32 0.5, %v5211_v43  ;;  %vm1425_vm6 = vcmp.eq.f32.partialorder %v1424_v37, 8.507059e+37 }
 0x299   :  { %v1427_v2 = vor.u32 1.1754944e-38, %v1426_v5  ;;  %vm1437_vm8 = vweird.f32 %v5101_v15  ;;  %v1443_v54 = vand.u32 2147483648, %v5101_v15  ;;  %v1441_v19 = vand.u32 2147483647, %v5101_v15 }
 0x29a   :  { %v1466_v59 = vmul.f32 0.6931472, %v3270_v55  ;;  %v1473_v42 = vmul.f32 %v1472_v10, %v5234_v9  ;;  %3273 = vlog2.f32 %v5045_v38  ;;  %vm1439_vm7 = vmor %vm1437_vm8, %vm1438_vm5  ;;  %v1591_v18 = vand.u32 2147483648, %v5287_v23 }
 0x29b   :  { %v1428_v32 = vsel %vm1425_vm6, %v1427_v2, %v1423_v41  ;;  %v1440_v1 = vsel %vm1439_vm7, %v5242_v29, %v1436_v60  ;;  %v1444_v40 = vor.u32 1.1754944e-38, %v1443_v54  ;;  %vm1442_vm9 = vcmp.eq.f32.partialorder %v1441_v19, 8.507059e+37 }
 0x29c   :  { %v1430_v43 = vadd.f32 %v1428_v32, %v1413_v4  ;;  %v1468_v16 = vsub.f32 %v1466_v59, %v1467_v51  ;;  %vm1585_vm12 = vweird.f32 %v5287_v23  ;;  %v1589_v27 = vand.u32 2147483647, %v5287_v23 }
 0x29d   :  { %v1445_v36 = vsel %vm1442_vm9, %v1444_v40, %v1440_v1  ;;  %v1592_v24 = vor.u32 1.1754944e-38, %v1591_v18 }
 0x29e   :  { %v3272_v25 = vpop.eup %3271  ;;  %v1474_v61 = vsub.f32 %v1468_v16, %v1473_v42  ;;  %v1447_v15 = vadd.f32 %v1445_v36, %v1430_v43  ;;  %vm1590_vm13 = vcmp.eq.f32.partialorder %v1589_v27, 8.507059e+37 }
 0x29f   :  { %v1581_v21 = vmul.f32 %v3272_v25, %v5287_v23  ;;  %vm1586_vm11 = vweird.f32 %v3272_v25 }
 0x2a0   :  { %v3274_v0 = vpop.eup %3273  ;;  %v1475_v50 = vsub.f32 %v1474_v61, %v1447_v15  ;;  %vm1587_vm10 = vmor %vm1585_vm12, %vm1586_vm11 }
 0x2a1   :  { %v1582_v48 = vsub.f32 1.0, %v1581_v21  ;;  %v1345_v30 = vmul.f32 0.6931472, %v3274_v0 }
 0x2a3   :  { %v1583_v31 = vmul.f32 %v3272_v25, %v1582_v48  ;;  %v1476_v29 = vsub.f32 %v1345_v30, %v1475_v50 }
 0x2a5   :  { %v1584_v9 = vadd.f32 %v3272_v25, %v1583_v31  ;;  %v1477_v52 = vsub.f32 %v1476_v29, %v3525_v22 }
 0x2a7   :  { %v1588_v39 = vsel %vm1587_vm10, %v3272_v25, %v1584_v9 }
 0x2a8   :  { %v1593_v33 = vsel %vm1590_vm13, %v1592_v24, %v1588_v39 }
 0x2a9   :  { %v1594_v45 = vmul.f32 %v1593_v33, %v1477_v52 }
 0x2ab   :  { %v5337_v57 = vsub.f32 %v5045_v38, %v1594_v45 }
 0x2ad   :  { %v5340_v11 = vadd.f32 1.0, %v5337_v57  ;;  %v5344_v53 = vadd.f32 6.0, %v5337_v57  ;;  %v5347_v23 = vadd.f32 2.0, %v5337_v57  ;;  %v5373_v56 = vadd.f32 3.0, %v5337_v57 }
 0x2ae   :  { %v5376_v26 = vadd.f32 4.0, %v5337_v57  ;;  %v5386_v28 = vadd.f32 5.0, %v5337_v57  ;;  %v5412_v2 = vmul.f32 %v5337_v57, %v5337_v57 }
 0x2af   :  { %3275 = vrcp.f32 %v5340_v11  ;;  %v5353_v46 = vmul.f32 %v5340_v11, %v5340_v11  ;;  %v5361_v3 = vmul.f32 3.0, %v5340_v11  ;;  %v5368_v47 = vmul.f32 2.0, %v5340_v11 }
 0x2b0   :  { %3277 = vrcp.f32 %v5337_v57  ;;  %v1625_v58 = vand.u32 2147483647, %v5340_v11  ;;  %v1627_v10 = vand.u32 2147483648, %v5340_v11  ;;  %vm1706_vm0 = vweird.f32 %v5344_v53 }
 0x2b1   :  { %3279 = vrcp.f32 %v5344_v53  ;;  %v1746_v49 = vmul.f32 7.0, %v5353_v46  ;;  %v1772_v59 = vand.u32 2147483647, %v5353_v46  ;;  %v1710_v36 = vand.u32 2147483647, %v5344_v53 }
 0x2b2   :  { %3281 = vrcp.f32 %v5347_v23  ;;  %vm1768_vm1 = vweird.f32 %v5353_v46  ;;  %v1774_v0 = vand.u32 2147483648, %v5353_v46  ;;  %vm1621_vm7 = vweird.f32 %v5340_v11 }
 0x2b3   :  { %3283 = vrcp.f32 %v5353_v46  ;;  %v1756_v19 = vand.u32 2147483647, %v1746_v49  ;;  %v1758_v32 = vand.u32 2147483648, %v1746_v49  ;;  %vm1752_vm2 = vweird.f32 %v1746_v49 }
 0x2b4   :  { %3285 = vrcp.f32 %v1746_v49  ;;  %vm5444_vm6 = vcmp.eq.f32.partialorder %v1772_v59, 8.507059e+37  ;;  %vm1785_vm9 = vweird.f32 %v5361_v3 }
 0x2b5   :  { %v5355_v38 = vpop.eup %3275  ;;  %3287 = vrcp.f32 %v5361_v3  ;;  %vm1757_vm5 = vcmp.eq.f32.partialorder %v1756_v19, 8.507059e+37  ;;  %v1759_v39 = vor.u32 1.1754944e-38, %v1758_v32 }
 0x2b6   :  { %v5363_v34 = vpop.eup %3277  ;;  %v1617_v8 = vmul.f32 %v5355_v38, %v5340_v11  ;;  %3289 = vrcp.f32 %v5368_v47 }
 0x2b7   :  { %v5370_v12 = vpop.eup %3279  ;;  %v5383_v35 = vmul.f32 %v5363_v34, %v5337_v57  ;;  %3291 = vrcp.f32 %v5373_v56  ;;  %vm1605_vm13 = vweird.f32 %v5363_v34 }
 0x2b8   :  { %v5379_v62 = vpop.eup %3281  ;;  %v1618_v20 = vsub.f32 1.0, %v1617_v8  ;;  %v1702_v37 = vmul.f32 %v5370_v12, %v5344_v53  ;;  %3293 = vrcp.f32 %v5376_v26  ;;  %v1775_v8 = vor.u32 1.1754944e-38, %v1774_v0 }
 0x2b9   :  { %v5388_v63 = vpop.eup %3283  ;;  %v1601_v25 = vsub.f32 1.0, %v5383_v35  ;;  %v5402_v44 = vmul.f32 %v5379_v62, %v5347_v23  ;;  %3295 = vrcp.f32 %v5386_v28  ;;  %vm1707_vm11 = vweird.f32 %v5370_v12 }
 0x2ba   :  { %v1764_v5 = vmul.f32 %v5388_v63, %v5353_v46  ;;  %v3286_v55 = vpop.eup %3285  ;;  %v5408_v60 = vmul.f32 %v5355_v38, %v1618_v20  ;;  %v1703_v51 = vsub.f32 1.0, %v1702_v37  ;;  %vm1769_vm14 = vweird.f32 %v5388_v63 }
 0x2bb   :  { %v1748_v41 = vmul.f32 %v3286_v55, %v1746_v49  ;;  %v5405_v4 = vpop.eup %3287  ;;  %3297 = vrcp.f32 %v5412_v2  ;;  %vm1753_vm15 = vweird.f32 %v3286_v55  ;;  %vm5437_vm3 = vmor %vm1768_vm1, %vm1769_vm14  ;;  %v1791_v20 = vand.u32 2147483648, %v5361_v3 }
 0x2bc   :  { %v1765_v21 = vsub.f32 1.0, %v1764_v5  ;;  %v1781_v42 = vmul.f32 %v5405_v4, %v5361_v3  ;;  %v5417_v48 = vpop.eup %3289  ;;  %v1704_v29 = vmul.f32 %v5370_v12, %v1703_v51  ;;  %vm1754_vm4 = vmor %vm1752_vm2, %vm1753_vm15  ;;  %vm1786_vm8 = vweird.f32 %v5405_v4 }
 0x2bd   :  { %v1749_v54 = vsub.f32 1.0, %v1748_v41  ;;  %v5422_v1 = vpop.eup %3291  ;;  %v1798_v61 = vmul.f32 %v5417_v48, %v5368_v47  ;;  %vm5466_vm12 = vmor %vm1785_vm9, %vm1786_vm8  ;;  %vm1803_vm10 = vweird.f32 %v5417_v48  ;;  %v1792_v32 = vor.u32 1.1754944e-38, %v1791_v20 }
 0x2be   :  { %v1766_v43 = vmul.f32 %v5388_v63, %v1765_v21  ;;  %v1782_v40 = vsub.f32 1.0, %v1781_v42  ;;  %v5426_v31 = vpop.eup %3293  ;;  %v1705_v41 = vadd.f32 %v5370_v12, %v1704_v29  ;;  %v1712_v42 = vand.u32 2147483648, %v5344_v53  ;;  %vm5481_vm15 = vmor %vm1706_vm0, %vm1707_vm11 }
 0x2bf   :  { %v1750_v16 = vmul.f32 %v3286_v55, %v1749_v54  ;;  %v5433_v50 = vpop.eup %3295  ;;  %v1799_v27 = vsub.f32 1.0, %v1798_v61  ;;  %vm1802_vm14 = vweird.f32 %v5368_v47  ;;  %vm1622_vm2 = vweird.f32 %v5355_v38 }
 0x2c0   :  { %v1767_v15 = vadd.f32 %v5388_v63, %v1766_v43  ;;  %v1783_v30 = vmul.f32 %v5405_v4, %v1782_v40  ;;  %v1808_v43 = vand.u32 2147483648, %v5368_v47  ;;  %v1651_v0 = vmul.f32 %v5422_v1, %v5373_v56  ;;  %vm5495_vm0 = vmor %vm1802_vm14, %vm1803_vm10 }
 0x2c1   :  { %v1751_v9 = vadd.f32 %v3286_v55, %v1750_v16  ;;  %v5453_v46 = vpop.eup %3297  ;;  %v1800_v37 = vmul.f32 %v5417_v48, %v1799_v27  ;;  %v1709_v35 = vsel %vm5481_vm15, %v5370_v12, %v1705_v41  ;;  %v1635_v27 = vsub.f32 1.0, %v5402_v44 }
 0x2c2   :  { %v1771_v52 = vsel %vm5437_vm3, %v5388_v63, %v1767_v15  ;;  %v1784_v45 = vadd.f32 %v5405_v4, %v1783_v30  ;;  %v1816_v63 = vmul.f32 %v5453_v46, %v5412_v2  ;;  %v1602_v15 = vmul.f32 %v5363_v34, %v1601_v25 }
 0x2c3   :  { %v1755_v33 = vsel %vm1754_vm4, %v3286_v55, %v1751_v9  ;;  %v1789_v55 = vand.u32 2147483647, %v5361_v3  ;;  %v1776_v51 = vsel %vm5444_vm6, %v1775_v8, %v1771_v52  ;;  %v1801_v19 = vadd.f32 %v5417_v48, %v1800_v37  ;;  %vm5515_vm6 = vmor %vm1621_vm7, %vm1622_vm2 }
 0x2c4   :  { %v1760_v49 = vsel %vm1757_vm5, %v1759_v39, %v1755_v33  ;;  %v1788_v3 = vsel %vm5466_vm12, %v5405_v4, %v1784_v45  ;;  %v1817_v59 = vsub.f32 1.0, %v1816_v63  ;;  %v1806_v4 = vand.u32 2147483647, %v5368_v47 }
 0x2c5   :  { %v1762_v5 = vsub.f32 0.2, %v1760_v49  ;;  %vm1790_vm1 = vcmp.eq.f32.partialorder %v1789_v55, 8.507059e+37  ;;  %v1620_v47 = vadd.f32 %v5355_v38, %v5408_v60  ;;  %v1805_v30 = vsel %vm5495_vm0, %v5417_v48, %v1801_v19 }
 0x2c6   :  { %v1818_v61 = vmul.f32 %v5453_v46, %v1817_v59  ;;  %v1793_v9 = vsel %vm1790_vm1, %v1792_v32, %v1788_v3  ;;  %vm1711_vm3 = vcmp.eq.f32.partialorder %v1710_v36, 8.507059e+37  ;;  %v1713_v29 = vor.u32 1.1754944e-38, %v1712_v42 }
 0x2c7   :  { %v1777_v54 = vmul.f32 %v1776_v51, %v1762_v5  ;;  %v1809_v39 = vor.u32 1.1754944e-38, %v1808_v43  ;;  %vm1807_vm4 = vcmp.eq.f32.partialorder %v1806_v4, 8.507059e+37  ;;  %vm1821_vm5 = vweird.f32 %v5453_v46 }
 0x2c8   :  { %v1819_v33 = vadd.f32 %v5453_v46, %v1818_v61  ;;  %v1603_v60 = vadd.f32 %v5363_v34, %v1602_v15  ;;  %v5519_v44 = vsel %vm1711_vm3, %v1713_v29, %v1709_v35  ;;  %v1826_v36 = vand.u32 2147483648, %v5412_v2 }
 0x2c9   :  { %v1778_v40 = vsub.f32 1.0, %v1777_v54  ;;  %v1810_v48 = vsel %vm1807_vm4, %v1809_v39, %v1805_v30  ;;  %v1624_v52 = vsel %vm5515_vm6, %v5355_v38, %v1620_v47  ;;  %vm1820_vm8 = vweird.f32 %v5412_v2 }
 0x2ca   :  { %v1824_v49 = vand.u32 2147483647, %v5412_v2  ;;  %vm1604_vm9 = vweird.f32 %v5337_v57  ;;  %v1608_v8 = vand.u32 2147483647, %v5337_v57  ;;  %v1610_v20 = vand.u32 2147483648, %v5337_v57  ;;  %vm5532_vm7 = vmor %vm1820_vm8, %vm1821_vm5 }
 0x2cb   :  { %v1794_v25 = vmul.f32 %v1793_v9, %v1778_v40  ;;  %v1628_v37 = vor.u32 1.1754944e-38, %v1627_v10  ;;  %vm1626_vm11 = vcmp.eq.f32.partialorder %v1625_v58, 8.507059e+37  ;;  %v5540_v38 = vmul.f32 %v5519_v44, %v5519_v44  ;;  %vm1606_vm12 = vmor %vm1604_vm9, %vm1605_vm13 }
 0x2cc   :  { %v1823_v55 = vsel %vm5532_vm7, %v5453_v46, %v1819_v33  ;;  %v1652_v63 = vsub.f32 1.0, %v1651_v0  ;;  %v1668_v41 = vmul.f32 %v5426_v31, %v5376_v26  ;;  %v1827_v51 = vor.u32 1.1754944e-38, %v1826_v36 }
 0x2cd   :  { %v1795_v24 = vadd.f32 1.0, %v1794_v25  ;;  %v1629_v10 = vsel %vm1626_vm11, %v1628_v37, %v1624_v52  ;;  %v1607_v11 = vsel %vm1606_vm12, %v5363_v34, %v1603_v60  ;;  %v1636_v58 = vmul.f32 %v5379_v62, %v1635_v27 }
 0x2ce   :  { %vm1825_vm10 = vcmp.eq.f32.partialorder %v1824_v49, 8.507059e+37  ;;  %v1611_v54 = vor.u32 1.1754944e-38, %v1610_v20  ;;  %vm1609_vm14 = vcmp.eq.f32.partialorder %v1608_v8, 8.507059e+37  ;;  %v1721_v46 = vmul.f32 0.003968254, %v5540_v38 }
 0x2cf   :  { %v1811_v45 = vmul.f32 %v1810_v48, %v1795_v24  ;;  %v1828_v3 = vsel %vm1825_vm10, %v1827_v51, %v1823_v55  ;;  %vm1639_vm13 = vweird.f32 %v5379_v62  ;;  %v1653_v42 = vmul.f32 %v5422_v1, %v1652_v63 }
 0x2d0   :  { %v1612_v59 = vsel %vm1609_vm14, %v1611_v54, %v1607_v11  ;;  %v1637_v32 = vadd.f32 %v5379_v62, %v1636_v58  ;;  %v1669_v43 = vsub.f32 1.0, %v1668_v41  ;;  %v1685_v34 = vmul.f32 %v5433_v50, %v5386_v28 }
 0x2d1   :  { %v1812_v2 = vadd.f32 1.0, %v1811_v45  ;;  %v1644_v40 = vand.u32 2147483648, %v5347_v23  ;;  %vm1638_vm15 = vweird.f32 %v5347_v23  ;;  %v1642_v4 = vand.u32 2147483647, %v5347_v23 }
 0x2d2   :  { %v1722_v61 = vsub.f32 0.008333334, %v1721_v46  ;;  %vm1640_vm1 = vmor %vm1638_vm15, %vm1639_vm13  ;;  %v1654_v15 = vadd.f32 %v5422_v1, %v1653_v42  ;;  %vm1656_vm2 = vweird.f32 %v5422_v1  ;;  %v1631_v0 = vadd.f32 %v1629_v10, %v1612_v59 }
 0x2d3   :  { %v1813_v21 = vmul.f32 %v1812_v2, %v1629_v10  ;;  %v1641_v9 = vsel %vm1640_vm1, %v5379_v62, %v1637_v32  ;;  %v1670_v18 = vmul.f32 %v5426_v31, %v1669_v43  ;;  %v1686_v47 = vsub.f32 1.0, %v1685_v34 }
 0x2d4   :  { %v1645_v35 = vor.u32 1.1754944e-38, %v1644_v40  ;;  %v1661_v25 = vand.u32 2147483648, %v5373_v56  ;;  %vm1643_vm0 = vcmp.eq.f32.partialorder %v1642_v4, 8.507059e+37  ;;  %vm1655_vm3 = vweird.f32 %v5373_v56 }
 0x2d5   :  { %v1830_v19 = vadd.f32 %v1828_v3, %v1813_v21  ;;  %v1659_v23 = vand.u32 2147483647, %v5373_v56  ;;  %v1723_v30 = vmul.f32 %v1722_v61, %v5540_v38  ;;  %vm5572_vm4 = vmor %vm1655_vm3, %vm1656_vm2  ;;  %vm1673_vm5 = vweird.f32 %v5426_v31 }
 0x2d6   :  { %v1646_v27 = vsel %vm1643_vm0, %v1645_v35, %v1641_v9  ;;  %v1671_v24 = vadd.f32 %v5426_v31, %v1670_v18  ;;  %v1687_v33 = vmul.f32 %v5433_v50, %v1686_v47  ;;  %v1662_v56 = vor.u32 1.1754944e-38, %v1661_v25 }
 0x2d7   :  { %v5557_v16 = vsub.f32 %v1612_v59, %v1830_v19  ;;  %v1648_v39 = vadd.f32 %v1646_v27, %v1631_v0  ;;  %v1676_v60 = vand.u32 2147483647, %v5376_v26  ;;  %v1678_v12 = vand.u32 2147483648, %v5376_v26 }
 0x2d8   :  { %vm1660_vm6 = vcmp.eq.f32.partialorder %v1659_v23, 8.507059e+37  ;;  %vm1672_vm8 = vweird.f32 %v5376_v26  ;;  %v1724_v48 = vsub.f32 0.083333336, %v1723_v30  ;;  %vm1690_vm7 = vweird.f32 %v5433_v50 }
 0x2d9   :  { %3299 = vrcp.f32 %v5557_v16  ;;  %vm5588_vm9 = vmor %vm1672_vm8, %vm1673_vm5  ;;  %v1688_v26 = vadd.f32 %v5433_v50, %v1687_v33  ;;  %v1719_v20 = vmul.f32 0.5, %v5519_v44  ;;  %vm1677_vm11 = vcmp.eq.f32.partialorder %v1676_v60, 8.507059e+37 }
 0x2da   :  { %3301 = vlog2.f32 %v5344_v53  ;;  %v1658_v53 = vsel %vm5572_vm4, %v5422_v1, %v1654_v15  ;;  %v1675_v8 = vsel %vm5588_vm9, %v5426_v31, %v1671_v24  ;;  %v1679_v37 = vor.u32 1.1754944e-38, %v1678_v12 }
 0x2db   :  { %v1663_v45 = vsel %vm1660_vm6, %v1662_v56, %v1658_v53  ;;  %vm1689_vm12 = vweird.f32 %v5386_v28  ;;  %v1695_v5 = vand.u32 2147483648, %v5386_v28  ;;  %v1693_v2 = vand.u32 2147483647, %v5386_v28 }
 0x2dc   :  { %v1665_v49 = vadd.f32 %v1663_v45, %v1648_v39  ;;  %v1725_v10 = vmul.f32 %v1724_v48, %v5540_v38  ;;  %3303 = vlog2.f32 %v5337_v57  ;;  %v1680_v41 = vsel %vm1677_vm11, %v1679_v37, %v1675_v8  ;;  %vm1691_vm10 = vmor %vm1689_vm12, %vm1690_vm7 }
 0x2dd   :  { %v1692_v44 = vsel %vm1691_vm10, %v5433_v50, %v1688_v26  ;;  %v1696_v11 = vor.u32 1.1754944e-38, %v1695_v5  ;;  %vm1694_vm14 = vcmp.eq.f32.partialorder %v1693_v2, 8.507059e+37  ;;  %v1843_v19 = vand.u32 2147483648, %v5557_v16 }
 0x2de   :  { %v1682_v31 = vadd.f32 %v1680_v41, %v1665_v49  ;;  %vm1837_vm15 = vweird.f32 %v5557_v16  ;;  %v1841_v42 = vand.u32 2147483647, %v5557_v16 }
 0x2df   :  { %v3300_v62 = vpop.eup %3299  ;;  %v1697_v54 = vsel %vm1694_vm14, %v1696_v11, %v1692_v44  ;;  %v1844_v43 = vor.u32 1.1754944e-38, %v1843_v19 }
 0x2e0   :  { %v1833_v36 = vmul.f32 %v3300_v62, %v5557_v16  ;;  %v3302_v52 = vpop.eup %3301  ;;  %v1699_v28 = vadd.f32 %v1697_v54, %v1682_v31  ;;  %vm1838_vm13 = vweird.f32 %v3300_v62  ;;  %vm1842_vm2 = vcmp.eq.f32.partialorder %v1841_v42, 8.507059e+37 }
 0x2e1   :  { %v1718_v55 = vmul.f32 0.6931472, %v3302_v52  ;;  %vm1839_vm1 = vmor %vm1837_vm15, %vm1838_vm13 }
 0x2e2   :  { %v1834_v63 = vsub.f32 1.0, %v1833_v36  ;;  %v3304_v3 = vpop.eup %3303 }
 0x2e3   :  { %v1720_v51 = vsub.f32 %v1718_v55, %v1719_v20  ;;  %v1597_v59 = vmul.f32 0.6931472, %v3304_v3 }
 0x2e4   :  { %v1835_v21 = vmul.f32 %v3300_v62, %v1834_v63 }
 0x2e5   :  { %v1726_v58 = vsub.f32 %v1720_v51, %v1725_v10 }
 0x2e6   :  { %v1836_v38 = vadd.f32 %v3300_v62, %v1835_v21 }
 0x2e7   :  { %v1727_v46 = vsub.f32 %v1726_v58, %v1699_v28 }
 0x2e8   :  { %v1840_v32 = vsel %vm1839_vm1, %v3300_v62, %v1836_v38 }
 0x2e9   :  { %v1728_v50 = vsub.f32 %v1597_v59, %v1727_v46  ;;  %v1845_v34 = vsel %vm1842_vm2, %v1844_v43, %v1840_v32 }
 0x2eb   :  { %v1729_v40 = vsub.f32 %v1728_v50, %v3525_v22 }
 0x2ed   :  { %v1846_v4 = vmul.f32 %v1845_v34, %v1729_v40 }
 0x2ef   :  { %v5611_v61 = vsub.f32 %v5337_v57, %v1846_v4 }
 0x2f1   :  { %3305 = vrcp.f32 %v5611_v61  ;;  %v5615_v15 = vadd.f32 1.0, %v5611_v61  ;;  %v5618_v0 = vadd.f32 6.0, %v5611_v61  ;;  %v5638_v35 = vadd.f32 2.0, %v5611_v61 }
 0x2f2   :  { %v5649_v27 = vadd.f32 3.0, %v5611_v61  ;;  %v5652_v29 = vadd.f32 4.0, %v5611_v61  ;;  %v5657_v39 = vadd.f32 5.0, %v5611_v61  ;;  %v5681_v26 = vmul.f32 %v5611_v61, %v5611_v61 }
 0x2f3   :  { %3307 = vrcp.f32 %v5615_v15  ;;  %v5626_v9 = vmul.f32 %v5615_v15, %v5615_v15  ;;  %v5633_v18 = vmul.f32 3.0, %v5615_v15  ;;  %v5644_v23 = vmul.f32 2.0, %v5615_v15 }
 0x2f4   :  { %3309 = vrcp.f32 %v5618_v0  ;;  %v1877_v12 = vand.u32 2147483647, %v5615_v15  ;;  %v1879_v36 = vand.u32 2147483648, %v5615_v15  ;;  %vm1873_vm10 = vweird.f32 %v5615_v15 }
 0x2f5   :  { %v5629_v57 = vmul.f32 7.0, %v5626_v9  ;;  %3311 = vrcp.f32 %v5626_v9  ;;  %v2024_v2 = vand.u32 2147483647, %v5626_v9  ;;  %vm2020_vm4 = vweird.f32 %v5626_v9 }
 0x2f6   :  { %v2026_v28 = vand.u32 2147483648, %v5626_v9  ;;  %vm2037_vm14 = vweird.f32 %v5633_v18 }
 0x2f7   :  { %v5622_v16 = vpop.eup %3305  ;;  %3313 = vrcp.f32 %v5629_v57  ;;  %v2008_v5 = vand.u32 2147483647, %v5629_v57  ;;  %v2010_v63 = vand.u32 2147483648, %v5629_v57  ;;  %vm2004_vm5 = vweird.f32 %v5629_v57 }
 0x2f8   :  { %v1852_v47 = vmul.f32 %v5622_v16, %v5611_v61  ;;  %3315 = vrcp.f32 %v5633_v18  ;;  %vm5718_vm11 = vcmp.eq.f32.partialorder %v2024_v2, 8.507059e+37  ;;  %vm1857_vm2 = vweird.f32 %v5622_v16 }
 0x2f9   :  { %v5640_v25 = vpop.eup %3307  ;;  %3317 = vrcp.f32 %v5638_v35  ;;  %vm2009_vm7 = vcmp.eq.f32.partialorder %v2008_v5, 8.507059e+37  ;;  %v2011_v50 = vor.u32 1.1754944e-38, %v2010_v63  ;;  %v2060_v2 = vand.u32 2147483648, %v5644_v23 }
 0x2fa   :  { %v5646_v30 = vpop.eup %3309  ;;  %v1853_v62 = vsub.f32 1.0, %v1852_v47  ;;  %v1869_v24 = vmul.f32 %v5640_v25, %v5615_v15  ;;  %3319 = vrcp.f32 %v5644_v23  ;;  %vm1874_vm8 = vweird.f32 %v5640_v25 }
 0x2fb   :  { %v5659_v53 = vpop.eup %3311  ;;  %v1954_v33 = vmul.f32 %v5646_v30, %v5618_v0  ;;  %3321 = vrcp.f32 %v5649_v27  ;;  %v2043_v47 = vand.u32 2147483648, %v5633_v18  ;;  %vm1959_vm13 = vweird.f32 %v5646_v30 }
 0x2fc   :  { %v2016_v56 = vmul.f32 %v5659_v53, %v5626_v9  ;;  %3323 = vrcp.f32 %v5652_v29  ;;  %v5672_v48 = vmul.f32 %v5622_v16, %v1853_v62  ;;  %v1870_v1 = vsub.f32 1.0, %v1869_v24 }
 0x2fd   :  { %v3314_v60 = vpop.eup %3313  ;;  %3325 = vrcp.f32 %v5657_v39  ;;  %v1955_v49 = vsub.f32 1.0, %v1954_v33  ;;  %vm2021_vm0 = vweird.f32 %v5659_v53  ;;  %v2041_v33 = vand.u32 2147483647, %v5633_v18 }
 0x2fe   :  { %v2000_v52 = vmul.f32 %v3314_v60, %v5629_v57  ;;  %v5677_v45 = vpop.eup %3315  ;;  %v2017_v8 = vsub.f32 1.0, %v2016_v56  ;;  %3327 = vrcp.f32 %v5681_v26  ;;  %vm2005_vm3 = vweird.f32 %v3314_v60  ;;  %vm5710_vm6 = vmor %vm2020_vm4, %vm2021_vm0 }
 0x2ff   :  { %v5683_v20 = vpop.eup %3317  ;;  %v2033_v55 = vmul.f32 %v5677_v45, %v5633_v18  ;;  %v1871_v21 = vmul.f32 %v5640_v25, %v1870_v1  ;;  %v1956_v42 = vmul.f32 %v5646_v30, %v1955_v49  ;;  %vm2006_vm9 = vmor %vm2004_vm5, %vm2005_vm3  ;;  %vm2038_vm12 = vweird.f32 %v5677_v45 }
 0x300   :  { %v2001_v37 = vsub.f32 1.0, %v2000_v52  ;;  %v5689_v10 = vpop.eup %3319  ;;  %v2018_v41 = vmul.f32 %v5659_v53, %v2017_v8  ;;  %v2027_v57 = vor.u32 1.1754944e-38, %v2026_v28  ;;  %v1964_v56 = vand.u32 2147483648, %v5618_v0  ;;  %vm5740_vm15 = vmor %vm2037_vm14, %vm2038_vm12 }
 0x301   :  { %v5695_v31 = vpop.eup %3321  ;;  %v2034_v51 = vsub.f32 1.0, %v2033_v55  ;;  %v2050_v11 = vmul.f32 %v5689_v10, %v5644_v23  ;;  %vm2055_vm1 = vweird.f32 %v5689_v10  ;;  %v2044_v5 = vor.u32 1.1754944e-38, %v2043_v47 }
 0x302   :  { %v2002_v44 = vmul.f32 %v3314_v60, %v2001_v37  ;;  %v5699_v58 = vpop.eup %3323  ;;  %v2019_v54 = vadd.f32 %v5659_v53, %v2018_v41  ;;  %v1957_v37 = vadd.f32 %v5646_v30, %v1956_v42  ;;  %vm2054_vm0 = vweird.f32 %v5644_v23 }
 0x303   :  { %v5705_v3 = vpop.eup %3325  ;;  %v2035_v19 = vmul.f32 %v5677_v45, %v2034_v51  ;;  %v2051_v59 = vsub.f32 1.0, %v2050_v11  ;;  %vm2042_vm3 = vcmp.eq.f32.partialorder %v2041_v33, 8.507059e+37  ;;  %v2058_v63 = vand.u32 2147483647, %v5644_v23  ;;  %vm5760_vm5 = vmor %vm2054_vm0, %vm2055_vm1 }
 0x304   :  { %v2003_v46 = vadd.f32 %v3314_v60, %v2002_v44  ;;  %v2023_v34 = vsel %vm5710_vm6, %v5659_v53, %v2019_v54  ;;  %v5727_v4 = vpop.eup %3327  ;;  %v1872_v44 = vadd.f32 %v5640_v25, %v1871_v21  ;;  %vm1958_vm4 = vweird.f32 %v5618_v0 }
 0x305   :  { %v2036_v40 = vadd.f32 %v5677_v45, %v2035_v19  ;;  %v2052_v62 = vmul.f32 %v5689_v10, %v2051_v59  ;;  %v2068_v53 = vmul.f32 %v5727_v4, %v5681_v26  ;;  %v1886_v54 = vmul.f32 %v5683_v20, %v5638_v35  ;;  %vm5770_vm6 = vmor %vm1958_vm4, %vm1959_vm13 }
 0x306   :  { %v2007_v43 = vsel %vm2006_vm9, %v3314_v60, %v2003_v46  ;;  %v2028_v60 = vsel %vm5718_vm11, %v2027_v57, %v2023_v34  ;;  %v1903_v23 = vmul.f32 %v5695_v31, %v5649_v27  ;;  %v1855_v38 = vadd.f32 %v5622_v16, %v5672_v48  ;;  %vm5786_vm9 = vmor %vm1873_vm10, %vm1874_vm8 }
 0x307   :  { %v2012_v9 = vsel %vm2009_vm7, %v2011_v50, %v2007_v43  ;;  %v2040_v18 = vsel %vm5740_vm15, %v5677_v45, %v2036_v40  ;;  %v2053_v49 = vadd.f32 %v5689_v10, %v2052_v62  ;;  %v2069_v8 = vsub.f32 1.0, %v2068_v53 }
 0x308   :  { %v2014_v24 = vsub.f32 0.2, %v2012_v9  ;;  %v1962_v45 = vand.u32 2147483647, %v5618_v0  ;;  %v2045_v51 = vsel %vm2042_vm3, %v2044_v5, %v2040_v18  ;;  %v1961_v19 = vsel %vm5770_vm6, %v5646_v30, %v1957_v37 }
 0x309   :  { %v2070_v41 = vmul.f32 %v5727_v4, %v2069_v8  ;;  %v2057_v46 = vsel %vm5760_vm5, %v5689_v10, %v2053_v49  ;;  %v1965_v59 = vor.u32 1.1754944e-38, %v1964_v56  ;;  %v2061_v42 = vor.u32 1.1754944e-38, %v2060_v2 }
 0x30a   :  { %v2029_v1 = vmul.f32 %v2028_v60, %v2014_v24  ;;  %vm2059_vm7 = vcmp.eq.f32.partialorder %v2058_v63, 8.507059e+37  ;;  %vm2073_vm11 = vweird.f32 %v5727_v4  ;;  %v1876_v30 = vsel %vm5786_vm9, %v5640_v25, %v1872_v44 }
 0x30b   :  { %v2071_v10 = vadd.f32 %v5727_v4, %v2070_v41  ;;  %vm1963_vm12 = vcmp.eq.f32.partialorder %v1962_v45, 8.507059e+37  ;;  %v2062_v48 = vsel %vm2059_vm7, %v2061_v42, %v2057_v46  ;;  %v2078_v43 = vand.u32 2147483648, %v5681_v26 }
 0x30c   :  { %v2030_v55 = vsub.f32 1.0, %v2029_v1  ;;  %v5796_v34 = vsel %vm1963_vm12, %v1965_v59, %v1961_v19  ;;  %vm2072_vm8 = vweird.f32 %v5681_v26  ;;  %v2076_v9 = vand.u32 2147483647, %v5681_v26 }
 0x30d   :  { %vm1856_vm10 = vweird.f32 %v5611_v61  ;;  %v1862_v57 = vand.u32 2147483648, %v5611_v61  ;;  %v1880_v47 = vor.u32 1.1754944e-38, %v1879_v36  ;;  %v1887_v62 = vsub.f32 1.0, %v1886_v54  ;;  %vm5804_vm14 = vmor %vm2072_vm8, %vm2073_vm11 }
 0x30e   :  { %v2046_v28 = vmul.f32 %v2045_v51, %v2030_v55  ;;  %v1860_v24 = vand.u32 2147483647, %v5611_v61  ;;  %vm1878_vm13 = vcmp.eq.f32.partialorder %v1877_v12, 8.507059e+37  ;;  %v2075_v26 = vsel %vm5804_vm14, %v5727_v4, %v2071_v10  ;;  %vm1858_vm15 = vmor %vm1856_vm10, %vm1857_vm2 }
 0x30f   :  { %v1881_v53 = vsel %vm1878_vm13, %v1880_v47, %v1876_v30  ;;  %v5818_v36 = vmul.f32 %v5796_v34, %v5796_v34  ;;  %v2079_v56 = vor.u32 1.1754944e-38, %v2078_v43  ;;  %v1859_v60 = vsel %vm1858_vm15, %v5622_v16, %v1855_v38 }
 0x310   :  { %v2047_v32 = vadd.f32 1.0, %v2046_v28  ;;  %v1904_v52 = vsub.f32 1.0, %v1903_v23  ;;  %vm2077_vm1 = vcmp.eq.f32.partialorder %v2076_v9, 8.507059e+37  ;;  %v1863_v15 = vor.u32 1.1754944e-38, %v1862_v57 }
 0x311   :  { %v1888_v12 = vmul.f32 %v5683_v20, %v1887_v62  ;;  %v1920_v4 = vmul.f32 %v5699_v58, %v5652_v29  ;;  %v2080_v18 = vsel %vm2077_vm1, %v2079_v56, %v2075_v26  ;;  %vm1861_vm0 = vcmp.eq.f32.partialorder %v1860_v24, 8.507059e+37 }
 0x312   :  { %v2063_v40 = vmul.f32 %v2062_v48, %v2047_v32  ;;  %v1864_v8 = vsel %vm1861_vm0, %v1863_v15, %v1859_v60  ;;  %v1973_v37 = vmul.f32 0.003968254, %v5818_v36  ;;  %v1905_v5 = vmul.f32 %v5695_v31, %v1904_v52 }
 0x313   :  { %v1889_v16 = vadd.f32 %v5683_v20, %v1888_v12  ;;  %vm1891_vm2 = vweird.f32 %v5683_v20  ;;  %v1921_v55 = vsub.f32 1.0, %v1920_v4  ;;  %v1937_v63 = vmul.f32 %v5705_v3, %v5657_v39 }
 0x314   :  { %v2064_v33 = vadd.f32 1.0, %v2063_v40  ;;  %v1896_v41 = vand.u32 2147483648, %v5638_v35  ;;  %vm1890_vm3 = vweird.f32 %v5638_v35  ;;  %v1894_v44 = vand.u32 2147483647, %v5638_v35 }
 0x315   :  { %v1974_v45 = vsub.f32 0.008333334, %v1973_v37  ;;  %vm5836_vm4 = vmor %vm1890_vm3, %vm1891_vm2  ;;  %v1906_v11 = vadd.f32 %v5695_v31, %v1905_v5  ;;  %vm1908_vm5 = vweird.f32 %v5695_v31  ;;  %v1883_v54 = vadd.f32 %v1881_v53, %v1864_v8 }
 0x316   :  { %v2065_v1 = vmul.f32 %v2064_v33, %v1881_v53  ;;  %v1893_v23 = vsel %vm5836_vm4, %v5683_v20, %v1889_v16  ;;  %v1922_v21 = vmul.f32 %v5699_v58, %v1921_v55  ;;  %v1938_v28 = vsub.f32 1.0, %v1937_v63 }
 0x317   :  { %v1897_v46 = vor.u32 1.1754944e-38, %v1896_v41  ;;  %v1913_v35 = vand.u32 2147483648, %v5649_v27  ;;  %vm1895_vm6 = vcmp.eq.f32.partialorder %v1894_v44, 8.507059e+37  ;;  %vm1907_vm9 = vweird.f32 %v5649_v27 }
 0x318   :  { %v2082_v49 = vadd.f32 %v2080_v18, %v2065_v1  ;;  %v1911_v38 = vand.u32 2147483647, %v5649_v27  ;;  %v1975_v19 = vmul.f32 %v1974_v45, %v5818_v36  ;;  %vm1909_vm7 = vmor %vm1907_vm9, %vm1908_vm5  ;;  %vm1925_vm11 = vweird.f32 %v5699_v58 }
 0x319   :  { %v1898_v42 = vsel %vm1895_vm6, %v1897_v46, %v1893_v23  ;;  %v1910_v50 = vsel %vm1909_vm7, %v5695_v31, %v1906_v11  ;;  %v1923_v32 = vadd.f32 %v5699_v58, %v1922_v21  ;;  %v1939_v10 = vmul.f32 %v5705_v3, %v1938_v28 }
 0x31a   :  { %v5826_v2 = vsub.f32 %v1864_v8, %v2082_v49  ;;  %v1900_v20 = vadd.f32 %v1898_v42, %v1883_v54  ;;  %v1928_v30 = vand.u32 2147483647, %v5652_v29  ;;  %v1930_v48 = vand.u32 2147483648, %v5652_v29 }
 0x31b   :  { %vm1912_vm12 = vcmp.eq.f32.partialorder %v1911_v38, 8.507059e+37  ;;  %vm1924_vm8 = vweird.f32 %v5652_v29  ;;  %v1976_v27 = vsub.f32 0.083333336, %v1975_v19  ;;  %vm1942_vm14 = vweird.f32 %v5705_v3 }
 0x31c   :  { %3329 = vrcp.f32 %v5826_v2  ;;  %vm5859_vm10 = vmor %vm1924_vm8, %vm1925_vm11  ;;  %v1940_v62 = vadd.f32 %v5705_v3, %v1939_v10  ;;  %v1971_v29 = vmul.f32 0.5, %v5796_v34  ;;  %vm1929_vm13 = vcmp.eq.f32.partialorder %v1928_v30, 8.507059e+37 }
 0x31d   :  { %3331 = vlog2.f32 %v5618_v0  ;;  %v1914_v0 = vor.u32 1.1754944e-38, %v1913_v35  ;;  %v1927_v47 = vsel %vm5859_vm10, %v5699_v58, %v1923_v32  ;;  %v1931_v25 = vor.u32 1.1754944e-38, %v1930_v48 }
 0x31e   :  { %vm1941_vm15 = vweird.f32 %v5657_v39  ;;  %v1947_v24 = vand.u32 2147483648, %v5657_v39  ;;  %v1945_v33 = vand.u32 2147483647, %v5657_v39  ;;  %v1977_v53 = vmul.f32 %v1976_v27, %v5818_v36 }
 0x31f   :  { %v1915_v9 = vsel %vm1912_vm12, %v1914_v0, %v1910_v50  ;;  %3333 = vlog2.f32 %v5611_v61  ;;  %v1932_v60 = vsel %vm1929_vm13, %v1931_v25, %v1927_v47  ;;  %vm1943_vm1 = vmor %vm1941_vm15, %vm1942_vm14  ;;  %v2095_v8 = vand.u32 2147483648, %v5826_v2 }
 0x320   :  { %v1917_v31 = vadd.f32 %v1915_v9, %v1900_v20  ;;  %v1944_v34 = vsel %vm1943_vm1, %v5705_v3, %v1940_v62  ;;  %v1948_v1 = vor.u32 1.1754944e-38, %v1947_v24  ;;  %vm1946_vm0 = vcmp.eq.f32.partialorder %v1945_v33, 8.507059e+37 }
 0x321   :  { %vm2089_vm3 = vweird.f32 %v5826_v2  ;;  %v2093_v5 = vand.u32 2147483647, %v5826_v2  ;;  %v2096_v55 = vor.u32 1.1754944e-38, %v2095_v8 }
 0x322   :  { %v3330_v59 = vpop.eup %3329  ;;  %v1934_v58 = vadd.f32 %v1932_v60, %v1917_v31  ;;  %v1949_v4 = vsel %vm1946_vm0, %v1948_v1, %v1944_v34 }
 0x323   :  { %v2085_v43 = vmul.f32 %v3330_v59, %v5826_v2  ;;  %v3332_v40 = vpop.eup %3331  ;;  %vm2090_vm2 = vweird.f32 %v3330_v59  ;;  %vm2094_vm5 = vcmp.eq.f32.partialorder %v2093_v5, 8.507059e+37 }
 0x324   :  { %v1970_v26 = vmul.f32 0.6931472, %v3332_v40  ;;  %v1951_v39 = vadd.f32 %v1949_v4, %v1934_v58  ;;  %vm2091_vm4 = vmor %vm2089_vm3, %vm2090_vm2 }
 0x325   :  { %v2086_v56 = vsub.f32 1.0, %v2085_v43  ;;  %v3334_v18 = vpop.eup %3333 }
 0x326   :  { %v1972_v52 = vsub.f32 %v1970_v26, %v1971_v29  ;;  %v1849_v37 = vmul.f32 0.6931472, %v3334_v18 }
 0x327   :  { %v2087_v12 = vmul.f32 %v3330_v59, %v2086_v56 }
 0x328   :  { %v1978_v15 = vsub.f32 %v1972_v52, %v1977_v53 }
 0x329   :  { %v2088_v36 = vadd.f32 %v3330_v59, %v2087_v12 }
 0x32a   :  { %v1979_v49 = vsub.f32 %v1978_v15, %v1951_v39 }
 0x32b   :  { %v2092_v16 = vsel %vm2091_vm4, %v3330_v59, %v2088_v36 }
 0x32c   :  { %v1980_v3 = vsub.f32 %v1849_v37, %v1979_v49  ;;  %v2097_v63 = vsel %vm2094_vm5, %v2096_v55, %v2092_v16 }
 0x32e   :  { %v1981_v41 = vsub.f32 %v1980_v3, %v3525_v22 }
 0x330   :  { %v2098_v44 = vmul.f32 %v2097_v63, %v1981_v41 }
 0x332   :  { %v5882_v45 = vsub.f32 %v5611_v61, %v2098_v44 }
 0x334   :  { %3335 = vrcp.f32 %v5882_v45  ;;  %v5886_v51 = vadd.f32 6.0, %v5882_v45  ;;  %v5889_v11 = vadd.f32 1.0, %v5882_v45  ;;  %v5912_v35 = vadd.f32 2.0, %v5882_v45 }
 0x335   :  { %v5915_v38 = vadd.f32 3.0, %v5882_v45  ;;  %v5921_v59 = vadd.f32 4.0, %v5882_v45  ;;  %v2112_v32 = vand.u32 2147483647, %v5882_v45  ;;  %v2114_v30 = vand.u32 2147483648, %v5882_v45 }
 0x336   :  { %3337 = vrcp.f32 %v5886_v51  ;;  %v5894_v2 = vmul.f32 %v5889_v11, %v5889_v11  ;;  %v5902_v23 = vmul.f32 3.0, %v5889_v11  ;;  %v5907_v28 = vmul.f32 2.0, %v5889_v11 }
 0x337   :  { %3339 = vrcp.f32 %v5889_v11  ;;  %v2129_v48 = vand.u32 2147483647, %v5889_v11  ;;  %v5936_v27 = vadd.f32 5.0, %v5882_v45  ;;  %v2131_v40 = vand.u32 2147483648, %v5889_v11 }
 0x338   :  { %v2250_v61 = vmul.f32 7.0, %v5894_v2  ;;  %3341 = vrcp.f32 %v5894_v2  ;;  %v5949_v29 = vmul.f32 %v5882_v45, %v5882_v45  ;;  %v2276_v33 = vand.u32 2147483647, %v5894_v2 }
 0x339   :  { %vm2272_vm7 = vweird.f32 %v5894_v2  ;;  %v2278_v39 = vand.u32 2147483648, %v5894_v2  ;;  %vm2125_vm1 = vweird.f32 %v5889_v11  ;;  %vm2289_vm0 = vweird.f32 %v5902_v23 }
 0x33a   :  { %v5896_v54 = vpop.eup %3335  ;;  %3343 = vrcp.f32 %v2250_v61  ;;  %v2260_v24 = vand.u32 2147483647, %v2250_v61  ;;  %v2262_v56 = vand.u32 2147483648, %v2250_v61  ;;  %vm2256_vm11 = vweird.f32 %v2250_v61 }
 0x33b   :  { %v2104_v21 = vmul.f32 %v5896_v54, %v5882_v45  ;;  %3345 = vrcp.f32 %v5902_v23  ;;  %vm5980_vm13 = vcmp.eq.f32.partialorder %v2276_v33, 8.507059e+37  ;;  %vm2306_vm5 = vweird.f32 %v5907_v28 }
 0x33c   :  { %v5909_v46 = vpop.eup %3337  ;;  %3347 = vrcp.f32 %v5907_v28  ;;  %vm2261_vm14 = vcmp.eq.f32.partialorder %v2260_v24, 8.507059e+37  ;;  %v2263_v3 = vor.u32 1.1754944e-38, %v2262_v56 }
 0x33d   :  { %v5918_v19 = vpop.eup %3339  ;;  %v2105_v20 = vsub.f32 1.0, %v2104_v21  ;;  %v2206_v50 = vmul.f32 %v5909_v46, %v5886_v51  ;;  %3349 = vrcp.f32 %v5912_v35  ;;  %v2295_v21 = vand.u32 2147483648, %v5902_v23 }
 0x33e   :  { %v5923_v42 = vpop.eup %3341  ;;  %3351 = vrcp.f32 %v5915_v38  ;;  %v2121_v43 = vmul.f32 %v5918_v19, %v5889_v11  ;;  %vm2126_vm8 = vweird.f32 %v5918_v19  ;;  %vm2211_vm2 = vweird.f32 %v5909_v46 }
 0x33f   :  { %v2268_v10 = vmul.f32 %v5923_v42, %v5894_v2  ;;  %3353 = vrcp.f32 %v5921_v59  ;;  %v5945_v31 = vmul.f32 %v5896_v54, %v2105_v20  ;;  %v2207_v47 = vsub.f32 1.0, %v2206_v50 }
 0x340   :  { %v3344_v0 = vpop.eup %3343  ;;  %vm2273_vm6 = vweird.f32 %v5923_v42  ;;  %3355 = vrcp.f32 %v5949_v29  ;;  %v2122_v12 = vsub.f32 1.0, %v2121_v43  ;;  %v2296_v33 = vor.u32 1.1754944e-38, %v2295_v21 }
 0x341   :  { %v2252_v9 = vmul.f32 %v3344_v0, %v2250_v61  ;;  %v5942_v57 = vpop.eup %3345  ;;  %v2269_v62 = vsub.f32 1.0, %v2268_v10  ;;  %vm2257_vm9 = vweird.f32 %v3344_v0  ;;  %vm5972_vm12 = vmor %vm2272_vm7, %vm2273_vm6  ;;  %v2208_v5 = vmul.f32 %v5909_v46, %v2207_v47 }
 0x342   :  { %v2285_v26 = vmul.f32 %v5942_v57, %v5902_v23  ;;  %v5954_v53 = vpop.eup %3347  ;;  %vm2258_vm10 = vmor %vm2256_vm11, %vm2257_vm9  ;;  %vm2290_vm15 = vweird.f32 %v5942_v57  ;;  %v2279_v61 = vor.u32 1.1754944e-38, %v2278_v39  ;;  %v2293_v10 = vand.u32 2147483647, %v5902_v23 }
 0x343   :  { %v2253_v25 = vsub.f32 1.0, %v2252_v9  ;;  %v2270_v60 = vmul.f32 %v5923_v42, %v2269_v62  ;;  %v5959_v58 = vpop.eup %3349  ;;  %v2302_v1 = vmul.f32 %v5954_v53, %v5907_v28  ;;  %vm6002_vm3 = vmor %vm2289_vm0, %vm2290_vm15  ;;  %vm2307_vm4 = vweird.f32 %v5954_v53 }
 0x344   :  { %v2286_v52 = vsub.f32 1.0, %v2285_v26  ;;  %v5963_v15 = vpop.eup %3351  ;;  %v2209_v24 = vadd.f32 %v5909_v46, %v2208_v5  ;;  %v2312_v26 = vand.u32 2147483648, %v5907_v28  ;;  %vm2108_vm6 = vweird.f32 %v5882_v45  ;;  %vm6022_vm11 = vmor %vm2306_vm5, %vm2307_vm4 }
 0x345   :  { %v2254_v34 = vmul.f32 %v3344_v0, %v2253_v25  ;;  %v2271_v4 = vadd.f32 %v5923_v42, %v2270_v60  ;;  %v5968_v18 = vpop.eup %3353  ;;  %v2303_v37 = vsub.f32 1.0, %v2302_v1  ;;  %vm2294_vm9 = vcmp.eq.f32.partialorder %v2293_v10, 8.507059e+37 }
 0x346   :  { %v2287_v8 = vmul.f32 %v5942_v57, %v2286_v52  ;;  %v5989_v44 = vpop.eup %3355  ;;  %v2310_v60 = vand.u32 2147483647, %v5907_v28  ;;  %vm2210_vm7 = vweird.f32 %v5886_v51  ;;  %v2216_v52 = vand.u32 2147483648, %v5886_v51 }
 0x347   :  { %v2255_v49 = vadd.f32 %v3344_v0, %v2254_v34  ;;  %v2275_v63 = vsel %vm5972_vm12, %v5923_v42, %v2271_v4  ;;  %v2304_v20 = vmul.f32 %v5954_v53, %v2303_v37  ;;  %v2320_v42 = vmul.f32 %v5989_v44, %v5949_v29 }
 0x348   :  { %v2288_v41 = vadd.f32 %v5942_v57, %v2287_v8  ;;  %v2280_v43 = vsel %vm5980_vm13, %v2279_v61, %v2275_v63  ;;  %vm2109_vm12 = vweird.f32 %v5896_v54  ;;  %v2214_v4 = vand.u32 2147483647, %v5886_v51 }
 0x349   :  { %v2259_v55 = vsel %vm2258_vm10, %v3344_v0, %v2255_v49  ;;  %v2123_v0 = vmul.f32 %v5918_v19, %v2122_v12  ;;  %v2305_v62 = vadd.f32 %v5954_v53, %v2304_v20  ;;  %v2321_v25 = vsub.f32 1.0, %v2320_v42  ;;  %vm6029_vm10 = vmor %vm2210_vm7, %vm2211_vm2 }
 0x34a   :  { %v2264_v2 = vsel %vm2261_vm14, %v2263_v3, %v2259_v55  ;;  %v2292_v23 = vsel %vm6002_vm3, %v5942_v57, %v2288_v41  ;;  %v2107_v36 = vadd.f32 %v5896_v54, %v5945_v31  ;;  %v2138_v8 = vmul.f32 %v5959_v58, %v5912_v35  ;;  %vm6048_vm14 = vmor %vm2125_vm1, %vm2126_vm8 }
 0x34b   :  { %v2266_v50 = vsub.f32 0.2, %v2264_v2  ;;  %v2322_v34 = vmul.f32 %v5989_v44, %v2321_v25  ;;  %v2124_v57 = vadd.f32 %v5918_v19, %v2123_v0  ;;  %v2297_v1 = vsel %vm2294_vm9, %v2296_v33, %v2292_v23  ;;  %vm6074_vm3 = vmor %vm2108_vm6, %vm2109_vm12 }
 0x34c   :  { %v2309_v49 = vsel %vm6022_vm11, %v5954_v53, %v2305_v62  ;;  %v2213_v37 = vsel %vm6029_vm10, %v5909_v46, %v2209_v24  ;;  %v2313_v5 = vor.u32 1.1754944e-38, %v2312_v26  ;;  %vm2311_vm13 = vcmp.eq.f32.partialorder %v2310_v60, 8.507059e+37 }
 0x34d   :  { %v2281_v47 = vmul.f32 %v2280_v43, %v2266_v50  ;;  %v2323_v31 = vadd.f32 %v5989_v44, %v2322_v34  ;;  %vm2325_vm15 = vweird.f32 %v5989_v44  ;;  %v2128_v16 = vsel %vm6048_vm14, %v5918_v19, %v2124_v57 }
 0x34e   :  { %v2217_v46 = vor.u32 1.1754944e-38, %v2216_v52  ;;  %v2314_v55 = vsel %vm2311_vm13, %v2313_v5, %v2309_v49  ;;  %v2330_v63 = vand.u32 2147483648, %v5949_v29  ;;  %vm2215_vm0 = vcmp.eq.f32.partialorder %v2214_v4, 8.507059e+37 }
 0x34f   :  { %v2282_v56 = vsub.f32 1.0, %v2281_v47  ;;  %vm2324_vm8 = vweird.f32 %v5949_v29  ;;  %v2328_v2 = vand.u32 2147483647, %v5949_v29  ;;  %v2132_v61 = vor.u32 1.1754944e-38, %v2131_v40 }
 0x350   :  { %v2155_v21 = vmul.f32 %v5963_v15, %v5915_v38  ;;  %3357 = vrcp.f32 %v5936_v27  ;;  %v6065_v20 = vsel %vm2215_vm0, %v2217_v46, %v2213_v37  ;;  %vm2326_vm1 = vmor %vm2324_vm8, %vm2325_vm15  ;;  %vm2130_vm2 = vcmp.eq.f32.partialorder %v2129_v48, 8.507059e+37 }
 0x351   :  { %v2298_v39 = vmul.f32 %v2297_v1, %v2282_v56  ;;  %v2139_v19 = vsub.f32 1.0, %v2138_v8  ;;  %v2327_v10 = vsel %vm2326_vm1, %v5989_v44, %v2323_v31  ;;  %v2133_v29 = vsel %vm2130_vm2, %v2132_v61, %v2128_v16 }
 0x352   :  { %v2331_v42 = vor.u32 1.1754944e-38, %v2330_v63  ;;  %v2111_v0 = vsel %vm6074_vm3, %v5896_v54, %v2107_v36  ;;  %v6083_v11 = vmul.f32 %v6065_v20, %v6065_v20  ;;  %vm2329_vm4 = vcmp.eq.f32.partialorder %v2328_v2, 8.507059e+37 }
 0x353   :  { %v2299_v53 = vadd.f32 1.0, %v2298_v39  ;;  %v2115_v44 = vor.u32 1.1754944e-38, %v2114_v30  ;;  %v2156_v43 = vsub.f32 1.0, %v2155_v21  ;;  %vm2113_vm5 = vcmp.eq.f32.partialorder %v2112_v32, 8.507059e+37 }
 0x354   :  { %v2332_v9 = vsel %vm2329_vm4, %v2331_v42, %v2327_v10  ;;  %v2140_v47 = vmul.f32 %v5959_v58, %v2139_v19  ;;  %v2172_v23 = vmul.f32 %v5968_v18, %v5921_v59  ;;  %v2225_v24 = vmul.f32 0.003968254, %v6083_v11 }
 0x355   :  { %v2315_v41 = vmul.f32 %v2314_v55, %v2299_v53  ;;  %v2116_v25 = vsel %vm2113_vm5, %v2115_v44, %v2111_v0  ;;  %v2157_v30 = vmul.f32 %v5963_v15, %v2156_v43  ;;  %vm2143_vm6 = vweird.f32 %v5959_v58 }
 0x356   :  { %v6092_v62 = vpop.eup %3357  ;;  %v2141_v26 = vadd.f32 %v5959_v58, %v2140_v47  ;;  %v2173_v32 = vsub.f32 1.0, %v2172_v23  ;;  %v2148_v60 = vand.u32 2147483648, %v5912_v35  ;;  %vm2142_vm9 = vweird.f32 %v5912_v35 }
 0x357   :  { %v2316_v50 = vadd.f32 1.0, %v2315_v41  ;;  %v2189_v56 = vmul.f32 %v6092_v62, %v5936_v27  ;;  %v2146_v34 = vand.u32 2147483647, %v5912_v35  ;;  %v2226_v57 = vsub.f32 0.008333334, %v2225_v24  ;;  %vm6106_vm7 = vmor %vm2142_vm9, %vm2143_vm6 }
 0x358   :  { %v2158_v1 = vadd.f32 %v5963_v15, %v2157_v30  ;;  %vm2160_vm11 = vweird.f32 %v5963_v15  ;;  %v2135_v12 = vadd.f32 %v2133_v29, %v2116_v25  ;;  %v2145_v28 = vsel %vm6106_vm7, %v5959_v58, %v2141_v26 }
 0x359   :  { %v2317_v48 = vmul.f32 %v2316_v50, %v2133_v29  ;;  %v2174_v4 = vmul.f32 %v5968_v18, %v2173_v32  ;;  %v2190_v39 = vsub.f32 1.0, %v2189_v56  ;;  %v2149_v49 = vor.u32 1.1754944e-38, %v2148_v60 }
 0x35a   :  { %v2165_v35 = vand.u32 2147483648, %v5915_v38  ;;  %vm2147_vm12 = vcmp.eq.f32.partialorder %v2146_v34, 8.507059e+37  ;;  %vm2159_vm10 = vweird.f32 %v5915_v38  ;;  %v2163_v36 = vand.u32 2147483647, %v5915_v38 }
 0x35b   :  { %v2334_v54 = vadd.f32 %v2332_v9, %v2317_v48  ;;  %v2227_v8 = vmul.f32 %v2226_v57, %v6083_v11  ;;  %v2150_v5 = vsel %vm2147_vm12, %v2149_v49, %v2145_v28  ;;  %vm2161_vm14 = vmor %vm2159_vm10, %vm2160_vm11  ;;  %vm2177_vm13 = vweird.f32 %v5968_v18 }
 0x35c   :  { %v2152_v58 = vadd.f32 %v2150_v5, %v2135_v12  ;;  %v2162_v3 = vsel %vm2161_vm14, %v5963_v15, %v2158_v1  ;;  %v2175_v53 = vadd.f32 %v5968_v18, %v2174_v4  ;;  %v2191_v31 = vmul.f32 %v6092_v62, %v2190_v39 }
 0x35d   :  { %v6095_v33 = vsub.f32 %v2116_v25, %v2334_v54  ;;  %v2180_v16 = vand.u32 2147483647, %v5921_v59  ;;  %v2182_v46 = vand.u32 2147483648, %v5921_v59  ;;  %vm2164_vm15 = vcmp.eq.f32.partialorder %v2163_v36, 8.507059e+37 }
 0x35e   :  { %vm2176_vm0 = vweird.f32 %v5921_v59  ;;  %v2228_v38 = vsub.f32 0.083333336, %v2227_v8  ;;  %vm2194_vm1 = vweird.f32 %v6092_v62  ;;  %v2192_v21 = vadd.f32 %v6092_v62, %v2191_v31 }
 0x35f   :  { %3359 = vrcp.f32 %v6095_v33  ;;  %vm6129_vm8 = vmor %vm2176_vm0, %vm2177_vm13  ;;  %v2223_v59 = vmul.f32 0.5, %v6065_v20  ;;  %vm2181_vm2 = vcmp.eq.f32.partialorder %v2180_v16, 8.507059e+37  ;;  %v2183_v19 = vor.u32 1.1754944e-38, %v2182_v46 }
 0x360   :  { %3361 = vlog2.f32 %v5886_v51  ;;  %v2166_v51 = vor.u32 1.1754944e-38, %v2165_v35  ;;  %v2179_v61 = vsel %vm6129_vm8, %v5968_v18, %v2175_v53  ;;  %vm2193_vm3 = vweird.f32 %v5936_v27 }
 0x361   :  { %v2199_v50 = vand.u32 2147483648, %v5936_v27  ;;  %v2197_v10 = vand.u32 2147483647, %v5936_v27  ;;  %v2229_v29 = vmul.f32 %v2228_v38, %v6083_v11  ;;  %3363 = vlog2.f32 %v5882_v45  ;;  %vm2195_vm4 = vmor %vm2193_vm3, %vm2194_vm1 }
 0x362   :  { %v2167_v41 = vsel %vm2164_vm15, %v2166_v51, %v2162_v3  ;;  %v2184_v0 = vsel %vm2181_vm2, %v2183_v19, %v2179_v61  ;;  %v2196_v20 = vsel %vm2195_vm4, %v6092_v62, %v2192_v21  ;;  %v2347_v25 = vand.u32 2147483648, %v6095_v33 }
 0x363   :  { %v2169_v15 = vadd.f32 %v2167_v41, %v2152_v58  ;;  %v2200_v44 = vor.u32 1.1754944e-38, %v2199_v50  ;;  %vm2198_vm5 = vcmp.eq.f32.partialorder %v2197_v10, 8.507059e+37  ;;  %vm2341_vm9 = vweird.f32 %v6095_v33 }
 0x364   :  { %v2345_v30 = vand.u32 2147483647, %v6095_v33  ;;  %v2348_v32 = vor.u32 1.1754944e-38, %v2347_v25 }
 0x365   :  { %v3360_v37 = vpop.eup %3359  ;;  %v2186_v18 = vadd.f32 %v2184_v0, %v2169_v15  ;;  %v2201_v47 = vsel %vm2198_vm5, %v2200_v44, %v2196_v20 }
 0x366   :  { %v2337_v55 = vmul.f32 %v3360_v37, %v6095_v33  ;;  %v3362_v63 = vpop.eup %3361  ;;  %vm2342_vm6 = vweird.f32 %v3360_v37  ;;  %vm2346_vm11 = vcmp.eq.f32.partialorder %v2345_v30, 8.507059e+37 }
 0x367   :  { %v2222_v40 = vmul.f32 0.6931472, %v3362_v63  ;;  %v2203_v27 = vadd.f32 %v2201_v47, %v2186_v18  ;;  %v3364_v23 = vpop.eup %3363  ;;  %vm2343_vm7 = vmor %vm2341_vm9, %vm2342_vm6 }
 0x368   :  { %v2338_v42 = vsub.f32 1.0, %v2337_v55  ;;  %v2101_v24 = vmul.f32 0.6931472, %v3364_v23 }
 0x369   :  { %v2224_v48 = vsub.f32 %v2222_v40, %v2223_v59 }
 0x36a   :  { %v2339_v9 = vmul.f32 %v3360_v37, %v2338_v42 }
 0x36b   :  { %v2230_v43 = vsub.f32 %v2224_v48, %v2229_v29 }
 0x36c   :  { %v2340_v11 = vadd.f32 %v3360_v37, %v2339_v9 }
 0x36d   :  { %v2231_v54 = vsub.f32 %v2230_v43, %v2203_v27 }
 0x36e   :  { %v2344_v26 = vsel %vm2343_vm7, %v3360_v37, %v2340_v11 }
 0x36f   :  { %v2232_v62 = vsub.f32 %v2101_v24, %v2231_v54  ;;  %v2349_v56 = vsel %vm2346_vm11, %v2348_v32, %v2344_v26 }
 0x371   :  { %v2233_v60 = vsub.f32 %v2232_v62, %v3525_v22 }
 0x373   :  { %v2350_v34 = vmul.f32 %v2349_v56, %v2233_v60 }
 0x375   :  { %v6152_v57 = vsub.f32 %v5882_v45, %v2350_v34 }
 0x377   :  { %v6155_v52 = vadd.f32 1.0, %v6152_v57  ;;  %3365 = vrcp.f32 %v6152_v57  ;;  %v6159_v1 = vadd.f32 6.0, %v6152_v57  ;;  %v6178_v39 = vadd.f32 2.0, %v6152_v57 }
 0x378   :  { %v6188_v36 = vadd.f32 3.0, %v6152_v57  ;;  %v2364_v5 = vand.u32 2147483647, %v6152_v57  ;;  %v2366_v58 = vand.u32 2147483648, %v6152_v57  ;;  %v6202_v51 = vadd.f32 4.0, %v6152_v57 }
 0x379   :  { %v6163_v33 = vmul.f32 %v6155_v52, %v6155_v52  ;;  %3367 = vrcp.f32 %v6155_v52  ;;  %v6169_v45 = vmul.f32 3.0, %v6155_v52  ;;  %v6175_v4 = vmul.f32 2.0, %v6155_v52 }
 0x37a   :  { %v2381_v31 = vand.u32 2147483647, %v6155_v52  ;;  %v6205_v16 = vadd.f32 5.0, %v6152_v57  ;;  %v2383_v38 = vand.u32 2147483648, %v6155_v52  ;;  %v6218_v61 = vmul.f32 %v6152_v57, %v6152_v57 }
 0x37b   :  { %v2502_v12 = vmul.f32 7.0, %v6163_v33  ;;  %3369 = vrcp.f32 %v6163_v33  ;;  %v2528_v19 = vand.u32 2147483647, %v6163_v33  ;;  %vm2524_vm14 = vweird.f32 %v6163_v33 }
 0x37c   :  { %3371 = vrcp.f32 %v6159_v1  ;;  %v2530_v43 = vand.u32 2147483648, %v6163_v33  ;;  %vm2377_vm3 = vweird.f32 %v6155_v52  ;;  %v2547_v34 = vand.u32 2147483648, %v6169_v45 }
 0x37d   :  { %v6172_v28 = vpop.eup %3365  ;;  %3373 = vrcp.f32 %v2502_v12  ;;  %v2512_v59 = vand.u32 2147483647, %v2502_v12  ;;  %v2514_v40 = vand.u32 2147483648, %v2502_v12  ;;  %vm2508_vm13 = vweird.f32 %v2502_v12 }
 0x37e   :  { %3375 = vrcp.f32 %v6169_v45  ;;  %v6185_v35 = vmul.f32 %v6172_v28, %v6152_v57  ;;  %vm6243_vm1 = vcmp.eq.f32.partialorder %v2528_v19, 8.507059e+37  ;;  %v2531_v60 = vor.u32 1.1754944e-38, %v2530_v43 }
 0x37f   :  { %v6181_v49 = vpop.eup %3367  ;;  %3377 = vrcp.f32 %v6175_v4  ;;  %vm2513_vm8 = vcmp.eq.f32.partialorder %v2512_v59, 8.507059e+37  ;;  %v2515_v25 = vor.u32 1.1754944e-38, %v2514_v40  ;;  %vm2541_vm4 = vweird.f32 %v6169_v45 }
 0x380   :  { %3379 = vrcp.f32 %v6178_v39  ;;  %v2357_v46 = vsub.f32 1.0, %v6185_v35  ;;  %v2373_v41 = vmul.f32 %v6181_v49, %v6155_v52  ;;  %v2548_v19 = vor.u32 1.1754944e-38, %v2547_v34 }
 0x381   :  { %v6190_v8 = vpop.eup %3369  ;;  %3381 = vrcp.f32 %v6188_v36  ;;  %vm2558_vm9 = vweird.f32 %v6175_v4  ;;  %vm6279_vm7 = vcmp.eq.f32.partialorder %v2381_v31, 8.507059e+37  ;;  %v2468_v43 = vand.u32 2147483648, %v6159_v1 }
 0x382   :  { %v6193_v37 = vpop.eup %3371  ;;  %v2520_v3 = vmul.f32 %v6190_v8, %v6163_v33  ;;  %vm2525_vm12 = vweird.f32 %v6190_v8  ;;  %3383 = vrcp.f32 %v6218_v61  ;;  %v2374_v48 = vsub.f32 1.0, %v2373_v41 }
 0x383   :  { %v3374_v53 = vpop.eup %3373  ;;  %v2458_v2 = vmul.f32 %v6193_v37, %v6159_v1  ;;  %vm6237_vm15 = vmor %vm2524_vm14, %vm2525_vm12  ;;  %3385 = vrcp.f32 %v6202_v51  ;;  %vm2360_vm12 = vweird.f32 %v6152_v57  ;;  %v2384_v34 = vor.u32 1.1754944e-38, %v2383_v38 }
 0x384   :  { %v2504_v55 = vmul.f32 %v3374_v53, %v2502_v12  ;;  %v6210_v63 = vpop.eup %3375  ;;  %v2521_v15 = vsub.f32 1.0, %v2520_v3  ;;  %vm2509_vm10 = vweird.f32 %v3374_v53  ;;  %v2545_v3 = vand.u32 2147483647, %v6169_v45 }
 0x385   :  { %v2537_v50 = vmul.f32 %v6210_v63, %v6169_v45  ;;  %v6223_v10 = vpop.eup %3377  ;;  %v2459_v11 = vsub.f32 1.0, %v2458_v2  ;;  %vm2510_vm0 = vmor %vm2508_vm13, %vm2509_vm10  ;;  %vm2542_vm2 = vweird.f32 %v6210_v63  ;;  %vm2378_vm10 = vweird.f32 %v6181_v49 }
 0x386   :  { %v2505_v21 = vsub.f32 1.0, %v2504_v55  ;;  %v2522_v29 = vmul.f32 %v6190_v8, %v2521_v15  ;;  %v2554_v18 = vmul.f32 %v6223_v10, %v6175_v4  ;;  %v6230_v20 = vpop.eup %3379  ;;  %vm6265_vm5 = vmor %vm2541_vm4, %vm2542_vm2  ;;  %vm2559_vm6 = vweird.f32 %v6223_v10 }
 0x387   :  { %v2538_v0 = vsub.f32 1.0, %v2537_v50  ;;  %v6235_v9 = vpop.eup %3381  ;;  %v2460_v55 = vmul.f32 %v6193_v37, %v2459_v11  ;;  %v2564_v50 = vand.u32 2147483648, %v6175_v4  ;;  %vm2546_vm11 = vcmp.eq.f32.partialorder %v2545_v3, 8.507059e+37  ;;  %vm6293_vm14 = vmor %vm2558_vm9, %vm2559_vm6 }
 0x388   :  { %v2506_v42 = vmul.f32 %v3374_v53, %v2505_v21  ;;  %v2523_v44 = vadd.f32 %v6190_v8, %v2522_v29  ;;  %v2555_v54 = vsub.f32 1.0, %v2554_v18  ;;  %v6252_v32 = vpop.eup %3383  ;;  %vm2463_vm13 = vweird.f32 %v6193_v37 }
 0x389   :  { %v2539_v23 = vmul.f32 %v6210_v63, %v2538_v0  ;;  %v2358_v0 = vmul.f32 %v6172_v28, %v2357_v46  ;;  %vm2361_vm4 = vweird.f32 %v6172_v28  ;;  %3387 = vrcp.f32 %v6205_v16 }
 0x38a   :  { %v2507_v47 = vadd.f32 %v3374_v53, %v2506_v42  ;;  %v2527_v62 = vsel %vm6237_vm15, %v6190_v8, %v2523_v44  ;;  %v2556_v33 = vmul.f32 %v6223_v10, %v2555_v54  ;;  %v2572_v8 = vmul.f32 %v6252_v32, %v6218_v61  ;;  %vm2362_vm9 = vmor %vm2360_vm12, %vm2361_vm4 }
 0x38b   :  { %v2540_v26 = vadd.f32 %v6210_v63, %v2539_v23  ;;  %v2532_v41 = vsel %vm6243_vm1, %v2531_v60, %v2527_v62  ;;  %vm2462_vm15 = vweird.f32 %v6159_v1  ;;  %v2466_v44 = vand.u32 2147483647, %v6159_v1 }
 0x38c   :  { %v2511_v30 = vsel %vm2510_vm0, %v3374_v53, %v2507_v47  ;;  %v2375_v53 = vmul.f32 %v6181_v49, %v2374_v48  ;;  %v2557_v21 = vadd.f32 %v6223_v10, %v2556_v33  ;;  %v2573_v59 = vsub.f32 1.0, %v2572_v8  ;;  %vm6307_vm0 = vmor %vm2377_vm3, %vm2378_vm10 }
 0x38d   :  { %v2516_v56 = vsel %vm2513_vm8, %v2515_v25, %v2511_v30  ;;  %v2544_v45 = vsel %vm6265_vm5, %v6210_v63, %v2540_v26  ;;  %v2562_v63 = vand.u32 2147483647, %v6175_v4  ;;  %v2461_v4 = vadd.f32 %v6193_v37, %v2460_v55  ;;  %vm6322_vm2 = vmor %vm2462_vm15, %vm2463_vm13 }
 0x38e   :  { %v2518_v12 = vsub.f32 0.2, %v2516_v56  ;;  %v2574_v42 = vmul.f32 %v6252_v32, %v2573_v59  ;;  %v2376_v18 = vadd.f32 %v6181_v49, %v2375_v53  ;;  %v2549_v31 = vsel %vm2546_vm11, %v2548_v19, %v2544_v45 }
 0x38f   :  { %v2561_v46 = vsel %vm6293_vm14, %v6223_v10, %v2557_v21  ;;  %v2565_v47 = vor.u32 1.1754944e-38, %v2564_v50  ;;  %vm2563_vm8 = vcmp.eq.f32.partialorder %v2562_v63, 8.507059e+37  ;;  %vm2577_vm1 = vweird.f32 %v6252_v32  ;;  %v6313_v10 = vpop.eup %3385 }
 0x390   :  { %v2533_v15 = vmul.f32 %v2532_v41, %v2518_v12  ;;  %v2575_v54 = vadd.f32 %v6252_v32, %v2574_v42  ;;  %v2380_v11 = vsel %vm6307_vm0, %v6181_v49, %v2376_v18  ;;  %v2390_v25 = vmul.f32 %v6230_v20, %v6178_v39  ;;  %v6357_v21 = vpop.eup %3387 }
 0x391   :  { %v2566_v30 = vsel %vm2563_vm8, %v2565_v47, %v2561_v46  ;;  %v2582_v62 = vand.u32 2147483648, %v6218_v61  ;;  %v2465_v26 = vsel %vm6322_vm2, %v6193_v37, %v2461_v4  ;;  %vm2576_vm3 = vweird.f32 %v6218_v61 }
 0x392   :  { %v2534_v29 = vsub.f32 1.0, %v2533_v15  ;;  %v2580_v49 = vand.u32 2147483647, %v6218_v61  ;;  %v2359_v60 = vadd.f32 %v6172_v28, %v2358_v0  ;;  %v2469_v33 = vor.u32 1.1754944e-38, %v2468_v43  ;;  %vm2578_vm5 = vmor %vm2576_vm3, %vm2577_vm1 }
 0x393   :  { %vm2467_vm6 = vcmp.eq.f32.partialorder %v2466_v44, 8.507059e+37  ;;  %v2579_v12 = vsel %vm2578_vm5, %v6252_v32, %v2575_v54  ;;  %v2385_v61 = vsel %vm6279_vm7, %v2384_v34, %v2380_v11  ;;  %v2407_v3 = vmul.f32 %v6235_v9, %v6188_v36 }
 0x394   :  { %v2550_v35 = vmul.f32 %v2549_v31, %v2534_v29  ;;  %v6344_v8 = vsel %vm2467_vm6, %v2469_v33, %v2465_v26  ;;  %v2583_v52 = vor.u32 1.1754944e-38, %v2582_v62  ;;  %v2391_v38 = vsub.f32 1.0, %v2390_v25 }
 0x395   :  { %vm2581_vm11 = vcmp.eq.f32.partialorder %v2580_v49, 8.507059e+37  ;;  %v2363_v55 = vsel %vm2362_vm9, %v6172_v28, %v2359_v60  ;;  %v2367_v32 = vor.u32 1.1754944e-38, %v2366_v58  ;;  %v6353_v2 = vmul.f32 %v6344_v8, %v6344_v8 }
 0x396   :  { %v2551_v23 = vadd.f32 1.0, %v2550_v35  ;;  %v2584_v41 = vsel %vm2581_vm11, %v2583_v52, %v2579_v12  ;;  %vm2365_vm7 = vcmp.eq.f32.partialorder %v2364_v5, 8.507059e+37  ;;  %v2408_v45 = vsub.f32 1.0, %v2407_v3 }
 0x397   :  { %v2368_v59 = vsel %vm2365_vm7, %v2367_v32, %v2363_v55  ;;  %v2392_v19 = vmul.f32 %v6230_v20, %v2391_v38  ;;  %v2424_v28 = vmul.f32 %v6313_v10, %v6202_v51  ;;  %v2477_v58 = vmul.f32 0.003968254, %v6353_v2 }
 0x398   :  { %v2567_v56 = vmul.f32 %v2566_v30, %v2551_v23  ;;  %v2409_v40 = vmul.f32 %v6235_v9, %v2408_v45  ;;  %vm2395_vm12 = vweird.f32 %v6230_v20  ;;  %v2441_v63 = vmul.f32 %v6357_v21, %v6205_v16 }
 0x399   :  { %v2393_v29 = vadd.f32 %v6230_v20, %v2392_v19  ;;  %v2425_v5 = vsub.f32 1.0, %v2424_v28  ;;  %v2400_v42 = vand.u32 2147483648, %v6178_v39  ;;  %vm2394_vm10 = vweird.f32 %v6178_v39 }
 0x39a   :  { %v2568_v37 = vadd.f32 1.0, %v2567_v56  ;;  %v2398_v0 = vand.u32 2147483647, %v6178_v39  ;;  %v2478_v18 = vsub.f32 0.008333334, %v2477_v58  ;;  %vm6374_vm14 = vmor %vm2394_vm10, %vm2395_vm12  ;;  %v2410_v48 = vadd.f32 %v6235_v9, %v2409_v40 }
 0x39b   :  { %vm2412_vm13 = vweird.f32 %v6235_v9  ;;  %v2387_v4 = vadd.f32 %v2385_v61, %v2368_v59  ;;  %v2397_v35 = vsel %vm6374_vm14, %v6230_v20, %v2393_v29  ;;  %v2426_v46 = vmul.f32 %v6313_v10, %v2425_v5 }
 0x39c   :  { %v2569_v53 = vmul.f32 %v2568_v37, %v2385_v61  ;;  %v2442_v44 = vsub.f32 1.0, %v2441_v63  ;;  %v2401_v43 = vor.u32 1.1754944e-38, %v2400_v42  ;;  %v2417_v39 = vand.u32 2147483648, %v6188_v36 }
 0x39d   :  { %vm2399_vm15 = vcmp.eq.f32.partialorder %v2398_v0, 8.507059e+37  ;;  %vm2411_vm0 = vweird.f32 %v6188_v36  ;;  %v2415_v47 = vand.u32 2147483647, %v6188_v36  ;;  %v2479_v27 = vmul.f32 %v2478_v18, %v6353_v2 }
 0x39e   :  { %v2586_v15 = vadd.f32 %v2584_v41, %v2569_v53  ;;  %v2402_v54 = vsel %vm2399_vm15, %v2401_v43, %v2397_v35  ;;  %vm2413_vm8 = vmor %vm2411_vm0, %vm2412_vm13  ;;  %vm2429_vm1 = vweird.f32 %v6313_v10  ;;  %v2427_v25 = vadd.f32 %v6313_v10, %v2426_v46 }
 0x39f   :  { %v2404_v20 = vadd.f32 %v2402_v54, %v2387_v4  ;;  %v2414_v11 = vsel %vm2413_vm8, %v6235_v9, %v2410_v48  ;;  %v2443_v24 = vmul.f32 %v6357_v21, %v2442_v44  ;;  %v2432_v30 = vand.u32 2147483647, %v6202_v51 }
 0x3a0   :  { %v6362_v50 = vsub.f32 %v2368_v59, %v2586_v15  ;;  %v2434_v62 = vand.u32 2147483648, %v6202_v51  ;;  %vm2416_vm2 = vcmp.eq.f32.partialorder %v2415_v47, 8.507059e+37  ;;  %vm2428_vm3 = vweird.f32 %v6202_v51 }
 0x3a1   :  { %v2480_v36 = vsub.f32 0.083333336, %v2479_v27  ;;  %vm6397_vm4 = vmor %vm2428_vm3, %vm2429_vm1  ;;  %vm2446_vm5 = vweird.f32 %v6357_v21  ;;  %v2444_v33 = vadd.f32 %v6357_v21, %v2443_v24  ;;  %v2475_v51 = vmul.f32 0.5, %v6344_v8 }
 0x3a2   :  { %3389 = vrcp.f32 %v6362_v50  ;;  %v2431_v34 = vsel %vm6397_vm4, %v6313_v10, %v2427_v25  ;;  %vm2433_vm6 = vcmp.eq.f32.partialorder %v2432_v30, 8.507059e+37  ;;  %v2435_v37 = vor.u32 1.1754944e-38, %v2434_v62 }
 0x3a3   :  { %3391 = vlog2.f32 %v6159_v1  ;;  %v2418_v1 = vor.u32 1.1754944e-38, %v2417_v39  ;;  %vm2445_vm9 = vweird.f32 %v6205_v16  ;;  %v2451_v12 = vand.u32 2147483648, %v6205_v16 }
 0x3a4   :  { %v2449_v61 = vand.u32 2147483647, %v6205_v16  ;;  %v2481_v52 = vmul.f32 %v2480_v36, %v6353_v2  ;;  %3393 = vlog2.f32 %v6152_v57  ;;  %v2436_v53 = vsel %vm2433_vm6, %v2435_v37, %v2431_v34  ;;  %vm2447_vm11 = vmor %vm2445_vm9, %vm2446_vm5 }
 0x3a5   :  { %v2419_v49 = vsel %vm2416_vm2, %v2418_v1, %v2414_v11  ;;  %v2448_v8 = vsel %vm2447_vm11, %v6357_v21, %v2444_v33  ;;  %v2452_v41 = vor.u32 1.1754944e-38, %v2451_v12  ;;  %v2599_v28 = vand.u32 2147483648, %v6362_v50 }
 0x3a6   :  { %v2421_v9 = vadd.f32 %v2419_v49, %v2404_v20  ;;  %vm2450_vm7 = vcmp.eq.f32.partialorder %v2449_v61, 8.507059e+37  ;;  %vm2593_vm10 = vweird.f32 %v6362_v50  ;;  %v2597_v40 = vand.u32 2147483647, %v6362_v50 }
 0x3a7   :  { %v2453_v45 = vsel %vm2450_vm7, %v2452_v41, %v2448_v8  ;;  %v2600_v5 = vor.u32 1.1754944e-38, %v2599_v28 }
 0x3a8   :  { %v3390_v23 = vpop.eup %3389  ;;  %v2438_v10 = vadd.f32 %v2436_v53, %v2421_v9  ;;  %vm2598_vm13 = vcmp.eq.f32.partialorder %v2597_v40, 8.507059e+37 }
 0x3a9   :  { %v2589_v26 = vmul.f32 %v3390_v23, %v6362_v50  ;;  %v3392_v56 = vpop.eup %3391  ;;  %vm2594_vm12 = vweird.f32 %v3390_v23 }
 0x3aa   :  { %v2474_v3 = vmul.f32 0.6931472, %v3392_v56  ;;  %v2455_v16 = vadd.f32 %v2453_v45, %v2438_v10  ;;  %v3394_v59 = vpop.eup %3393  ;;  %vm2595_vm14 = vmor %vm2593_vm10, %vm2594_vm12 }
 0x3ab   :  { %v2590_v38 = vsub.f32 1.0, %v2589_v26  ;;  %v2353_v58 = vmul.f32 0.6931472, %v3394_v59 }
 0x3ac   :  { %v2476_v55 = vsub.f32 %v2474_v3, %v2475_v51 }
 0x3ad   :  { %v2591_v15 = vmul.f32 %v3390_v23, %v2590_v38 }
 0x3ae   :  { %v2482_v32 = vsub.f32 %v2476_v55, %v2481_v52 }
 0x3af   :  { %v2592_v2 = vadd.f32 %v3390_v23, %v2591_v15 }
 0x3b0   :  { %v2483_v19 = vsub.f32 %v2482_v32, %v2455_v16 }
 0x3b1   :  { %v2596_v29 = vsel %vm2595_vm14, %v3390_v23, %v2592_v2 }
 0x3b2   :  { %v2484_v21 = vsub.f32 %v2353_v58, %v2483_v19  ;;  %v2601_v63 = vsel %vm2598_vm13, %v2600_v5, %v2596_v29 }
 0x3b4   :  { %v2485_v42 = vsub.f32 %v2484_v21, %v3525_v22 }
 0x3b6   :  { %v2602_v0 = vmul.f32 %v2601_v63, %v2485_v42 }
 0x3b8   :  { %v2603_v18 = vsub.f32 %v6152_v57, %v2602_v0 }
 0x3ba   :  { %v2604_v31 = vmax.f32 %v2603_v18, 1e-07 }
 0x3bc   :  { %v6420_v48 = vmin.f32 %v2604_v31, 18.0 }
 0x3be   :  { %v6423_v4 = vadd.f32 1.0, %v6420_v48  ;;  %v6426_v35 = vadd.f32 8.0, %v6420_v48  ;;  %v6429_v50 = vadd.f32 2.0, %v6420_v48  ;;  %v6436_v22 = vadd.f32 3.0, %v6420_v48 }
 0x3bf   :  { %v6444_v43 = vadd.f32 4.0, %v6420_v48  ;;  %v6451_v23 = vadd.f32 5.0, %v6420_v48  ;;  %v6476_v60 = vadd.f32 6.0, %v6420_v48  ;;  %v6483_v33 = vadd.f32 7.0, %v6420_v48 }
 0x3c0   :  { %v6432_v46 = vadd.f32 -0.5, %v6426_v35  ;;  %3395 = vrcp.f32 %v6423_v4  ;;  %v2633_v1 = vand.u32 2147483648, %v6423_v4  ;;  %v2650_v36 = vand.u32 2147483648, %v6429_v50 }
 0x3c1   :  { %3397 = vrcp.f32 %v6429_v50  ;;  %vm2627_vm0 = vweird.f32 %v6423_v4  ;;  %v2631_v34 = vand.u32 2147483647, %v6423_v4  ;;  %v2648_v12 = vand.u32 2147483647, %v6429_v50 }
 0x3c2   :  { %v6439_v57 = vand.u32 2147483647, %v6432_v46  ;;  %3399 = vrcp.f32 %v6436_v22  ;;  %v2634_v51 = vor.u32 1.1754944e-38, %v2633_v1  ;;  %v6491_v52 = vor.u32 1.1754944e-38, %v2650_v36 }
 0x3c3   :  { %3401 = vrcp.f32 %v6444_v43  ;;  %vm6501_vm8 = vcmp.eq.f32.partialorder %v2631_v34, 8.507059e+37  ;;  %vm2644_vm1 = vweird.f32 %v6429_v50  ;;  %v2665_v15 = vand.u32 2147483647, %v6436_v22 }
 0x3c4   :  { %v2986_v44 = vand.u32 8388607, %v6439_v57  ;;  %3403 = vrcp.f32 %v6451_v23  ;;  %v2982_v53 = vand.u32 2139095040, %v6439_v57  ;;  %v2667_v45 = vand.u32 2147483648, %v6436_v22 }
 0x3c5   :  { %3405 = vrcp.f32 %v6476_v60  ;;  %v2682_v16 = vand.u32 2147483647, %v6444_v43  ;;  %v2684_v59 = vand.u32 2147483648, %v6444_v43  ;;  %vm2661_vm3 = vweird.f32 %v6436_v22 }
 0x3c6   :  { %v2987_v39 = vor.u32 8388608, %v2986_v44  ;;  %v6447_v47 = vpop.eup %3395  ;;  %v2983_v29 = vshrl.u32 %v2982_v53, 23  ;;  %3407 = vrcp.f32 %v6483_v33  ;;  %vm6521_vm5 = vcmp.eq.f32.partialorder %v2648_v12, 8.507059e+37 }
 0x3c7   :  { %v6453_v54 = vpop.eup %3397  ;;  %v2623_v20 = vmul.f32 %v6447_v47, %v6423_v4  ;;  %vm2628_vm2 = vweird.f32 %v6447_v47  ;;  %v2668_v18 = vor.u32 1.1754944e-38, %v2667_v45  ;;  %vm2678_vm6 = vweird.f32 %v6444_v43 }
 0x3c8   :  { %v2989_v27 = vand.u32 8388607, %v2987_v39  ;;  %v6459_v25 = vpop.eup %3399  ;;  %v2640_v30 = vmul.f32 %v6453_v54, %v6429_v50  ;;  %vm2645_vm4 = vweird.f32 %v6453_v54  ;;  %v6526_v31 = vor.u32 1.1754944e-38, %v2684_v59  ;;  %vm6535_vm9 = vmor %vm2627_vm0, %vm2628_vm2 }
 0x3c9   :  { %v2624_v62 = vsub.f32 1.0, %v2623_v20  ;;  %v6471_v56 = vpop.eup %3401  ;;  %v2657_v49 = vmul.f32 %v6459_v25, %v6436_v22  ;;  %v2701_v44 = vand.u32 2147483648, %v6451_v23  ;;  %vm2662_vm11 = vweird.f32 %v6459_v25  ;;  %vm6569_vm12 = vmor %vm2644_vm1, %vm2645_vm4 }
 0x3ca   :  { %v6457_v11 = vor.u32 1065353216, %v2989_v27  ;;  %v2641_v37 = vsub.f32 1.0, %v2640_v30  ;;  %v2674_v38 = vmul.f32 %v6471_v56, %v6444_v43  ;;  %v6496_v10 = vpop.eup %3403  ;;  %vm6541_vm7 = vcmp.eq.f32.partialorder %v2665_v15, 8.507059e+37  ;;  %vm6586_vm0 = vmor %vm2661_vm3, %vm2662_vm11 }
 0x3cb   :  { %v2625_v3 = vmul.f32 %v6447_v47, %v2624_v62  ;;  %v2658_v8 = vsub.f32 1.0, %v2657_v49  ;;  %v2691_v21 = vmul.f32 %v6496_v10, %v6451_v23  ;;  %v6529_v39 = vpop.eup %3405  ;;  %v3079_v49 = vadd.s32 4294967169, %v2983_v29 }
 0x3cc   :  { %vm2991_vm15 = vcmp.ge.f32.partialorder %v6457_v11, 1.4142135  ;;  %v2992_v24 = vmul.f32 0.5, %v6457_v11  ;;  %v2642_v19 = vmul.f32 %v6453_v54, %v2641_v37  ;;  %v2675_v40 = vsub.f32 1.0, %v2674_v38 }
 0x3cd   :  { %v2626_v58 = vadd.f32 %v6447_v47, %v2625_v3  ;;  %v2659_v5 = vmul.f32 %v6459_v25, %v2658_v8  ;;  %v6551_v37 = vadd.f32 0.5, %v6420_v48  ;;  %v2699_v38 = vand.u32 2147483647, %v6451_v23 }
 0x3ce   :  { %v2993_v26 = vsel %vm2991_vm15, %v2992_v24, %v6457_v11  ;;  %v2643_v20 = vadd.f32 %v6453_v54, %v2642_v19  ;;  %v2676_v36 = vmul.f32 %v6471_v56, %v2675_v40  ;;  %v6556_v53 = vor.u32 1.1754944e-38, %v2701_v44 }
 0x3cf   :  { %v6478_v9 = vadd.f32 -1.0, %v2993_v26  ;;  %v2630_v62 = vsel %vm6535_vm9, %v6447_v47, %v2626_v58  ;;  %v2692_v26 = vsub.f32 1.0, %v2691_v21  ;;  %v2660_v34 = vadd.f32 %v6459_v25, %v2659_v5 }
 0x3d0   :  { %v2708_v47 = vmul.f32 %v6529_v39, %v6476_v60  ;;  %v2716_v8 = vand.u32 2147483647, %v6476_v60  ;;  %vm2679_vm10 = vweird.f32 %v6471_v56  ;;  %vm6574_vm14 = vcmp.eq.f32.partialorder %v2682_v16, 8.507059e+37 }
 0x3d1   :  { %v6488_v61 = vmul.f32 %v6478_v9, %v6478_v9  ;;  %vm2695_vm13 = vweird.f32 %v6451_v23  ;;  %v2677_v16 = vadd.f32 %v6471_v56, %v2676_v36  ;;  %v2664_v58 = vsel %vm6586_vm0, %v6459_v25, %v2660_v34 }
 0x3d2   :  { %v2718_v40 = vand.u32 2147483648, %v6476_v60  ;;  %v6598_v21 = vand.u32 2147483647, %v6551_v37  ;;  %v2709_v5 = vsub.f32 1.0, %v2708_v47  ;;  %3409 = vrcp.f32 %v6426_v35 }
 0x3d3   :  { %v2998_v55 = vmul.f32 0.12621109, %v6488_v61  ;;  %v3000_v41 = vmul.f32 -0.20706727, %v6488_v61  ;;  %vm2696_vm1 = vweird.f32 %v6496_v10  ;;  %v2669_v27 = vsel %vm6541_vm7, %v2668_v18, %v2664_v58 }
 0x3d4   :  { %vm2712_vm2 = vweird.f32 %v6476_v60  ;;  %v3040_v36 = vfloor.f32 %v6598_v21  ;;  %vm6628_vm3 = vcmp.eq.f32.partialorder %v2699_v38, 8.507059e+37  ;;  %vm3032_vm4 = vcmp.lt.s32.totalorder %v6551_v37, 0 }
 0x3d5   :  { %v2999_v2 = vadd.f32 0.21545328, %v2998_v55  ;;  %v3001_v28 = vadd.f32 -0.23896284, %v3000_v41  ;;  %v6561_v55 = vpop.eup %3407  ;;  %v2635_v41 = vsel %vm6501_vm8, %v2634_v51, %v2630_v62  ;;  %v2647_v51 = vsel %vm6569_vm12, %v6453_v54, %v2643_v20  ;;  %vm6610_vm8 = vmor %vm2678_vm6, %vm2679_vm10 }
 0x3d6   :  { %v2636_v29 = vmul.f32 676.5204, %v2635_v41  ;;  %v3034_v62 = vfloor.f32 %v6551_v37  ;;  %vm6646_vm6 = vmor %vm2695_vm13, %vm2696_vm1  ;;  %v2733_v41 = vand.u32 2147483647, %v6483_v33  ;;  %vm3020_vm9 = vweird.f32 %v6439_v57 }
 0x3d7   :  { %v3002_v63 = vmul.f32 %v2999_v2, %v6488_v61  ;;  %v3004_v42 = vmul.f32 %v3001_v28, %v6488_v61  ;;  %v2693_v2 = vmul.f32 %v6496_v10, %v2692_v26  ;;  %v2994_v28 = vadd.s32 1, %v3079_v49 }
 0x3d8   :  { %v2637_v24 = vadd.f32 1.0, %v2636_v29  ;;  %v6637_v34 = vpop.eup %3409  ;;  %vm3019_vm11 = vcmp.lt.f32.partialorder %v6439_v57, 0.0  ;;  %3411 = vrcp.f32 %v6420_v48  ;;  %vm3018_vm7 = vcmp.eq.f32.partialorder %v6439_v57, 0.0 }
 0x3d9   :  { %v3003_v1 = vadd.f32 0.28795174, %v3002_v63  ;;  %v3005_v30 = vadd.f32 -0.3607037, %v3004_v42  ;;  %v2725_v63 = vmul.f32 %v6561_v55, %v6483_v33  ;;  %v2652_v42 = vsel %vm6521_vm5, %v6491_v52, %v2647_v51 }
 0x3da   :  { %v2681_v52 = vsel %vm6610_vm8, %v6471_v56, %v2677_v16  ;;  %v2694_v0 = vadd.f32 %v6496_v10, %v2693_v2  ;;  %v2995_v20 = vsel %vm2991_vm15, %v2994_v28, %v3079_v49  ;;  %v2710_v56 = vmul.f32 %v6529_v39, %v2709_v5 }
 0x3db   :  { %v3006_v12 = vmul.f32 %v3003_v1, %v6488_v61  ;;  %v3008_v3 = vmul.f32 %v3005_v30, %v6488_v61  ;;  %v3033_v30 = vceil.f32 %v6551_v37  ;;  %v2726_v26 = vsub.f32 1.0, %v2725_v63 }
 0x3dc   :  { %vm2713_vm15 = vweird.f32 %v6529_v39  ;;  %vm2729_vm5 = vweird.f32 %v6483_v33  ;;  %v3015_v49 = vcvt.s32.f32 %v2995_v20  ;;  %v2686_v38 = vsel %vm6574_vm14, %v6526_v31, %v2681_v52 }
 0x3dd   :  { %v3007_v59 = vadd.f32 0.48090908, %v3006_v12  ;;  %v3009_v19 = vadd.f32 -0.72134733, %v3008_v3  ;;  %v2653_v12 = vmul.f32 -1259.1392, %v2652_v42  ;;  %v2711_v31 = vadd.f32 %v6529_v39, %v2710_v56  ;;  %vm6671_vm0 = vmor %vm2712_vm2, %vm2713_vm15 }
 0x3de   :  { %v2670_v3 = vmul.f32 771.3234, %v2669_v27  ;;  %v2727_v45 = vmul.f32 %v6561_v55, %v2726_v26  ;;  %v2742_v32 = vmul.f32 %v6637_v34, %v6426_v35  ;;  %vm3028_vm12 = vcmp.eq.f32.partialorder %v6598_v21, 2139095040  ;;  %v6701_v52 = vpop.eup %3411 }
 0x3df   :  { %v3010_v54 = vmul.f32 %v3007_v59, %v6488_v61  ;;  %v3012_v44 = vmul.f32 %v6478_v9, %v3009_v19  ;;  %v3035_v59 = vsel %vm3032_vm4, %v3033_v30, %v3034_v62  ;;  %v3041_v19 = vcvt.f32.s32 %v3040_v36 }
 0x3e0   :  { %v2654_v51 = vadd.f32 %v2653_v12, %v2637_v24  ;;  %vm3036_vm10 = vcmp.ne.f32.partialorder %v6551_v37, %v3035_v59  ;;  %vm2730_vm14 = vweird.f32 %v6561_v55  ;;  %vm3017_vm13 = vcmp.eq.f32.partialorder %v6439_v57, 1.0 }
 0x3e1   :  { %v3011_v61 = vadd.f32 1.442695, %v3010_v54  ;;  %v3042_v28 = vand.u32 1, %v3041_v19  ;;  %v2687_v54 = vmul.f32 -176.61504, %v2686_v38  ;;  %vm3048_vm8 = vcmp.eq.f32.partialorder %v6432_v46, 0  ;;  %vm6685_vm1 = vmor %vm3036_vm10, %vm3028_vm12 }
 0x3e2   :  { %v2671_v58 = vadd.f32 %v2670_v3, %v2654_v51  ;;  %v2715_v42 = vsel %vm6671_vm0, %v6529_v39, %v2711_v31  ;;  %v2743_v25 = vsub.f32 1.0, %v2742_v32  ;;  %v2728_v27 = vadd.f32 %v6561_v55, %v2727_v45  ;;  %vm6694_vm2 = vmor %vm2729_vm5, %vm2730_vm14 }
 0x3e3   :  { %v3013_v1 = vadd.f32 %v3012_v44, %v3011_v61  ;;  %v2735_v39 = vand.u32 2147483648, %v6483_v33  ;;  %vm3051_vm4 = vcmp.gt.f32.partialorder %v6439_v57, 1065353216  ;;  %vm3043_vm15 = vcmp.eq.s32.totalorder %v3042_v28, 1 }
 0x3e4   :  { %v2744_v36 = vmul.f32 %v6637_v34, %v2743_v25  ;;  %vm3047_vm14 = vcmp.lt.f32.partialorder %v6432_v46, 0  ;;  %v2767_v26 = vmul.f32 %v6701_v52, %v6420_v48  ;;  %v2761_v3 = vsub.f32 0.0, %v6432_v46 }
 0x3e5   :  { %v3014_v11 = vmul.f32 %v6478_v9, %v3013_v1  ;;  %v2698_v9 = vsel %vm6646_vm6, %v6496_v10, %v2694_v0  ;;  %v2719_v0 = vor.u32 1.1754944e-38, %v2718_v40  ;;  %v2688_v1 = vadd.f32 %v2687_v54, %v2671_v58 }
 0x3e6   :  { %v2703_v63 = vsel %vm6628_vm3, %v6556_v53, %v2698_v9  ;;  %vm3031_vm3 = vcmp.lt.f32.partialorder %v6551_v37, 0  ;;  %vm2717_vm6 = vcmp.eq.f32.partialorder %v2716_v8, 8.507059e+37  ;;  %v2732_v8 = vsel %vm6694_vm2, %v6561_v55, %v2728_v27 }
 0x3e7   :  { %v3016_v15 = vadd.f32 %v3015_v49, %v3014_v11  ;;  %vm6709_vm5 = vmand %vm3031_vm3, %vm3048_vm8  ;;  %v2704_v30 = vmul.f32 12.507343, %v2703_v63  ;;  %v2720_v62 = vsel %vm2717_vm6, %v2719_v0, %v2715_v42  ;;  %v2736_v18 = vor.u32 1.1754944e-38, %v2735_v39 }
 0x3e8   :  { %v2752_v11 = vand.u32 2147483648, %v6426_v35  ;;  %v3494_v55 = vmov 2139095040   ;;  %v2721_v47 = vmul.f32 -0.1385711, %v2720_v62  ;;  %vm2746_vm0 = vweird.f32 %v6426_v35 }
 0x3e9   :  { %v3021_v16 = vsel %vm3020_vm9, %v6439_v57, %v3016_v15  ;;  %vm3044_vm9 = vmneg %vm6685_vm1  ;;  %v3067_v12 = vsel %vm3031_vm3, 0, %v3494_v55  ;;  %v2705_v38 = vadd.f32 %v2704_v30, %v2688_v1  ;;  %vm3038_vm2 = vcmp.lt.f32.partialorder %v6598_v21, 1266679808 }
 0x3ea   :  { %v3022_v10 = vsel %vm3019_vm11, nan, %v3021_v16  ;;  %vm6717_vm11 = vcmp.eq.f32.partialorder %v2733_v41, 8.507059e+37  ;;  %vm6731_vm10 = vmand %vm3043_vm15, %vm3044_vm9  ;;  %v2745_v15 = vadd.f32 %v6637_v34, %v2744_v36  ;;  %v2750_v59 = vand.u32 2147483647, %v6426_v35 }
 0x3eb   :  { %v3023_v2 = vsel %vm3018_vm7, -inf, %v3022_v10  ;;  %vm6724_vm7 = vmxor %vm3031_vm3, %vm3051_vm4  ;;  %v2737_v9 = vsel %vm6717_vm11, %v2736_v18, %v2732_v8  ;;  %vm2747_vm4 = vweird.f32 %v6637_v34  ;;  %v3495_v31 = vmov 0  }
 0x3ec   :  { %v3024_v5 = vsel %vm3017_vm13, 0.0, %v3023_v2  ;;  %vm6743_vm13 = vmand %vm3047_vm14, %vm6685_vm1  ;;  %v3055_v45 = vsel %vm3031_vm3, 2139095040, %v3495_v31  ;;  %v3068_v32 = vxor.u32 2147483648, %v3067_v12  ;;  %v2768_v16 = vsub.f32 1.0, %v2767_v26 }
 0x3ed   :  { %v3025_v61 = vmul.f32 %v3024_v5, %v6551_v37  ;;  %vm3062_vm1 = vmor %vm6709_vm5, %vm6724_vm7  ;;  %v2753_v10 = vor.u32 1.1754944e-38, %v2752_v11  ;;  %v2762_v58 = vmul.f32 1.442695, %v2761_v3  ;;  %v2722_v54 = vadd.f32 %v2721_v47, %v2705_v38 }
 0x3ee   :  { %vm6763_vm15 = vmand %vm3038_vm2, %vm6731_vm10  ;;  %v3063_v28 = vsel %vm3062_vm1, 2139095040, %v3495_v31  ;;  %vm3050_vm6 = vcmp.lt.s32.totalorder %v6432_v46, 0  ;;  %vm3049_vm3 = vcmp.eq.f32.partialorder %v6432_v46, 1065353216  ;;  %vm3052_vm9 = vcmp.eq.f32.partialorder %v6439_v57, 2139095040 }
 0x3ef   :  { %3413 = vpow2.f32 %v3025_v61  ;;  %vm6775_vm5 = vmor %vm2746_vm0, %vm2747_vm4  ;;  %v3069_v63 = vsel %vm6763_vm15, %v3068_v32, %v3067_v12  ;;  %vm3064_vm11 = vcmp.eq.f32.partialorder %v6432_v46, 3212836864  ;;  %vm3072_vm7 = vcmp.ne.f32.partialorder %v6432_v46, %v6432_v46 }
 0x3f0   :  { %v2749_v35 = vsel %vm6775_vm5, %v6637_v34, %v2745_v15  ;;  %v3065_v25 = vsel %vm3064_vm11, 1065353216, %v3063_v28  ;;  %v2769_v61 = vmul.f32 %v6701_v52, %v2768_v16  ;;  %v3070_v57 = vsel %vm3047_vm14, %v3069_v63, %v3067_v12 }
 0x3f1   :  { %vm3073_vm10 = vcmp.ne.f32.partialorder %v6551_v37, %v6551_v37  ;;  %3415 = vpow2.f32 %v2762_v58  ;;  %v2738_v27 = vmul.f32 9.984369e-06, %v2737_v9  ;;  %vm3029_vm0 = vcmp.eq.f32.partialorder %v6551_v37, 0 }
 0x3f2   :  { %vm3074_vm2 = vmor %vm3072_vm7, %vm3073_vm10  ;;  %3417 = vrcp.f32 %v3522_v17  ;;  %vm3030_vm1 = vcmp.eq.f32.partialorder %v6551_v37, 1065353216  ;;  %v2770_v20 = vadd.f32 %v6701_v52, %v2769_v61  ;;  %vm2772_vm14 = vweird.f32 %v6701_v52 }
 0x3f3   :  { %v2739_v39 = vadd.f32 %v2738_v27, %v2722_v54  ;;  %v2777_v30 = vand.u32 2147483648, %v6420_v48  ;;  %vm2771_vm4 = vweird.f32 %v6420_v48  ;;  %v2775_v37 = vand.u32 2147483647, %v6420_v48 }
 0x3f4   :  { %v2617_v15 = vand.u32 2147483648, %v3522_v17 }
 0x3f5   :  { %v3414_v41 = vpop.eup %3413  ;;  %v2778_v26 = vor.u32 1.1754944e-38, %v2777_v30  ;;  %vm2776_vm5 = vcmp.eq.f32.partialorder %v2775_v37, 8.507059e+37 }
 0x3f6   :  { %v3054_v51 = vsel %vm6743_vm13, 2143289344, %v3414_v41  ;;  %vm2751_vm13 = vcmp.eq.f32.partialorder %v2750_v59, 8.507059e+37  ;;  %v2615_v59 = vand.u32 2147483647, %v3522_v17  ;;  %v2618_v19 = vor.u32 1.1754944e-38, %v2617_v15 }
 0x3f7   :  { %v3056_v2 = vsel %vm3048_vm8, %v3055_v45, %v3054_v51  ;;  %vm3057_vm8 = vmand %vm3050_vm6, %vm6763_vm15  ;;  %v2754_v34 = vsel %vm2751_vm13, %v2753_v10, %v2749_v35  ;;  %v3416_v36 = vpop.eup %3415 }
 0x3f8   :  { %v3058_v5 = vxor.u32 2147483648, %v3056_v2  ;;  %v2755_v62 = vmul.f32 1.5056327e-07, %v2754_v34  ;;  %vm2773_vm15 = vmor %vm2771_vm4, %vm2772_vm14  ;;  %v3418_v56 = vpop.eup %3417 }
 0x3f9   :  { %v2774_v18 = vsel %vm2773_vm15, %v6701_v52, %v2770_v20  ;;  %v2607_v55 = vmul.f32 %v3418_v56, %v3522_v17  ;;  %vm2612_vm6 = vweird.f32 %v3418_v56 }
 0x3fa   :  { %v3059_v42 = vsel %vm3057_vm8, %v3058_v5, %v3056_v2  ;;  %v2756_v24 = vadd.f32 %v2755_v62, %v2739_v39  ;;  %v2779_v49 = vsel %vm2776_vm5, %v2778_v26, %v2774_v18  ;;  %vm2616_vm8 = vcmp.eq.f32.partialorder %v2615_v59, 8.507059e+37 }
 0x3fb   :  { %v3066_v44 = vsel %vm3028_vm12, %v3065_v25, %v3059_v42  ;;  %vm3076_vm12 = vmor %vm3049_vm3, %vm3029_vm0  ;;  %v2608_v3 = vsub.f32 1.0, %v2607_v55  ;;  %vm2611_vm3 = vweird.f32 %v3522_v17 }
 0x3fc   :  { %v3071_v53 = vsel %vm3052_vm9, %v3070_v57, %v3066_v44  ;;  %vm2613_vm9 = vmor %vm2611_vm3, %vm2612_vm6 }
 0x3fd   :  { %v3075_v21 = vsel %vm3074_vm2, 2143289344, %v3071_v53  ;;  %v2609_v52 = vmul.f32 %v3418_v56, %v2608_v3 }
 0x3fe   :  { %v3077_v0 = vsel %vm3076_vm12, 1065353216, %v3075_v21 }
 0x3ff   :  { %v3078_v1 = vsel %vm3030_vm1, %v6432_v46, %v3077_v0  ;;  %v2610_v9 = vadd.f32 %v3418_v56, %v2609_v52 }
 0x400   :  { %v2760_v40 = vmul.f32 2.5066283, %v3078_v1 }
 0x402   :  { %v2764_v8 = vmul.f32 %v3416_v36, %v2760_v40 }
 0x404   :  { %v2765_v11 = vmul.f32 %v2764_v8, %v2756_v24 }
 0x406   :  { %v2780_v46 = vmul.f32 %v2779_v49, %v2765_v11 }
 0x408   :  { %v6813_v12 = vmul.f32 %v2780_v46, %v6420_v48 }
 0x40a   :  { %v6817_v38 = vmul.f32 %v6813_v12, %v6423_v4 }
 0x40c   :  { %v6821_v47 = vmul.f32 %v6817_v38, %v6429_v50  ;;  %v2614_v50 = vsel %vm2613_vm9, %v3418_v56, %v2610_v9 }
 0x40d   :  { %v2619_v51 = vsel %vm2616_vm8, %v2618_v19, %v2614_v50 }
 0x40e   :  { %v6825_v41 = vmul.f32 %v6821_v47, %v6436_v22  ;;  %v2620_v31 = vmul.f32 %v2619_v51, %v6420_v48  ;;  %v2823_v30 = vand.u32 2147483647, %v6821_v47 }
 0x410   :  { %v6832_v4 = vmul.f32 %v6825_v41, %v6444_v43  ;;  %v6867_v35 = vmul.f32 %v2620_v31, %v3510_v6  ;;  %v6870_v42 = vmul.f32 %v2620_v31, %v3512_v7 }
 0x412   :  { %v6836_v22 = vmul.f32 %v6832_v4, %v6451_v23  ;;  %vm2851_vm6 = vweird.f32 %v6832_v4 }
 0x414   :  { %3419 = vrcp.f32 %v6836_v22  ;;  %v6842_v17 = vmul.f32 %v6836_v22, %v6476_v60  ;;  %vm2867_vm14 = vweird.f32 %v6836_v22  ;;  %v2873_v11 = vand.u32 2147483648, %v6836_v22 }
 0x415   :  { %3421 = vlog2.f32 %v2620_v31  ;;  %v2871_v55 = vand.u32 2147483647, %v6836_v22 }
 0x416   :  { %3423 = vrcp.f32 %v6842_v17  ;;  %v2893_v43 = vmul.f32 %v6842_v17, %v6483_v33  ;;  %vm2883_vm10 = vweird.f32 %v6842_v17  ;;  %v2887_v62 = vand.u32 2147483647, %v6842_v17 }
 0x417   :  { %3425 = vrcp.f32 %v6832_v4  ;;  %vm2872_vm3 = vcmp.eq.f32.partialorder %v2871_v55, 8.507059e+37 }
 0x418   :  { %3427 = vrcp.f32 %v6825_v41  ;;  %v2903_v7 = vand.u32 2147483647, %v2893_v43  ;;  %v2905_v34 = vand.u32 2147483648, %v2893_v43  ;;  %vm2899_vm0 = vweird.f32 %v2893_v43 }
 0x419   :  { %3429 = vrcp.f32 %v2893_v43  ;;  %vm2888_vm4 = vcmp.eq.f32.partialorder %v2887_v62, 8.507059e+37 }
 0x41a   :  { %v6849_v23 = vpop.eup %3419  ;;  %3431 = vrcp.f32 %v6817_v38  ;;  %v2906_v24 = vor.u32 1.1754944e-38, %v2905_v34  ;;  %vm2904_vm12 = vcmp.eq.f32.partialorder %v2903_v7, 8.507059e+37 }
 0x41b   :  { %v3422_v45 = vpop.eup %3421  ;;  %v2863_v60 = vmul.f32 %v6849_v23, %v6836_v22  ;;  %3433 = vrcp.f32 %v6821_v47  ;;  %vm2868_vm2 = vweird.f32 %v6849_v23 }
 0x41c   :  { %v6851_v32 = vpop.eup %3423  ;;  %v2912_v33 = vmul.f32 0.6931472, %v3422_v45  ;;  %3435 = vrcp.f32 %v6813_v12  ;;  %vm6919_vm5 = vmor %vm2867_vm14, %vm2868_vm2  ;;  %v2874_v45 = vor.u32 1.1754944e-38, %v2873_v11  ;;  %vm2803_vm14 = vweird.f32 %v6817_v38 }
 0x41d   :  { %v6853_v16 = vpop.eup %3425  ;;  %v2879_v10 = vmul.f32 %v6851_v32, %v6842_v17  ;;  %v2864_v29 = vsub.f32 1.0, %v2863_v60  ;;  %vm2884_vm11 = vweird.f32 %v6851_v32 }
 0x41e   :  { %v6861_v2 = vpop.eup %3427  ;;  %v2847_v54 = vmul.f32 %v6853_v16, %v6832_v4  ;;  %v2913_v25 = vadd.f32 %v2912_v33, %v3516_v13  ;;  %v6879_v27 = vadd.f32 %v2912_v33, %v3518_v14  ;;  %v2889_v14 = vand.u32 2147483648, %v6842_v17  ;;  %vm6897_vm13 = vmor %vm2883_vm10, %vm2884_vm11 }
 0x41f   :  { %v2880_v28 = vsub.f32 1.0, %v2879_v10  ;;  %v3430_v58 = vpop.eup %3429  ;;  %v2831_v44 = vmul.f32 %v6861_v2, %v6825_v41  ;;  %v2865_v13 = vmul.f32 %v6849_v23, %v2864_v29  ;;  %vm2852_vm15 = vweird.f32 %v6853_v16 }
 0x420   :  { %v2895_v63 = vmul.f32 %v3430_v58, %v2893_v43  ;;  %v6873_v61 = vpop.eup %3431  ;;  %v2848_v6 = vsub.f32 1.0, %v2847_v54  ;;  %vm2900_vm7 = vweird.f32 %v3430_v58  ;;  %v6893_v20 = vmul.f32 %v2913_v25, %v6420_v48  ;;  %vm6939_vm8 = vmor %vm2851_vm6, %vm2852_vm15 }
 0x421   :  { %v2881_v5 = vmul.f32 %v6851_v32, %v2880_v28  ;;  %v6881_v53 = vpop.eup %3433  ;;  %v6888_v0 = vmul.f32 %v6873_v61, %v6817_v38  ;;  %v2832_v37 = vsub.f32 1.0, %v2831_v44  ;;  %vm2901_vm1 = vmor %vm2899_vm0, %vm2900_vm7  ;;  %v2866_v18 = vadd.f32 %v6849_v23, %v2865_v13 }
 0x422   :  { %v2896_v57 = vsub.f32 1.0, %v2895_v63  ;;  %v2815_v1 = vmul.f32 %v6881_v53, %v6821_v47  ;;  %v2849_v36 = vmul.f32 %v6853_v16, %v2848_v6  ;;  %v6904_v8 = vpop.eup %3435  ;;  %v2890_v49 = vor.u32 1.1754944e-38, %v2889_v14 }
 0x423   :  { %v2882_v21 = vadd.f32 %v6851_v32, %v2881_v5  ;;  %v2833_v15 = vmul.f32 %v6861_v2, %v2832_v37  ;;  %v2870_v51 = vsel %vm6919_vm5, %v6849_v23, %v2866_v18  ;;  %v2783_v17 = vmul.f32 %v6904_v8, %v6813_v12 }
 0x424   :  { %v2897_v39 = vmul.f32 %v3430_v58, %v2896_v57  ;;  %v2816_v9 = vsub.f32 1.0, %v2815_v1  ;;  %v2850_v19 = vadd.f32 %v6853_v16, %v2849_v36  ;;  %v2857_v43 = vand.u32 2147483648, %v6832_v4 }
 0x425   :  { %v2886_v56 = vsel %vm6897_vm13, %v6851_v32, %v2882_v21  ;;  %v2855_v32 = vand.u32 2147483647, %v6832_v4  ;;  %v2800_v33 = vsub.f32 1.0, %v6888_v0  ;;  %vm2836_vm9 = vweird.f32 %v6861_v2 }
 0x426   :  { %v2898_v40 = vadd.f32 %v3430_v58, %v2897_v39  ;;  %v2891_v50 = vsel %vm2888_vm4, %v2890_v49, %v2886_v56  ;;  %v2817_v23 = vmul.f32 %v6881_v53, %v2816_v9  ;;  %v2834_v4 = vadd.f32 %v6861_v2, %v2833_v15 }
 0x427   :  { %v2854_v54 = vsel %vm6939_vm8, %v6853_v16, %v2850_v19  ;;  %vm2835_vm11 = vweird.f32 %v6825_v41  ;;  %v2841_v63 = vand.u32 2147483648, %v6825_v41  ;;  %v2858_v25 = vor.u32 1.1754944e-38, %v2857_v43 }
 0x428   :  { %v2902_v26 = vsel %vm2901_vm1, %v3430_v58, %v2898_v40  ;;  %v2875_v58 = vsel %vm2872_vm3, %v2874_v45, %v2870_v51  ;;  %v2944_v44 = vmul.f32 %v6879_v27, %v6420_v48  ;;  %v2839_v57 = vand.u32 2147483647, %v6825_v41  ;;  %vm6958_vm13 = vmor %vm2835_vm11, %vm2836_vm9 }
 0x429   :  { %v2907_v46 = vsel %vm2904_vm12, %v2906_v24, %v2902_v26  ;;  %vm2856_vm7 = vcmp.eq.f32.partialorder %v2855_v32, 8.507059e+37  ;;  %v2784_v34 = vsub.f32 1.0, %v2783_v17  ;;  %v2801_v16 = vmul.f32 %v6873_v61, %v2800_v33 }
 0x42a   :  { %v2915_v3 = vmul.f32 %v6867_v35, %v2907_v46  ;;  %v2916_v52 = vmul.f32 %v6870_v42, %v2907_v46  ;;  %vm2820_vm10 = vweird.f32 %v6881_v53  ;;  %v2859_v21 = vsel %vm2856_vm7, %v2858_v25, %v2854_v54 }
 0x42b   :  { %v2818_v48 = vadd.f32 %v6881_v53, %v2817_v23  ;;  %v2838_v41 = vsel %vm6958_vm13, %v6861_v2, %v2834_v4  ;;  %vm2819_vm0 = vweird.f32 %v6821_v47  ;;  %v2825_v0 = vand.u32 2147483648, %v6821_v47 }
 0x42c   :  { %v2917_v22 = vadd.f32 %v2915_v3, %v2891_v50  ;;  %v2918_v31 = vadd.f32 %v2916_v52, %v2891_v50  ;;  %v2842_v14 = vor.u32 1.1754944e-38, %v2841_v63  ;;  %v2945_v1 = vsub.f32 %v6893_v20, %v6867_v35  ;;  %vm6977_vm12 = vmor %vm2819_vm0, %vm2820_vm10 }
 0x42d   :  { %vm2840_vm2 = vcmp.eq.f32.partialorder %v2839_v57, 8.507059e+37  ;;  %v2785_v37 = vmul.f32 %v6904_v8, %v2784_v34  ;;  %vm2804_vm1 = vweird.f32 %v6873_v61  ;;  %v2946_v20 = vsub.f32 %v2944_v44, %v6870_v42 }
 0x42e   :  { %v2919_v60 = vmul.f32 %v2917_v22, %v6867_v35  ;;  %v2920_v10 = vmul.f32 %v2918_v31, %v6870_v42  ;;  %v2843_v36 = vsel %vm2840_vm2, %v2842_v14, %v2838_v41  ;;  %v2802_v47 = vadd.f32 %v6873_v61, %v2801_v16  ;;  %vm6994_vm5 = vmor %vm2803_vm14, %vm2804_vm1 }
 0x42f   :  { %v2822_v24 = vsel %vm6977_vm12, %v6881_v53, %v2818_v48  ;;  %v2809_v26 = vand.u32 2147483648, %v6817_v38  ;;  %v2826_v11 = vor.u32 1.1754944e-38, %v2825_v0  ;;  %v2947_v49 = vmul.f32 1.442695, %v2945_v1 }
 0x430   :  { %v2921_v29 = vadd.f32 %v2919_v60, %v2875_v58  ;;  %v2922_v5 = vadd.f32 %v2920_v10, %v2875_v58  ;;  %v2807_v46 = vand.u32 2147483647, %v6817_v38  ;;  %vm2824_vm4 = vcmp.eq.f32.partialorder %v2823_v30, 8.507059e+37 }
 0x431   :  { %vm2788_vm15 = vweird.f32 %v6904_v8  ;;  %v2827_v52 = vsel %vm2824_vm4, %v2826_v11, %v2822_v24  ;;  %v2949_v9 = vmul.f32 1.442695, %v2946_v20  ;;  %v2786_v15 = vadd.f32 %v6904_v8, %v2785_v37 }
 0x432   :  { %v2923_v6 = vmul.f32 %v2921_v29, %v6867_v35  ;;  %v2924_v7 = vmul.f32 %v2922_v5, %v6870_v42  ;;  %v2806_v38 = vsel %vm6994_vm5, %v6873_v61, %v2802_v47  ;;  %vm2787_vm6 = vweird.f32 %v6813_v12 }
 0x433   :  { %v2793_v19 = vand.u32 2147483648, %v6813_v12  ;;  %v2810_v51 = vor.u32 1.1754944e-38, %v2809_v26  ;;  %3437 = vpow2.f32 %v2947_v49  ;;  %v2791_v22 = vand.u32 2147483647, %v6813_v12  ;;  %vm2789_vm9 = vmor %vm2787_vm6, %vm2788_vm15 }
 0x434   :  { %v2925_v27 = vadd.f32 %v2923_v6, %v2859_v21  ;;  %v2926_v39 = vadd.f32 %v2924_v7, %v2859_v21  ;;  %vm2808_vm3 = vcmp.eq.f32.partialorder %v2807_v46, 8.507059e+37  ;;  %3439 = vpow2.f32 %v2949_v9 }
 0x435   :  { %v2811_v43 = vsel %vm2808_vm3, %v2810_v51, %v2806_v38  ;;  %v2790_v61 = vsel %vm2789_vm9, %v6904_v8, %v2786_v15  ;;  %v2794_v60 = vor.u32 1.1754944e-38, %v2793_v19  ;;  %vm2792_vm8 = vcmp.eq.f32.partialorder %v2791_v22, 8.507059e+37 }
 0x436   :  { %v2927_v62 = vmul.f32 %v2925_v27, %v6867_v35  ;;  %v2928_v40 = vmul.f32 %v2926_v39, %v6870_v42 }
 0x437   :  { %v2795_v23 = vsel %vm2792_vm8, %v2794_v60, %v2790_v61 }
 0x438   :  { %v2929_v18 = vadd.f32 %v2927_v62, %v2843_v36  ;;  %v2930_v56 = vadd.f32 %v2928_v40, %v2843_v36 }
 0x439   :  { %v3438_v33 = vpop.eup %3437 }
 0x43a   :  { %v2931_v55 = vmul.f32 %v2929_v18, %v6867_v35  ;;  %v2932_v3 = vmul.f32 %v2930_v56, %v6870_v42  ;;  %v3440_v4 = vpop.eup %3439 }
 0x43c   :  { %v2933_v59 = vadd.f32 %v2931_v55, %v2827_v52  ;;  %v2934_v50 = vadd.f32 %v2932_v3, %v2827_v52 }
 0x43e   :  { %v2935_v31 = vmul.f32 %v2933_v59, %v6867_v35  ;;  %v2936_v17 = vmul.f32 %v2934_v50, %v6870_v42 }
 0x440   :  { %v2937_v45 = vadd.f32 %v2935_v31, %v2811_v43  ;;  %v2938_v32 = vadd.f32 %v2936_v17, %v2811_v43 }
 0x442   :  { %v2939_v10 = vmul.f32 %v2937_v45, %v6867_v35  ;;  %v2940_v12 = vmul.f32 %v2938_v32, %v6870_v42 }
 0x444   :  { %v2941_v28 = vadd.f32 %v2939_v10, %v2795_v23  ;;  %v2942_v58 = vadd.f32 %v2940_v12, %v2795_v23 }
 0x446   :  { %v2951_v54 = vmul.f32 %v3438_v33, %v2941_v28  ;;  %v2952_v29 = vmul.f32 %v3440_v4, %v2942_v58 }
 0x448   :  { %v2953_v5 = vand.u32 2147483647, %v2951_v54  ;;  %v2954_v63 = vand.u32 2147483647, %v2952_v29 }
 0x44a   :  { %vm2955_vm11 = vcmp.le.f32.partialorder %v2953_v5, 3.4028235e+38  ;;  %vm2956_vm7 = vcmp.le.f32.partialorder %v2954_v63, 3.4028235e+38 }
 0x44b   :  { %v2957_v35 = vsel %vm2955_vm11, %v2951_v54, 0.0  ;;  %v2958_v8 = vsel %vm2956_vm7, %v2952_v29, 0.0 }
 0x44c   :  { %2959 = vst [vmem:[#allocation5] sm:$0xff] %v2957_v35 }
 0x44d   :  { %2960 = vst [vmem:[#allocation5 + $0x8] sm:$0xff] %v2958_v8 }
 0x44e   :  { %2971 = dma.vmem_to_hbm [thread:$0]  %s2967_s11, 256, %s2969_s14, [#allocation4]  }
 0x44f   :  { %3491 = dma.done.wait [#allocation4], 256  }
 0x450   :  { %3492 = vsyncadd [#allocation4], 4294967040 }
 0x451   :  { %2976 = vsyncpa [#allocation3], 1 }
 0x452   :  { %2977 = vsyncpa [#allocation4], 1 }

</bundles_post_ra>
